<compile_context>
chip_gen: v6e
topology: v6e:2x2x1
jax: 0.10.0
libtpu: 0.0.40
codegen_flags: <defaults>
</compile_context>

<pallas_src>
import functools

import jax
import jax.numpy as jnp
from jax import lax
from jax.experimental import pallas as pl
from jax.experimental.pallas import tpu as pltpu

_NCAND = 80                        # torch: for i in range(80)
_BATCHED_MAX_ELEMS = 128 * 1024    # padded sizes up to this use the batched path


def _physical_vmem_bytes() -> int:
    """Per-TensorCore physical VMEM (128 MiB v5e/v6e, 64 MiB v7x)."""
    try:
        v = int(getattr(pltpu.get_tpu_info(), "vmem_capacity_bytes", 0))
        if v > 0:
            return v
    except Exception:
        pass
    return 64 * 1024 * 1024        # conservative (v7x-sized) default


# ---------------------------------------------------------------------------
# Kernel 1: candidate-batched search (small / module-sized tensors).
# Data lives on the lane axis (shape (1, N)); a chunk of candidates lives on
# the sublane axis, so each chunk is one vectorized VPU pass + one lane-reduce
# per candidate. Selection (first global min, strict '>') happens after the
# loop from scalar (best_sse, best_idx) only.
# ---------------------------------------------------------------------------
def _quantizer_batched_kernel(x_ref, o_ref, *, bit, n_valid, n_total, cand_chunk):
    qmax = jnp.float32(2 ** bit - 1)
    x = x_ref[...].astype(jnp.float32)                     # (1, N)
    n_pad = n_total - n_valid

    # ---- per-tensor min / max (asymmetric); mask padded zeros once ----
    if n_pad:
        lane = lax.broadcasted_iota(jnp.int32, x.shape, 1)
        valid = lane < n_valid
        x_min = jnp.min(jnp.where(valid, x, jnp.inf))
        x_max = jnp.max(jnp.where(valid, x, -jnp.inf))
    else:
        x_min = jnp.min(x)
        x_max = jnp.max(x)
    max_range = x_max - x_min

    n_chunks = _NCAND // cand_chunk

    # qdq(x) - x = scale * (clip(round(x/scale), -off, qmax-off) - x/scale)
    #   => SSE_i = scale_i^2 * sum(err_scaled^2)   (monotone -> same argmin)
    def chunk_body(c, carry):
        best_sse, best_idx = carry
        start = c * cand_chunk
        cand = (start + lax.broadcasted_iota(jnp.int32, (cand_chunk, 1), 0)
                ).astype(jnp.float32)                      # (C,1) exact ints
        scale = (max_range - 0.01 * cand) / qmax           # (C,1)
        inv_scale = 1.0 / scale                            # tiny per-candidate recip
        offset = jnp.round(-x_min / scale)                 # exact divide, (C,1)
        lo = -offset
        hi = qmax - offset
        xs = x * inv_scale                                 # (C,N): 1 vmul / elem
        e = jnp.clip(jnp.round(xs), lo, hi) - xs
        sse = jnp.sum(e * e, axis=1, keepdims=True)        # (C,1) lane-reduce
        if n_pad:
            # padded elements are exactly 0 -> one scalar error per candidate
            e_pad = jnp.clip(jnp.zeros_like(offset), lo, hi)
            sse = sse - jnp.float32(n_pad) * (e_pad * e_pad)
        sse = (scale * scale) * sse
        # NaN candidates (scale == 0 for nearly-constant tensors) are skipped,
        # exactly like torch's strict '>' against a NaN mean.
        sse = jnp.where(jnp.isnan(sse), jnp.float32(jnp.inf), sse)
        c_min = jnp.min(sse)
        c_idx = jnp.min(jnp.where(sse == c_min, cand, jnp.float32(_NCAND)))
        better = best_sse > c_min                          # strict '>' as in torch
        return (jnp.where(better, c_min, best_sse),
                jnp.where(better, c_idx, best_idx))

    init = (jnp.float32(jnp.inf), jnp.float32(0.0))
    _, best_idx = lax.fori_loop(0, n_chunks, chunk_body, init)

    # Recompute (scale, offset) from the winning index: bit-identical formula,
    # avoids any dynamic gather. Negative-scale winners (max_range < 0.01*i)
    # faithfully mirror the torch module's behaviour.
    best_scale = (max_range - 0.01 * best_idx) / qmax
    best_offset = jnp.round(-x_min / best_scale)
    # final quant-dequant keeps the exact divide-based formula (torch parity)
    x_q = jnp.clip(jnp.round(x / best_scale) + best_offset, 0.0, qmax)
    o_ref[...] = ((x_q - best_offset) * best_scale).astype(o_ref.dtype)


# ---------------------------------------------------------------------------
# Kernel 2: scalar-carry candidate loop (large tensors, still single block).
# Whole-slab VPU work per candidate; carry is just (best_sse, best_idx).
# ---------------------------------------------------------------------------
def _quantizer_loop_kernel(x_ref, o_ref, *, bit, n_valid, n_total):
    qmax = jnp.float32(2 ** bit - 1)
    x = x_ref[...].astype(jnp.float32)                     # (rows, lanes)
    n_pad = n_total - n_valid

    if n_pad:
        rows, lanes = x_ref.shape
        flat = (lax.broadcasted_iota(jnp.int32, (rows, lanes), 0) * lanes
                + lax.broadcasted_iota(jnp.int32, (rows, lanes), 1))
        valid = flat < n_valid
        x_min = jnp.min(jnp.where(valid, x, jnp.inf))
        x_max = jnp.max(jnp.where(valid, x, -jnp.inf))
    else:
        x_min = jnp.min(x)
        x_max = jnp.max(x)
    max_range = x_max - x_min

    def body(i, carry):
        best_sse, best_idx = carry
        i_f = i.astype(jnp.float32)
        scale = (max_range - 0.01 * i_f) / qmax
        inv_scale = 1.0 / scale                            # scalar reciprocal
        offset = jnp.round(-x_min / scale)                 # scalar, exact divide
        lo = -offset
        hi = qmax - offset
        xs = x * inv_scale                                 # 1 vmul, no vdiv
        e = jnp.clip(jnp.round(xs), lo, hi) - xs
        sse = jnp.sum(e * e)
        if n_pad:
            e_pad = jnp.clip(jnp.float32(0.0), lo, hi)     # analytic pad fix
            sse = sse - jnp.float32(n_pad) * (e_pad * e_pad)
        sse = (scale * scale) * sse
        better = best_sse > sse                            # strict '>' (skips NaN)
        return (jnp.where(better, sse, best_sse),
                jnp.where(better, i_f, best_idx))

    init = (jnp.float32(jnp.inf), jnp.float32(0.0))
    _, best_idx = lax.fori_loop(0, _NCAND, body, init, unroll=4)

    best_scale = (max_range - 0.01 * best_idx) / qmax
    best_offset = jnp.round(-x_min / best_scale)
    x_q = jnp.clip(jnp.round(x / best_scale) + best_offset, 0.0, qmax)
    o_ref[...] = ((x_q - best_offset) * best_scale).astype(o_ref.dtype)


def _choose_layout(total: int):
    """Lane-dense 2D slab for the large-tensor path (rows % 8 == 0, lanes % 128 == 0)."""
    for lanes in (1024, 512, 256, 128):
        if total % lanes == 0 and (total // lanes) % 8 == 0:
            return total // lanes, lanes, total
    padded = ((total + 1023) // 1024) * 1024   # pad to a multiple of 8*128
    return padded // 128, 128, padded


def quantizer_forward(x_f, *, bit: int = 8, is_quantize: bool = True,
                      force_loop_path: bool = False):
    """Forward pass of Quantizer (mse / asymmetric / per-tensor). x_f is NCHW."""
    if not is_quantize:
        # module returns the input unchanged when quantization is disabled
        return x_f

    orig_shape = x_f.shape
    total = int(x_f.size)
    itemsize = jnp.dtype(x_f.dtype).itemsize

    # Per-generation VMEM budgeting (128 MiB v5e/v6e -> ~96 MiB limit; 64 MiB
    # v7x -> ~48 MiB limit). No grid => single invocation, single-buffered.
    phys = _physical_vmem_bytes()
    vmem_limit = int((phys * 3) // 4)
    budget = max(vmem_limit - (8 << 20), 16 << 20)   # headroom for compiler scratch

    use_batched = (total <= _BATCHED_MAX_ELEMS) and not force_loop_path

    if use_batched:
        padded = ((total + 127) // 128) * 128
        rows, lanes = 1, padded
        # conservative base: assume 8x sublane padding for the (1, N) layout
        base = 8 * padded * (2 * itemsize + 4)
        cand_chunk = 1
        for c in (80, 40, 20, 16, 10, 8, 5, 4, 2, 1):
            if base + 4 * c * padded * 4 <= budget:
                cand_chunk = c
                break
        kernel = functools.partial(_quantizer_batched_kernel, bit=bit,
                                   n_valid=total, n_total=padded,
                                   cand_chunk=cand_chunk)
    else:
        rows, lanes, padded = _choose_layout(total)
        # input + output + f32 working copy + a few full-size temporaries
        working_bytes = padded * (2 * itemsize + 4 + 16)
        assert working_bytes <= budget, (
            "tensor too large for the single-block kernel on this TPU "
            "generation; TODO(synk): tiled 3-pass path (see header comment)")
        kernel = functools.partial(_quantizer_loop_kernel, bit=bit,
                                   n_valid=total, n_total=padded)

    x_flat = x_f.reshape(-1)
    if padded != total:
        x_flat = jnp.pad(x_flat, (0, padded - total))
    x2d = x_flat.reshape(rows, lanes)

    cost = pl.CostEstimate(
        flops=int(_NCAND * 6 * padded + 5 * padded),   # search dominates
        transcendentals=int(padded + 2 * _NCAND),
        bytes_accessed=int(2 * itemsize * padded),
    )

    out2d = pl.pallas_call(
        kernel,
        out_shape=jax.ShapeDtypeStruct((rows, lanes), x_f.dtype),
        compiler_params=pltpu.CompilerParams(vmem_limit_bytes=vmem_limit),
        cost_estimate=cost,
    )(x2d)

    out_flat = out2d.reshape(-1)
    if padded != total:
        out_flat = out_flat[:total]
    return out_flat.reshape(orig_shape)


def _reference_forward(x_f, bit=8):
    """Pure-JAX reference faithful to the torch module (sanity check)."""
    x = x_f.astype(jnp.float32)
    x_min, x_max = jnp.min(x), jnp.max(x)
    max_range = x_max - x_min
    qmax = float(2 ** bit - 1)

    def qdq(xv, scale, offset):
        x_q = jnp.clip(jnp.round(xv / scale) + offset, 0.0, qmax)
        return (x_q - offset) * scale

    def body(i, carry):
        bm, bs, bo = carry
        scale = (max_range - 0.01 * i.astype(jnp.float32)) / qmax
        offset = jnp.round(-x_min / scale)
        mse = jnp.mean((qdq(x, scale, offset) - x) ** 2)
        better = bm > mse
        return (jnp.where(better, mse, bm),
                jnp.where(better, scale, bs),
                jnp.where(better, offset, bo))

    init = (jnp.float32(jnp.inf), jnp.float32(1.0), jnp.float32(0.0))
    _, s, o = lax.fori_loop(0, _NCAND, body, init)
    return qdq(x, s, o).astype(x_f.dtype)


if __name__ == "__main__":
    key = jax.random.PRNGKey(0)
    # NCHW input consistent with the 4-D branch of quant_dequant
    x = jax.random.normal(key, (2, 4, 16, 16), dtype=jnp.float32)

    ref = jax.block_until_ready(_reference_forward(x, bit=8))

    # primary (candidate-batched) path
    out = jax.block_until_ready(quantizer_forward(x, bit=8, is_quantize=True))
    assert out.shape == x.shape and out.dtype == x.dtype
    assert jnp.allclose(out, ref, atol=1e-5, rtol=1e-5)

    # large-tensor fallback path, exercised on the same small input
    out2 = jax.block_until_ready(
        quantizer_forward(x, bit=8, is_quantize=True, force_loop_path=True))
    assert jnp.allclose(out2, ref, atol=1e-5, rtol=1e-5)

    # TODO(synk): scheme='kl_divergence' calibration (numpy histogram KL) and
    # the stateful running min/max across multiple forward calls have no
    # in-kernel equivalent within a single forward(); omitted.
    print("KERNEL_OK")
</pallas_src>

<mosaic_0001>
module attributes {stable_mosaic.version = 11 : i64} {
  func.func @_quantizer_batched_kernel(%arg0: memref<1x2048xf32, #tpu.memory_space<vmem>>, %arg1: memref<1x2048xf32, #tpu.memory_space<vmem>>) attributes {dimension_semantics = [], scalar_prefetch = 0 : i64, scratch_operands = 0 : i64, tpu.core_type = #tpu.core_type<tc>} {
    %c0 = arith.constant 0 : index
    %c0_0 = arith.constant 0 : index
    %0 = vector.load %arg0[%c0, %c0_0] : memref<1x2048xf32, #tpu.memory_space<vmem>>, vector<1x2048xf32>
    %1 = vector.shape_cast %0 : vector<1x2048xf32> to vector<1x1x2048xf32>
    %cst = arith.constant dense<0x7F800000> : vector<1xf32>
    %2 = vector.multi_reduction <minimumf>, %1, %cst [1, 2] : vector<1x1x2048xf32> to vector<1xf32>
    %3 = vector.shape_cast %2 : vector<1xf32> to vector<1x1x1xf32>
    %4 = vector.extract %3[0, 0, 0] : f32 from vector<1x1x1xf32>
    %5 = vector.shape_cast %0 : vector<1x2048xf32> to vector<1x1x2048xf32>
    %cst_1 = arith.constant dense<0xFF800000> : vector<1xf32>
    %6 = vector.multi_reduction <maximumf>, %5, %cst_1 [1, 2] : vector<1x1x2048xf32> to vector<1xf32>
    %7 = vector.shape_cast %6 : vector<1xf32> to vector<1x1x1xf32>
    %8 = vector.extract %7[0, 0, 0] : f32 from vector<1x1x1xf32>
    %9 = arith.subf %8, %4 : f32
    %cst_2 = arith.constant 2.550000e+02 : f32
    %cst_3 = arith.constant 0x7F800000 : f32
    %cst_4 = arith.constant 0.000000e+00 : f32
    %c0_i32 = arith.constant 0 : i32
    %c80_i32 = arith.constant 80 : i32
    %10 = arith.muli %c0_i32, %c80_i32 : i32
    %11 = tpu.iota {dimensions = array<i32: 0>} : vector<80x1xi32>
    %12 = vector.broadcast %10 : i32 to vector<80x1xi32>
    %13 = arith.addi %12, %11 : vector<80x1xi32>
    %14 = arith.sitofp %13 : vector<80x1xi32> to vector<80x1xf32>
    %cst_5 = arith.constant 0.00999999977 : f32
    %15 = vector.broadcast %cst_5 : f32 to vector<80x1xf32>
    %16 = arith.mulf %15, %14 : vector<80x1xf32>
    %17 = vector.broadcast %9 : f32 to vector<80x1xf32>
    %18 = arith.subf %17, %16 : vector<80x1xf32>
    %19 = vector.broadcast %cst_2 : f32 to vector<80x1xf32>
    %20 = arith.divf %18, %19 : vector<80x1xf32>
    %cst_6 = arith.constant 1.000000e+00 : f32
    %21 = vector.broadcast %cst_6 : f32 to vector<80x1xf32>
    %22 = arith.divf %21, %20 : vector<80x1xf32>
    %cst_7 = arith.constant 0.000000e+00 : f32
    %23 = arith.subf %cst_7, %4 : f32
    %24 = vector.broadcast %23 : f32 to vector<80x1xf32>
    %25 = arith.divf %24, %20 : vector<80x1xf32>
    %26 = math.roundeven %25 : vector<80x1xf32>
    %cst_8 = arith.constant 0.000000e+00 : f32
    %27 = vector.broadcast %cst_8 : f32 to vector<80x1xf32>
    %28 = arith.subf %27, %26 : vector<80x1xf32>
    %29 = vector.broadcast %cst_2 : f32 to vector<80x1xf32>
    %30 = arith.subf %29, %26 : vector<80x1xf32>
    %31 = vector.broadcast %0 : vector<1x2048xf32> to vector<80x2048xf32>
    %32 = vector.broadcast %22 : vector<80x1xf32> to vector<80x2048xf32>
    %33 = arith.mulf %31, %32 : vector<80x2048xf32>
    %34 = math.roundeven %33 : vector<80x2048xf32>
    %35 = vector.broadcast %28 : vector<80x1xf32> to vector<80x2048xf32>
    %36 = arith.maximumf %35, %34 : vector<80x2048xf32>
    %37 = vector.broadcast %30 : vector<80x1xf32> to vector<80x2048xf32>
    %38 = arith.minimumf %37, %36 : vector<80x2048xf32>
    %39 = arith.subf %38, %33 : vector<80x2048xf32>
    %40 = arith.mulf %39, %39 : vector<80x2048xf32>
    %cst_9 = arith.constant dense<0.000000e+00> : vector<80xf32>
    %41 = vector.multi_reduction <add>, %40, %cst_9 [1] : vector<80x2048xf32> to vector<80xf32>
    %42 = vector.shape_cast %41 : vector<80xf32> to vector<80x1xf32>
    %43 = arith.mulf %20, %20 : vector<80x1xf32>
    %44 = arith.mulf %43, %42 : vector<80x1xf32>
    %45 = arith.cmpf one, %44, %44 : vector<80x1xf32>
    %cst_10 = arith.constant 0x7F800000 : f32
    %46 = vector.broadcast %cst_10 : f32 to vector<80x1xf32>
    %47 = arith.select %45, %46, %44 : vector<80x1xi1>, vector<80x1xf32>
    %48 = vector.shape_cast %47 : vector<80x1xf32> to vector<1x80x1xf32>
    %cst_11 = arith.constant dense<0x7F800000> : vector<1xf32>
    %49 = vector.multi_reduction <minimumf>, %48, %cst_11 [1, 2] : vector<1x80x1xf32> to vector<1xf32>
    %50 = vector.shape_cast %49 : vector<1xf32> to vector<1x1x1xf32>
    %51 = vector.extract %50[0, 0, 0] : f32 from vector<1x1x1xf32>
    %52 = vector.broadcast %51 : f32 to vector<80x1xf32>
    %53 = arith.cmpf oeq, %47, %52 : vector<80x1xf32>
    %cst_12 = arith.constant 8.000000e+01 : f32
    %54 = vector.broadcast %cst_12 : f32 to vector<80x1xf32>
    %55 = arith.select %53, %14, %54 : vector<80x1xi1>, vector<80x1xf32>
    %56 = vector.shape_cast %55 : vector<80x1xf32> to vector<1x80x1xf32>
    %cst_13 = arith.constant dense<0x7F800000> : vector<1xf32>
    %57 = vector.multi_reduction <minimumf>, %56, %cst_13 [1, 2] : vector<1x80x1xf32> to vector<1xf32>
    %58 = vector.shape_cast %57 : vector<1xf32> to vector<1x1x1xf32>
    %59 = vector.extract %58[0, 0, 0] : f32 from vector<1x1x1xf32>
    %60 = arith.cmpf ogt, %cst_3, %51 : f32
    %61 = arith.select %60, %51, %cst_3 : f32
    %62 = arith.select %60, %59, %cst_4 : f32
    %c1_i32 = arith.constant 1 : i32
    %cst_14 = arith.constant 0.00999999977 : f32
    %63 = arith.mulf %cst_14, %62 : f32
    %64 = arith.subf %9, %63 : f32
    %cst_15 = arith.constant 2.550000e+02 : f32
    %65 = arith.divf %64, %cst_15 : f32
    %cst_16 = arith.constant 0.000000e+00 : f32
    %66 = arith.subf %cst_16, %4 : f32
    %67 = arith.divf %66, %65 : f32
    %68 = math.roundeven %67 : f32
    %69 = vector.broadcast %65 : f32 to vector<1x2048xf32>
    %70 = arith.divf %0, %69 : vector<1x2048xf32>
    %71 = math.roundeven %70 : vector<1x2048xf32>
    %72 = vector.broadcast %68 : f32 to vector<1x2048xf32>
    %73 = arith.addf %71, %72 : vector<1x2048xf32>
    %cst_17 = arith.constant 0.000000e+00 : f32
    %cst_18 = arith.constant 2.550000e+02 : f32
    %74 = vector.broadcast %cst_17 : f32 to vector<1x2048xf32>
    %75 = arith.maximumf %74, %73 : vector<1x2048xf32>
    %76 = vector.broadcast %cst_18 : f32 to vector<1x2048xf32>
    %77 = arith.minimumf %76, %75 : vector<1x2048xf32>
    %78 = vector.broadcast %68 : f32 to vector<1x2048xf32>
    %79 = arith.subf %77, %78 : vector<1x2048xf32>
    %80 = vector.broadcast %65 : f32 to vector<1x2048xf32>
    %81 = arith.mulf %79, %80 : vector<1x2048xf32>
    %c0_19 = arith.constant 0 : index
    %c0_20 = arith.constant 0 : index
    %82 = vector.load %arg1[%c0_19, %c0_20] : memref<1x2048xf32, #tpu.memory_space<vmem>>, vector<1x2048xf32>
    tpu.vector_store %arg1[%c0_19, %c0_20], %81 {strides = array<i32>} : memref<1x2048xf32, #tpu.memory_space<vmem>>, vector<1x2048xf32>,
    return
  }
}

</mosaic_0001>

<bundles_post_ra>
// kernel: tpu_custom_call.1
= control target key start
LH: loop header
LB: loop body
LE: loop exit
PB: predicated region body
PF: predicated region fallthrough
CT: control target
= control target key end

     0   :  { %6 = vsyncpa [#allocation3], 0  ;;  %s6273_s0 = inlined_call_operand.hbm [shape: f32[1,2048], index: 0, kind: input, shape index: {}]   ;;  %s6274_s1 = inlined_call_operand.hbm [shape: f32[1,2048], index: 1, kind: output, shape index: {}]  }
   0x1   :  { %7 = vsyncpa [#allocation4], 0  ;;  %s3035_s6 = smov [#allocation2]  }
   0x2   :  { %s14_s7 = sshll.u32 %s3035_s6, 4  ;;  %s15_s7 = int_to_ptr.vmem [resolvable:$true] %s14_s7 }
   0x3   :  { %s2999_s8 = scalar_lea.vmem %s15_s7, 256  ;;  %p3004_p1 = scmp.lt.s32.totalorder %s15_s7, %s15_s7 }
   0x4   :  { %p3000_p0 = scmp.ne.s32.totalorder %s15_s7, %s2999_s8  ;;  %p3005_p2 = scmp.lt.s32.totalorder %s2999_s8, %s2999_s8 }
   0x6   :  { %p3006_p3 = por %p3005_p2, %p3004_p1 }
   0x8   :  { %p3007_p4 = pnand %p3006_p3, %p3000_p0 }
   0xa   :  { %3010 = shalt.err (!%p3007_p4)
}
   0xb   :  { %17 = dma.hbm_to_vmem [thread:$0]  %s6273_s0, 256, %s15_s7, [#allocation3]  }
   0xc   :  { %3031 = dma.done.wait [#allocation3], 256  }
   0xd   :  { %3032 = vsyncadd [#allocation3], 4294967040  ;;  %v25_v0 = vlaneseq  ;;  %v21_v10 = vld [vmem:[#allocation2] sm:$0xff]  ;;  %v22_v11 = vld [vmem:[#allocation2 + $0x8] sm:$0xff]  ;;  %vm105_vm0 = vcmask 1040384   ;;  %s3036_s27 = smov [#allocation5]  }
   0xe   :  { %s1569_s28 = sshll.u32 %s3036_s27, 4  ;;  %s1570_s28 = int_to_ptr.vmem [resolvable:$true] %s1569_s28 }
   0xf   :  { %v3050_v1 = vshrl.u32 %v25_v0, 7  ;;  %s3011_s29 = scalar_lea.vmem %s1570_s28, 256  ;;  %p3016_p8 = scmp.lt.s32.totalorder %s1570_s28, %s1570_s28 }
  0x10   :  { %p3012_p7 = scmp.ne.s32.totalorder %s1570_s28, %s3011_s29  ;;  %p3017_p9 = scmp.lt.s32.totalorder %s3011_s29, %s3011_s29 }
  0x11   :  { %6342 = vst [vmem:[#allocation8_spill] sm:$0xff] %v3050_v1  ;;  %v27_v2 = vsub.s32 0, %v3050_v1  ;;  %v31_v3 = vsub.s32 1, %v3050_v1  ;;  %v35_v4 = vsub.s32 2, %v3050_v1  ;;  %v39_v5 = vsub.s32 3, %v3050_v1 }
  0x12   :  { %v43_v6 = vsub.s32 4, %v3050_v1  ;;  %v47_v7 = vsub.s32 5, %v3050_v1  ;;  %v51_v8 = vsub.s32 6, %v3050_v1  ;;  %v55_v9 = vsub.s32 7, %v3050_v1  ;;  %p3018_p10 = por %p3017_p9, %p3016_p8 }
  0x13   :  { %v3060_v12 = vrot.slane %v21_v10, %v27_v2  ;;  %v3062_v13 = vrot.slane %v21_v10, %v31_v3  ;;  %v3064_v14 = vrot.slane %v21_v10, %v35_v4  ;;  %v3066_v15 = vrot.slane %v21_v10, %v39_v5 }
  0x14   :  { %v3068_v16 = vrot.slane %v21_v10, %v43_v6  ;;  %v3070_v17 = vrot.slane %v21_v10, %v47_v7  ;;  %v3072_v18 = vrot.slane %v21_v10, %v51_v8  ;;  %v3074_v19 = vrot.slane %v21_v10, %v55_v9  ;;  %p3019_p11 = pnand %p3018_p10, %p3012_p7 }
  0x15   :  { %v3076_v20 = vrot.slane %v22_v11, %v27_v2  ;;  %v3078_v21 = vrot.slane %v22_v11, %v31_v3  ;;  %v3080_v22 = vrot.slane %v22_v11, %v35_v4  ;;  %v3082_v23 = vrot.slane %v22_v11, %v39_v5 }
  0x16   :  { %6343 = vst [vmem:[#allocation9_spill] sm:$0xff] %v3072_v18  ;;  %6344 = vst [vmem:[#allocation10_spill] sm:$0xff] %v3074_v19  ;;  %v3084_v24 = vrot.slane %v22_v11, %v43_v6  ;;  %v3086_v25 = vrot.slane %v22_v11, %v47_v7  ;;  %v3088_v26 = vrot.slane %v22_v11, %v51_v8  ;;  %v106_v28 = vsel %vm105_vm0, %v3060_v12, inf }
  0x17   :  { %6345 = vst [vmem:[#allocation11_spill] sm:$0xff] %v3076_v20  ;;  %6346 = vst [vmem:[#allocation12_spill] sm:$0xff] %v3078_v21  ;;  %v3090_v27 = vrot.slane %v22_v11, %v55_v9  ;;  %v107_v29 = vsel %vm105_vm0, %v3062_v13, inf  ;;  %v108_v30 = vsel %vm105_vm0, %v3064_v14, inf  ;;  %v109_v31 = vsel %vm105_vm0, %v3066_v15, inf }
  0x18   :  { %6347 = vst [vmem:[#allocation13_spill] sm:$0xff] %v3080_v22  ;;  %6348 = vst [vmem:[#allocation14_spill] sm:$0xff] %v3082_v23  ;;  %v110_v32 = vsel %vm105_vm0, %v3068_v16, inf  ;;  %v112_v33 = vsel %vm105_vm0, %v3070_v17, inf  ;;  %v114_v34 = vsel %vm105_vm0, %v3072_v18, inf  ;;  %v116_v35 = vsel %vm105_vm0, %v3074_v19, inf }
  0x19   :  { %6349 = vst [vmem:[#allocation15_spill] sm:$0xff] %v3084_v24  ;;  %6350 = vst [vmem:[#allocation16_spill] sm:$0xff] %v3086_v25  ;;  %v111_v36 = vmin.f32 %v106_v28, %v110_v32  ;;  %v113_v37 = vmin.f32 %v107_v29, %v112_v33  ;;  %v115_v38 = vmin.f32 %v108_v30, %v114_v34  ;;  %v118_v40 = vsel %vm105_vm0, %v3076_v20, inf }
  0x1a   :  { %6351 = vst [vmem:[#allocation17_spill] sm:$0xff] %v3088_v26  ;;  %6352 = vst [vmem:[#allocation18_spill] sm:$0xff] %v3090_v27  ;;  %v117_v39 = vmin.f32 %v109_v31, %v116_v35  ;;  %v120_v41 = vsel %vm105_vm0, %v3078_v21, inf  ;;  %v122_v42 = vsel %vm105_vm0, %v3080_v22, inf  ;;  %v124_v43 = vsel %vm105_vm0, %v3082_v23, inf }
  0x1b   :  { %v119_v44 = vmin.f32 %v111_v36, %v118_v40  ;;  %v121_v45 = vmin.f32 %v113_v37, %v120_v41  ;;  %v123_v46 = vmin.f32 %v115_v38, %v122_v42  ;;  %v126_v48 = vsel %vm105_vm0, %v3084_v24, inf }
  0x1c   :  { %v125_v47 = vmin.f32 %v117_v39, %v124_v43  ;;  %v128_v49 = vsel %vm105_vm0, %v3086_v25, inf  ;;  %v130_v50 = vsel %vm105_vm0, %v3088_v26, inf  ;;  %v132_v51 = vsel %vm105_vm0, %v3090_v27, inf }
  0x1d   :  { %v127_v52 = vmin.f32 %v119_v44, %v126_v48  ;;  %v129_v53 = vmin.f32 %v121_v45, %v128_v49  ;;  %v131_v54 = vmin.f32 %v123_v46, %v130_v50  ;;  %v146_v56 = vsel %vm105_vm0, %v3060_v12, -inf }
  0x1e   :  { %v133_v55 = vmin.f32 %v125_v47, %v132_v51  ;;  %v147_v57 = vsel %vm105_vm0, %v3062_v13, -inf  ;;  %v148_v58 = vsel %vm105_vm0, %v3064_v14, -inf  ;;  %v149_v59 = vsel %vm105_vm0, %v3066_v15, -inf }
  0x1f   :  { %v134_v60 = vmin.f32 %v127_v52, %v129_v53  ;;  %v150_v62 = vsel %vm105_vm0, %v3068_v16, -inf  ;;  %v152_v63 = vsel %vm105_vm0, %v3070_v17, -inf  ;;  %v154_v3 = vsel %vm105_vm0, %v3072_v18, -inf }
  0x20   :  { %v135_v61 = vmin.f32 %v131_v54, %v133_v55  ;;  %v151_v0 = vmax.f32 %v146_v56, %v150_v62  ;;  %v153_v2 = vmax.f32 %v147_v57, %v152_v63  ;;  %v156_v4 = vsel %vm105_vm0, %v3074_v19, -inf }
  0x21   :  { %v155_v6 = vmax.f32 %v148_v58, %v154_v3  ;;  %v157_v7 = vmax.f32 %v149_v59, %v156_v4  ;;  %v158_v8 = vsel %vm105_vm0, %v3076_v20, -inf  ;;  %v160_v10 = vsel %vm105_vm0, %v3078_v21, -inf }
  0x22   :  { %v136_v5 = vmin.f32 %v134_v60, %v135_v61  ;;  %v159_v9 = vmax.f32 %v151_v0, %v158_v8  ;;  %v162_v11 = vsel %vm105_vm0, %v3080_v22, -inf  ;;  %v164_v28 = vsel %vm105_vm0, %v3082_v23, -inf }
  0x23   :  { %v161_v29 = vmax.f32 %v153_v2, %v160_v10  ;;  %v163_v30 = vmax.f32 %v155_v6, %v162_v11  ;;  %v165_v31 = vmax.f32 %v157_v7, %v164_v28  ;;  %v166_v32 = vsel %vm105_vm0, %v3084_v24, -inf }
  0x24   :  { %137 = vmin.xlane.f32.xlu0 %v136_v5  ;;  %v167_v33 = vmax.f32 %v159_v9, %v166_v32  ;;  %v168_v34 = vsel %vm105_vm0, %v3086_v25, -inf  ;;  %v170_v35 = vsel %vm105_vm0, %v3088_v26, -inf  ;;  %v172_v36 = vsel %vm105_vm0, %v3090_v27, -inf }
  0x25   :  { %v169_v37 = vmax.f32 %v161_v29, %v168_v34  ;;  %v171_v38 = vmax.f32 %v163_v30, %v170_v35  ;;  %v173_v39 = vmax.f32 %v165_v31, %v172_v36  ;;  %v3157_v57 = vadd.s32 32, %v3050_v1 }
  0x26   :  { %v6277_v63 = vcvt.s32.f32 %v3050_v1  ;;  %v3184_v5 = vadd.s32 16, %v3050_v1 }
  0x27   :  { %v174_v40 = vmax.f32 %v167_v33, %v169_v37  ;;  %v175_v41 = vmax.f32 %v171_v38, %v173_v39  ;;  %6353 = vst [vmem:[#allocation19_spill] sm:$0xff] %v3157_v57  ;;  %v6275_v58 = vcvt.s32.f32 %v3157_v57 }
  0x28   :  { %v208_v4 = vmul.f32 0.01, %v6277_v63  ;;  %6356 = vst [vmem:[#allocation22_spill] sm:$0xff] %v3184_v5  ;;  %v6276_v10 = vcvt.s32.f32 %v3184_v5 }
  0x29   :  { %v176_v42 = vmax.f32 %v174_v40, %v175_v41  ;;  %v212_v59 = vmul.f32 0.01, %v6275_v58 }
  0x2a   :  { %v3206_v33 = vmul.f32 0.01, %v6276_v10 }
  0x2b   :  { %177 = vmax.xlane.f32.xlu0 %v176_v42 }
  0xad   :  { %v138_v43 = vpop.xlane.xlu0 %137 }
  0xae   :  { %v139_v44 = vrot.slane %v138_v43, 4 }
  0xb0   :  { %v140_v45 = vmin.f32 %v138_v43, %v139_v44 }
  0xb2   :  { %v141_v46 = vrot.slane %v140_v45, 2 }
  0xb4   :  { %v142_v47 = vmin.f32 %v140_v45, %v141_v46  ;;  %v178_v48 = vpop.xlane.xlu0 %177 }
  0xb5   :  { %v179_v50 = vrot.slane %v178_v48, 4 }
  0xb6   :  { %v143_v49 = vrot.slane %v142_v47, 1 }
  0xb7   :  { %v180_v52 = vmax.f32 %v178_v48, %v179_v50 }
  0xb8   :  { %v144_v51 = vmin.f32 %v142_v47, %v143_v49 }
  0xb9   :  { %v181_v53 = vrot.slane %v180_v52, 2 }
  0xba   :  { %1579 = vpush %v144_v51 }
  0xbb   :  { %v182_v54 = vmax.f32 %v180_v52, %v181_v53 }
  0xbd   :  { %v183_v55 = vrot.slane %v182_v54, 1 }
  0xbf   :  { %v184_v56 = vmax.f32 %v182_v54, %v183_v55 }
  0xc1   :  { %1581 = vpush %v184_v56 }
  0xeb   :  { %s3160_s0 = spop %1579 }
  0xec   :  { %s260_s13 = ssub.f32 0.0, %s3160_s0 }
  0xee   :  { %v3178_v2 = vstv %s260_s13 }
  0xf2   :  { %s1582_s11 = spop %1581 }
  0xf3   :  { %s3165_s12 = ssub.f32 %s1582_s11, %s3160_s0 }
  0xf5   :  { %v3168_v60 = vstv %s3165_s12 }
  0xf6   :  { %6354 = vst [vmem:[#allocation20_spill] sm:$0xff] %v3168_v60  ;;  %v223_v61 = vsub.f32 %v3168_v60, %v212_v59  ;;  %v219_v7 = vsub.f32 %v3168_v60, %v208_v4 }
  0xf8   :  { %v3171_v62 = vmul.f32 0.003921569, %v223_v61  ;;  %v3194_v28 = vmul.f32 0.003921569, %v219_v7 }
  0xfa   :  { %6355 = vst [vmem:[#allocation21_spill] sm:$0xff] %v3171_v62  ;;  %2967 = vrcp.f32 %v3171_v62  ;;  %6357 = vst [vmem:[#allocation23_spill] sm:$0xff] %v3194_v28 }
  0xfb   :  { %2969 = vrcp.f32 %v3194_v28 }
 0x107   :  { %v2968_v0 = vpop.eup %2967 }
 0x108   :  { %v266_v3 = vmul.f32 %v2968_v0, %v3178_v2  ;;  %v3188_v8 = vmul.f32 %v2968_v0, %v3060_v12  ;;  %v3191_v9 = vmul.f32 %v2968_v0, %v3062_v13  ;;  %v3197_v29 = vmul.f32 %v2968_v0, %v3064_v14 }
 0x109   :  { %v3201_v31 = vmul.f32 %v2968_v0, %v3066_v15  ;;  %v3209_v36 = vmul.f32 %v2968_v0, %v3068_v16  ;;  %v3213_v38 = vmul.f32 %v2968_v0, %v3070_v17  ;;  %v3216_v39 = vmul.f32 %v2968_v0, %v3072_v18 }
 0x10a   :  { %v1617_v6 = vcvt.f32.s32 %v266_v3  ;;  %v2177_v30 = vcvt.f32.s32 %v3188_v8  ;;  %v2185_v32 = vcvt.f32.s32 %v3191_v9  ;;  %v1615_v34 = vand.u32 2147483647, %v266_v3 }
 0x10b   :  { %v1620_v37 = vand.u32 2147483648, %v266_v3  ;;  %v3219_v40 = vmul.f32 %v2968_v0, %v3074_v19  ;;  %v3222_v41 = vmul.f32 %v2968_v0, %v3076_v20  ;;  %v3225_v42 = vmul.f32 %v2968_v0, %v3078_v21 }
 0x10c   :  { %v1618_v11 = vcvt.s32.f32 %v1617_v6  ;;  %v2178_v43 = vcvt.s32.f32 %v2177_v30  ;;  %v2193_v44 = vcvt.f32.s32 %v3197_v29  ;;  %v3229_v45 = vmul.f32 %v2968_v0, %v3080_v22 }
 0x10d   :  { %v3232_v46 = vmul.f32 %v2968_v0, %v3082_v23  ;;  %v2186_v47 = vcvt.s32.f32 %v2185_v32  ;;  %v2201_v48 = vcvt.f32.s32 %v3201_v31  ;;  %vm3235_vm1 = vcmp.lt.f32.partialorder %v1615_v34, 8388608.0 }
 0x10e   :  { %v1619_v35 = vand.u32 2147483647, %v1618_v11  ;;  %v3240_v51 = vmul.f32 %v2968_v0, %v3084_v24  ;;  %v2175_v52 = vand.u32 2147483647, %v3188_v8  ;;  %v3244_v53 = vmul.f32 %v2968_v0, %v3086_v25 }
 0x10f   :  { %v3247_v54 = vmul.f32 %v2968_v0, %v3088_v26  ;;  %v2183_v55 = vand.u32 2147483647, %v3191_v9  ;;  %v2209_v56 = vcvt.f32.s32 %v3209_v36  ;;  %v2179_v59 = vand.u32 2147483647, %v2178_v43 }
 0x110   :  { %v1621_v50 = vor.u32 %v1620_v37, %v1619_v35  ;;  %v2191_v61 = vand.u32 2147483647, %v3197_v29  ;;  %v2194_v4 = vcvt.s32.f32 %v2193_v44  ;;  %v2217_v6 = vcvt.f32.s32 %v3213_v38 }
 0x111   :  { %v3254_v7 = vmul.f32 %v2968_v0, %v3090_v27  ;;  %v2180_v11 = vand.u32 2147483648, %v3188_v8  ;;  %v2187_v30 = vand.u32 2147483647, %v2186_v47  ;;  %v2202_v32 = vcvt.s32.f32 %v2201_v48 }
 0x112   :  { %v1622_v34 = vsel %vm3235_vm1, %v1621_v50, %v266_v3  ;;  %vm3259_vm2 = vcmp.lt.f32.partialorder %v2175_v52, 8388608.0  ;;  %v2188_v37 = vand.u32 2147483648, %v3191_v9  ;;  %v2225_v43 = vcvt.f32.s32 %v3216_v39 }
 0x113   :  { %vm3265_vm3 = vcmp.lt.f32.partialorder %v2183_v55, 8388608.0  ;;  %v2199_v0 = vand.u32 2147483647, %v3201_v31  ;;  %v2210_v58 = vcvt.s32.f32 %v2209_v56  ;;  %v2233_v47 = vcvt.f32.s32 %v3219_v40 }
 0x114   :  { %v3271_v48 = vor.u32 %v2180_v11, %v2179_v59  ;;  %vm3273_vm4 = vcmp.lt.f32.partialorder %v2191_v61, 8388608.0  ;;  %v2195_v49 = vand.u32 2147483647, %v2194_v4  ;;  %v2218_v50 = vcvt.s32.f32 %v2217_v6  ;;  %v3286_v61 = vpop.eup %2969 }
 0x115   :  { %v3277_v52 = vsub.f32 0.0, %v1622_v34  ;;  %v3279_v10 = vor.u32 %v2188_v37, %v2187_v30  ;;  %v2196_v55 = vand.u32 2147483648, %v3197_v29  ;;  %v2203_v63 = vand.u32 2147483647, %v2202_v32 }
 0x116   :  { %v3282_v57 = vsub.f32 255.0, %v1622_v34  ;;  %v2207_v56 = vand.u32 2147483647, %v3209_v36  ;;  %v2226_v5 = vcvt.s32.f32 %v2225_v43  ;;  %v2241_v59 = vcvt.f32.s32 %v3222_v41 }
 0x117   :  { %vm3288_vm5 = vcmp.lt.f32.partialorder %v2199_v0, 8388608.0  ;;  %v2204_v4 = vand.u32 2147483648, %v3201_v31  ;;  %v2211_v6 = vand.u32 2147483647, %v2210_v58  ;;  %v2234_v30 = vcvt.s32.f32 %v2233_v47 }
 0x118   :  { %v2182_v32 = vsel %vm3259_vm2, %v3271_v48, %v3188_v8  ;;  %v3297_v34 = vor.u32 %v2196_v55, %v2195_v49  ;;  %v2212_v37 = vand.u32 2147483648, %v3209_v36  ;;  %v2219_v43 = vand.u32 2147483647, %v2218_v50 }
 0x119   :  { %v2190_v0 = vsel %vm3265_vm3, %v3279_v10, %v3191_v9  ;;  %v3304_v62 = vor.u32 %v2204_v4, %v2203_v63  ;;  %v2215_v58 = vand.u32 2147483647, %v3213_v38  ;;  %v2249_v47 = vcvt.f32.s32 %v3225_v42 }
 0x11a   :  { %vm3308_vm6 = vcmp.lt.f32.partialorder %v2207_v56, 8388608.0  ;;  %v2220_v35 = vand.u32 2147483648, %v3213_v38  ;;  %v2227_v48 = vand.u32 2147483647, %v2226_v5  ;;  %v2242_v49 = vcvt.s32.f32 %v2241_v59 }
 0x11b   :  { %v3313_v50 = vor.u32 %v2212_v37, %v2211_v6  ;;  %v2223_v55 = vand.u32 2147483647, %v3216_v39  ;;  %v2231_v10 = vand.u32 2147483647, %v3219_v40  ;;  %v2235_v63 = vand.u32 2147483647, %v2234_v30 }
 0x11c   :  { %v2198_v44 = vsel %vm3273_vm4, %v3297_v34, %v3197_v29  ;;  %v3321_v56 = vor.u32 %v2220_v35, %v2219_v43  ;;  %v2228_v4 = vand.u32 2147483648, %v3216_v39  ;;  %v2239_v1 = vand.u32 2147483647, %v3222_v41 }
 0x11d   :  { %v2206_v5 = vsel %vm3288_vm5, %v3304_v62, %v3201_v31  ;;  %vm3329_vm7 = vcmp.lt.f32.partialorder %v2215_v58, 8388608.0  ;;  %v2236_v6 = vand.u32 2147483648, %v3219_v40  ;;  %v2250_v30 = vcvt.s32.f32 %v2249_v47 }
 0x11e   :  { %v3334_v3 = vor.u32 %v2228_v4, %v2227_v48  ;;  %v2243_v34 = vand.u32 2147483647, %v2242_v49  ;;  %v2247_v37 = vand.u32 2147483647, %v3225_v42  ;;  %v2257_v43 = vcvt.f32.s32 %v3229_v45 }
 0x11f   :  { %v2214_v11 = vsel %vm3308_vm6, %v3313_v50, %v3209_v36  ;;  %vm3342_vm8 = vcmp.lt.f32.partialorder %v2223_v55, 8388608.0  ;;  %vm3346_vm9 = vcmp.lt.f32.partialorder %v2231_v10, 8388608.0  ;;  %v3350_v47 = vor.u32 %v2236_v6, %v2235_v63 }
 0x120   :  { %v2222_v35 = vsel %vm3329_vm7, %v3321_v56, %v3213_v38  ;;  %vm3356_vm10 = vcmp.lt.f32.partialorder %v2239_v1, 8388608.0  ;;  %v2244_v28 = vand.u32 2147483648, %v3222_v41  ;;  %v2265_v49 = vcvt.f32.s32 %v3232_v46 }
 0x121   :  { %v2251_v50 = vand.u32 2147483647, %v2250_v30  ;;  %v2252_v55 = vand.u32 2147483648, %v3225_v42  ;;  %v2255_v10 = vand.u32 2147483647, %v3229_v45  ;;  %v2273_v63 = vcvt.f32.s32 %v3240_v51 }
 0x122   :  { %v2230_v56 = vsel %vm3342_vm8, %v3334_v3, %v3216_v39  ;;  %v3369_v1 = vor.u32 %v2244_v28, %v2243_v34  ;;  %vm3371_vm11 = vcmp.lt.f32.partialorder %v2247_v37, 8388608.0  ;;  %v2258_v59 = vcvt.s32.f32 %v2257_v43 }
 0x123   :  { %v2238_v6 = vsel %vm3346_vm9, %v3350_v47, %v3219_v40  ;;  %v2260_v30 = vand.u32 2147483648, %v3229_v45  ;;  %v2263_v27 = vand.u32 2147483647, %v3232_v46  ;;  %v686_v26 = vmax.f32 %v3277_v52, %v2182_v32 }
 0x124   :  { %v2266_v62 = vcvt.s32.f32 %v2265_v49  ;;  %v2271_v3 = vand.u32 2147483647, %v3240_v51  ;;  %v2281_v34 = vcvt.f32.s32 %v3244_v53  ;;  %v687_v37 = vmax.f32 %v3277_v52, %v2190_v0 }
 0x125   :  { %v3385_v28 = vor.u32 %v2252_v55, %v2251_v50  ;;  %vm3387_vm12 = vcmp.lt.f32.partialorder %v2255_v10, 8388608.0  ;;  %v2268_v58 = vand.u32 2147483648, %v3232_v46  ;;  %v2274_v47 = vcvt.s32.f32 %v2273_v63 }
 0x126   :  { %v2246_v32 = vsel %vm3356_vm10, %v3369_v1, %v3222_v41  ;;  %v2259_v49 = vand.u32 2147483647, %v2258_v59  ;;  %v2289_v25 = vcvt.f32.s32 %v3247_v54  ;;  %v2297_v24 = vcvt.f32.s32 %v3254_v7 }
 0x127   :  { %vm3398_vm13 = vcmp.lt.f32.partialorder %v2263_v27, 8388608.0  ;;  %v2276_v50 = vand.u32 2147483648, %v3240_v51  ;;  %v2279_v55 = vand.u32 2147483647, %v3244_v53  ;;  %v688_v10 = vmax.f32 %v3277_v52, %v2198_v44 }
 0x128   :  { %v846_v63 = vmin.f32 %v3282_v57, %v686_v26  ;;  %v2267_v23 = vand.u32 2147483647, %v2266_v62  ;;  %vm3406_vm14 = vcmp.lt.f32.partialorder %v2271_v3, 8388608.0  ;;  %v2282_v1 = vcvt.s32.f32 %v2281_v34 }
 0x129   :  { %v847_v59 = vmin.f32 %v3282_v57, %v687_v37  ;;  %v2254_v27 = vsel %vm3371_vm11, %v3385_v28, %v3225_v42  ;;  %v2275_v22 = vand.u32 2147483647, %v2274_v47  ;;  %v2287_v21 = vand.u32 2147483647, %v3247_v54 }
 0x12a   :  { %v689_v44 = vmax.f32 %v3277_v52, %v2206_v5  ;;  %v2261_v20 = vor.u32 %v2260_v30, %v2259_v49  ;;  %v2284_v26 = vand.u32 2147483648, %v3244_v53  ;;  %v2290_v62 = vcvt.s32.f32 %v2289_v25 }
 0x12b   :  { %v2298_v3 = vcvt.s32.f32 %v2297_v24  ;;  %vm3418_vm15 = vcmp.lt.f32.partialorder %v2279_v55, 8388608.0  ;;  %v690_v34 = vmax.f32 %v3277_v52, %v2214_v11  ;;  %v848_v37 = vmin.f32 %v3282_v57, %v688_v10 }
 0x12c   :  { %v1006_v4 = vsub.f32 %v846_v63, %v3188_v8  ;;  %v2269_v28 = vor.u32 %v2268_v58, %v2267_v23  ;;  %v2283_v47 = vand.u32 2147483647, %v2282_v1  ;;  %v2292_v18 = vand.u32 2147483648, %v3247_v54 }
 0x12d   :  { %v1007_v5 = vsub.f32 %v847_v59, %v3191_v9  ;;  %v2277_v30 = vor.u32 %v2276_v50, %v2275_v22  ;;  %vm3427_vm0 = vcmp.lt.f32.partialorder %v2287_v21, 8388608.0  ;;  %v691_v24 = vmax.f32 %v3277_v52, %v2222_v35 }
 0x12e   :  { %v849_v49 = vmin.f32 %v3282_v57, %v689_v44  ;;  %v2262_v11 = vsel %vm3387_vm12, %v2261_v20, %v3229_v45  ;;  %v2291_v8 = vand.u32 2147483647, %v2290_v62  ;;  %v2295_v23 = vand.u32 2147483647, %v3254_v7 }
 0x12f   :  { %v2299_v58 = vand.u32 2147483647, %v2298_v3  ;;  %v692_v55 = vmax.f32 %v3277_v52, %v2230_v56  ;;  %v850_v22 = vmin.f32 %v3282_v57, %v690_v34  ;;  %v1008_v21 = vsub.f32 %v848_v37, %v3197_v29 }
 0x130   :  { %v1166_v9 = vmul.f32 %v1006_v4, %v1006_v4  ;;  %v2270_v35 = vsel %vm3398_vm13, %v2269_v28, %v3232_v46  ;;  %v2285_v50 = vor.u32 %v2284_v26, %v2283_v47  ;;  %v2300_v10 = vand.u32 2147483648, %v3254_v7 }
 0x131   :  { %v1167_v43 = vmul.f32 %v1007_v5, %v1007_v5  ;;  %v2278_v20 = vsel %vm3406_vm14, %v2277_v30, %v3240_v51  ;;  %v693_v63 = vmax.f32 %v3277_v52, %v2238_v6  ;;  %v851_v56 = vmin.f32 %v3282_v57, %v691_v24 }
 0x132   :  { %v1009_v1 = vsub.f32 %v849_v49, %v3201_v31  ;;  %v2293_v29 = vor.u32 %v2292_v18, %v2291_v8  ;;  %vm3450_vm1 = vcmp.lt.f32.partialorder %v2295_v23, 8388608.0  ;;  %v2301_v0 = vor.u32 %v2300_v10, %v2299_v58 }
 0x133   :  { %v694_v44 = vmax.f32 %v3277_v52, %v2246_v32  ;;  %v852_v26 = vmin.f32 %v3282_v57, %v692_v55  ;;  %v1010_v62 = vsub.f32 %v850_v22, %v3209_v36  ;;  %v1168_v48 = vmul.f32 %v1008_v21, %v1008_v21 }
 0x134   :  { %v1330_v3 = vadd.f32 %v1167_v43, %v1166_v9  ;;  %v2286_v6 = vsel %vm3418_vm15, %v2285_v50, %v3244_v53  ;;  %v695_v31 = vmax.f32 %v3277_v52, %v2254_v27  ;;  %v696_v18 = vmax.f32 %v3277_v52, %v2262_v11 }
 0x135   :  { %v697_v34 = vmax.f32 %v3277_v52, %v2270_v35  ;;  %v853_v37 = vmin.f32 %v3282_v57, %v693_v63  ;;  %v1011_v32 = vsub.f32 %v851_v56, %v3213_v38  ;;  %v1169_v4 = vmul.f32 %v1009_v1, %v1009_v1 }
 0x136   :  { %v1331_v28 = vadd.f32 %v1330_v3, %v1168_v48  ;;  %v2294_v36 = vsel %vm3427_vm0, %v2293_v29, %v3247_v54  ;;  %v2302_v19 = vsel %vm3450_vm1, %v2301_v0, %v3254_v7  ;;  %v698_v27 = vmax.f32 %v3277_v52, %v2278_v20 }
 0x137   :  { %v699_v47 = vmax.f32 %v3277_v52, %v2286_v6  ;;  %v854_v5 = vmin.f32 %v3282_v57, %v694_v44  ;;  %v1012_v30 = vsub.f32 %v852_v26, %v3216_v39  ;;  %v1170_v24 = vmul.f32 %v1010_v62, %v1010_v62 }
 0x138   :  { %v1332_v38 = vadd.f32 %v1331_v28, %v1169_v4  ;;  %v700_v49 = vmax.f32 %v3277_v52, %v2294_v36  ;;  %v701_v11 = vmax.f32 %v3277_v52, %v2302_v19  ;;  %v221_v25 = vsub.f32 %v3168_v60, %v3206_v33 }
 0x139   :  { %v855_v8 = vmin.f32 %v3282_v57, %v695_v31  ;;  %v1013_v23 = vsub.f32 %v853_v37, %v3219_v40  ;;  %v1171_v58 = vmul.f32 %v1011_v32, %v1011_v32  ;;  %v856_v22 = vmin.f32 %v3282_v57, %v696_v18 }
 0x13a   :  { %v1333_v55 = vadd.f32 %v1332_v38, %v1170_v24  ;;  %v857_v21 = vmin.f32 %v3282_v57, %v697_v34  ;;  %v858_v39 = vmin.f32 %v3282_v57, %v698_v27  ;;  %v3486_v9 = vmul.f32 %v3286_v61, %v3178_v2  ;;  %v6394_v38 = vld [vmem:[#allocation10_spill] sm:$0xff] }
 0x13b   :  { %v859_v52 = vmin.f32 %v3282_v57, %v699_v47  ;;  %v1014_v33 = vsub.f32 %v854_v5, %v3222_v41  ;;  %v1172_v35 = vmul.f32 %v1012_v30, %v1012_v30  ;;  %v860_v40 = vmin.f32 %v3282_v57, %v700_v49  ;;  %v6393_v30 = vld [vmem:[#allocation9_spill] sm:$0xff] }
 0x13c   :  { %v1334_v50 = vadd.f32 %v1333_v55, %v1171_v58  ;;  %v861_v10 = vmin.f32 %v3282_v57, %v701_v11  ;;  %v1015_v43 = vsub.f32 %v855_v8, %v3225_v42  ;;  %v1173_v20 = vmul.f32 %v1013_v23, %v1013_v23 }
 0x13d   :  { %v3493_v56 = vmul.f32 0.003921569, %v221_v25  ;;  %v1016_v1 = vsub.f32 %v856_v22, %v3229_v45  ;;  %v1017_v29 = vsub.f32 %v857_v21, %v3232_v46  ;;  %v1018_v59 = vsub.f32 %v858_v39, %v3240_v51  ;;  %v6395_v25 = vld [vmem:[#allocation11_spill] sm:$0xff]  ;;  %v6398_v22 = vld [vmem:[#allocation12_spill] sm:$0xff]  ;;  %v6399_v39 = vld [vmem:[#allocation13_spill] sm:$0xff] }
 0x13e   :  { %v1335_v63 = vadd.f32 %v1334_v50, %v1172_v35  ;;  %v1585_v41 = vcvt.f32.s32 %v3486_v9  ;;  %v1019_v0 = vsub.f32 %v859_v52, %v3244_v53  ;;  %v1174_v44 = vmul.f32 %v1014_v33, %v1014_v33  ;;  %v6400_v50 = vld [vmem:[#allocation14_spill] sm:$0xff] }
 0x13f   :  { %6392 = vst [vmem:[#allocation24_spill] sm:$0xff] %v3493_v56  ;;  %v3502_v57 = vmul.f32 %v3286_v61, %v3060_v12  ;;  %v1020_v42 = vsub.f32 %v860_v40, %v3247_v54  ;;  %v1021_v62 = vsub.f32 %v861_v10, %v3254_v7  ;;  %v3508_v45 = vmul.f32 %v3286_v61, %v3062_v13  ;;  %v6401_v10 = vld [vmem:[#allocation15_spill] sm:$0xff] }
 0x140   :  { %v1336_v26 = vadd.f32 %v1335_v63, %v1173_v20  ;;  %v1175_v46 = vmul.f32 %v1015_v43, %v1015_v43  ;;  %2971 = vrcp.f32 %v3493_v56  ;;  %v1176_v48 = vmul.f32 %v1016_v1, %v1016_v1  ;;  %v6402_v1 = vld [vmem:[#allocation16_spill] sm:$0xff] }
 0x141   :  { %v1177_v53 = vmul.f32 %v1017_v29, %v1017_v29  ;;  %v1178_v3 = vmul.f32 %v1018_v59, %v1018_v59  ;;  %v1586_v6 = vcvt.s32.f32 %v1585_v41  ;;  %v1179_v31 = vmul.f32 %v1019_v0, %v1019_v0  ;;  %v6403_v59 = vld [vmem:[#allocation17_spill] sm:$0xff] }
 0x142   :  { %v1337_v51 = vadd.f32 %v1336_v26, %v1174_v44  ;;  %v3513_v34 = vmul.f32 %v3286_v61, %v3064_v14  ;;  %v1665_v54 = vcvt.f32.s32 %v3502_v57  ;;  %v1180_v7 = vmul.f32 %v1020_v42, %v1020_v42 }
 0x143   :  { %v1181_v37 = vmul.f32 %v1021_v62, %v1021_v62  ;;  %v1583_v32 = vand.u32 2147483647, %v3486_v9  ;;  %v1673_v4 = vcvt.f32.s32 %v3508_v45  ;;  %v3520_v36 = vmul.f32 %v3286_v61, %v3066_v15 }
 0x144   :  { %v1338_v18 = vadd.f32 %v1337_v51, %v1175_v46  ;;  %v3524_v19 = vmul.f32 %v3286_v61, %v3068_v16  ;;  %v3528_v27 = vmul.f32 %v3286_v61, %v3070_v17  ;;  %v1587_v47 = vand.u32 2147483647, %v1586_v6  ;;  %v6404_v46 = vld [vmem:[#allocation18_spill] sm:$0xff] }
 0x145   :  { %v1588_v5 = vand.u32 2147483648, %v3486_v9  ;;  %v3533_v24 = vmul.f32 %v3286_v61, %v6393_v30  ;;  %v3537_v49 = vmul.f32 %v3286_v61, %v6394_v38  ;;  %v3541_v8 = vmul.f32 %v3286_v61, %v6395_v25 }
 0x146   :  { %v1339_v28 = vadd.f32 %v1338_v18, %v1176_v48  ;;  %v1666_v23 = vcvt.s32.f32 %v1665_v54  ;;  %v1681_v58 = vcvt.f32.s32 %v3513_v34  ;;  %vm3544_vm2 = vcmp.lt.f32.partialorder %v1583_v32, 8388608.0 }
 0x147   :  { %v3550_v21 = vmul.f32 %v3286_v61, %v6398_v22  ;;  %v3554_v52 = vmul.f32 %v3286_v61, %v6399_v39  ;;  %v1674_v33 = vcvt.s32.f32 %v1673_v4  ;;  %v3558_v40 = vmul.f32 %v3286_v61, %v6400_v50 }
 0x148   :  { %v1340_v11 = vadd.f32 %v1339_v28, %v1177_v53  ;;  %v3562_v43 = vmul.f32 %v3286_v61, %v6401_v10  ;;  %v1663_v20 = vand.u32 2147483647, %v3502_v57  ;;  %v1589_v63 = vor.u32 %v1588_v5, %v1587_v47 }
 0x149   :  { %v3567_v29 = vmul.f32 %v3286_v61, %v6402_v1  ;;  %v3571_v41 = vmul.f32 %v3286_v61, %v6403_v59  ;;  %v1689_v0 = vcvt.f32.s32 %v3520_v36  ;;  %v1667_v26 = vand.u32 2147483647, %v1666_v23 }
 0x14a   :  { %v1341_v35 = vadd.f32 %v1340_v11, %v1178_v3  ;;  %v1682_v42 = vcvt.s32.f32 %v1681_v58  ;;  %v1697_v62 = vcvt.f32.s32 %v3524_v19  ;;  %v3577_v51 = vmul.f32 %v3286_v61, %v6404_v46 }
 0x14b   :  { %v1668_v48 = vand.u32 2147483648, %v3502_v57  ;;  %v1671_v53 = vand.u32 2147483647, %v3508_v45  ;;  %v1675_v3 = vand.u32 2147483647, %v1674_v33  ;;  %vm3581_vm3 = vcmp.lt.f32.partialorder %v1663_v20, 8388608.0 }
 0x14c   :  { %v1342_v44 = vadd.f32 %v1341_v35, %v1179_v31  ;;  %v1676_v31 = vand.u32 2147483648, %v3508_v45  ;;  %v1705_v54 = vcvt.f32.s32 %v3528_v27  ;;  %v1590_v61 = vsel %vm3544_vm2, %v1589_v63, %v3486_v9 }
 0x14d   :  { %v3587_v32 = vpop.eup %2971  ;;  %v1679_v4 = vand.u32 2147483647, %v3513_v34  ;;  %v1690_v28 = vcvt.s32.f32 %v1689_v0  ;;  %v1713_v47 = vcvt.f32.s32 %v3533_v24  ;;  %v3594_v5 = vor.u32 %v1668_v48, %v1667_v26 }
 0x14e   :  { %v1343_v6 = vadd.f32 %v1342_v44, %v1180_v7  ;;  %v1683_v11 = vand.u32 2147483647, %v1682_v42  ;;  %v1698_v23 = vcvt.s32.f32 %v1697_v62  ;;  %vm3596_vm4 = vcmp.lt.f32.partialorder %v1671_v53, 8388608.0 }
 0x14f   :  { %v1677_v33 = vor.u32 %v1676_v31, %v1675_v3  ;;  %v1684_v35 = vand.u32 2147483648, %v3513_v34  ;;  %v1687_v55 = vand.u32 2147483647, %v3520_v36  ;;  %v3602_v9 = vsub.f32 0.0, %v1590_v61 }
 0x150   :  { %v1344_v7 = vadd.f32 %v1343_v6, %v1181_v37  ;;  %v3604_v20 = vsub.f32 255.0, %v1590_v61  ;;  %v1706_v63 = vcvt.s32.f32 %v1705_v54  ;;  %v1721_v37 = vcvt.f32.s32 %v3537_v49 }
 0x151   :  { %vm3607_vm5 = vcmp.lt.f32.partialorder %v1679_v4, 8388608.0  ;;  %v1691_v44 = vand.u32 2147483647, %v1690_v28  ;;  %v1695_v26 = vand.u32 2147483647, %v3524_v19  ;;  %v1714_v42 = vcvt.s32.f32 %v1713_v47 }
 0x152   :  { %1345 = vadd.xlane.f32.xlu0 %v1344_v7  ;;  %v1670_v62 = vsel %vm3581_vm3, %v3594_v5, %v3502_v57  ;;  %v3616_v48 = vor.u32 %v1684_v35, %v1683_v11  ;;  %v1692_v53 = vand.u32 2147483648, %v3520_v36  ;;  %v1699_v3 = vand.u32 2147483647, %v1698_v23 }
 0x153   :  { %v1678_v6 = vsel %vm3596_vm4, %v1677_v33, %v3508_v45  ;;  %vm3622_vm6 = vcmp.lt.f32.partialorder %v1687_v55, 8388608.0  ;;  %v1703_v54 = vand.u32 2147483647, %v3528_v27  ;;  %v1729_v61 = vcvt.f32.s32 %v3541_v8 }
 0x154   :  { %v1700_v18 = vand.u32 2147483648, %v3524_v19  ;;  %v1707_v4 = vand.u32 2147483647, %v1706_v63  ;;  %v1711_v28 = vand.u32 2147483647, %v3533_v24  ;;  %v1722_v47 = vcvt.s32.f32 %v1721_v37 }
 0x155   :  { %v3630_v7 = vor.u32 %v1692_v53, %v1691_v44  ;;  %vm3632_vm7 = vcmp.lt.f32.partialorder %v1695_v26, 8388608.0  ;;  %v1715_v11 = vand.u32 2147483647, %v1714_v42  ;;  %v1719_v23 = vand.u32 2147483647, %v3537_v49 }
 0x156   :  { %v1686_v58 = vsel %vm3607_vm5, %v3616_v48, %v3513_v34  ;;  %v3641_v33 = vor.u32 %v1700_v18, %v1699_v3  ;;  %v1708_v35 = vand.u32 2147483648, %v3528_v27  ;;  %v1737_v55 = vcvt.f32.s32 %v3550_v21 }
 0x157   :  { %vm3645_vm8 = vcmp.lt.f32.partialorder %v1703_v54, 8388608.0  ;;  %v1716_v37 = vand.u32 2147483648, %v3533_v24  ;;  %v1730_v44 = vcvt.s32.f32 %v1729_v61  ;;  %v1745_v26 = vcvt.f32.s32 %v3554_v52 }
 0x158   :  { %v3651_v42 = vor.u32 %v1708_v35, %v1707_v4  ;;  %vm3653_vm9 = vcmp.lt.f32.partialorder %v1711_v28, 8388608.0  ;;  %v1723_v48 = vand.u32 2147483647, %v1722_v47  ;;  %v1727_v53 = vand.u32 2147483647, %v3541_v8 }
 0x159   :  { %v1694_v3 = vsel %vm3622_vm6, %v3630_v7, %v3520_v36  ;;  %v3662_v54 = vor.u32 %v1716_v37, %v1715_v11  ;;  %vm3664_vm10 = vcmp.lt.f32.partialorder %v1719_v23, 8388608.0  ;;  %v1735_v18 = vand.u32 2147483647, %v3550_v21 }
 0x15a   :  { %v1702_v4 = vsel %vm3632_vm7, %v3641_v33, %v3524_v19  ;;  %v1724_v28 = vand.u32 2147483648, %v3537_v49  ;;  %v1738_v47 = vcvt.s32.f32 %v1737_v55  ;;  %v1743_v35 = vand.u32 2147483647, %v3554_v52 }
 0x15b   :  { %v1731_v31 = vand.u32 2147483647, %v1730_v44  ;;  %v1732_v7 = vand.u32 2147483648, %v3541_v8  ;;  %v1746_v11 = vcvt.s32.f32 %v1745_v26  ;;  %v1753_v23 = vcvt.f32.s32 %v3558_v40 }
 0x15c   :  { %v1710_v37 = vsel %vm3645_vm8, %v3651_v42, %v3528_v27  ;;  %v3681_v56 = vor.u32 %v1724_v28, %v1723_v48  ;;  %vm3683_vm11 = vcmp.lt.f32.partialorder %v1727_v53, 8388608.0  ;;  %v1740_v33 = vand.u32 2147483648, %v3550_v21 }
 0x15d   :  { %v1718_v55 = vsel %vm3653_vm9, %v3662_v54, %v3533_v24  ;;  %vm3692_vm12 = vcmp.lt.f32.partialorder %v1735_v18, 8388608.0  ;;  %v1748_v63 = vand.u32 2147483648, %v3554_v52  ;;  %v622_v26 = vmax.f32 %v3602_v9, %v1670_v62 }
 0x15e   :  { %v623_v42 = vmax.f32 %v3602_v9, %v1678_v6  ;;  %v1739_v48 = vand.u32 2147483647, %v1738_v47  ;;  %vm3699_vm13 = vcmp.lt.f32.partialorder %v1743_v35, 8388608.0  ;;  %v1761_v28 = vcvt.f32.s32 %v3562_v43 }
 0x15f   :  { %v1769_v0 = vcvt.f32.s32 %v3567_v29  ;;  %v1777_v54 = vcvt.f32.s32 %v3571_v41  ;;  %v1733_v18 = vor.u32 %v1732_v7, %v1731_v31  ;;  %v1747_v60 = vand.u32 2147483647, %v1746_v11 }
 0x160   :  { %v1751_v46 = vand.u32 2147483647, %v3558_v40  ;;  %v1754_v59 = vcvt.s32.f32 %v1753_v23  ;;  %v1726_v62 = vsel %vm3664_vm10, %v3681_v56, %v3537_v49  ;;  %v1756_v6 = vand.u32 2147483648, %v3558_v40 }
 0x161   :  { %v1759_v47 = vand.u32 2147483647, %v3562_v43  ;;  %v1785_v35 = vcvt.f32.s32 %v3577_v51  ;;  %v1767_v1 = vand.u32 2147483647, %v3567_v29  ;;  %v624_v10 = vmax.f32 %v3602_v9, %v1686_v58 }
 0x162   :  { %v782_v31 = vmin.f32 %v3604_v20, %v622_v26  ;;  %v783_v7 = vmin.f32 %v3604_v20, %v623_v42  ;;  %v1741_v11 = vor.u32 %v1740_v33, %v1739_v48  ;;  %v1762_v23 = vcvt.s32.f32 %v1761_v28 }
 0x163   :  { %v1770_v50 = vcvt.s32.f32 %v1769_v0  ;;  %v1778_v39 = vcvt.s32.f32 %v1777_v54  ;;  %v1734_v56 = vsel %vm3683_vm11, %v1733_v18, %v3541_v8  ;;  %v1749_v61 = vor.u32 %v1748_v63, %v1747_v60 }
 0x164   :  { %vm3721_vm14 = vcmp.lt.f32.partialorder %v1751_v46, 8388608.0  ;;  %v1755_v25 = vand.u32 2147483647, %v1754_v59  ;;  %v625_v58 = vmax.f32 %v3602_v9, %v1694_v3  ;;  %v1764_v26 = vand.u32 2147483648, %v3562_v43 }
 0x165   :  { %v1772_v42 = vand.u32 2147483648, %v3567_v29  ;;  %v1775_v33 = vand.u32 2147483647, %v3571_v41  ;;  %v1786_v48 = vcvt.s32.f32 %v1785_v35  ;;  %vm3729_vm15 = vcmp.lt.f32.partialorder %v1759_v47, 8388608.0 }
 0x166   :  { %vm3733_vm0 = vcmp.lt.f32.partialorder %v1767_v1, 8388608.0  ;;  %v626_v46 = vmax.f32 %v3602_v9, %v1702_v4  ;;  %v784_v59 = vmin.f32 %v3604_v20, %v624_v10  ;;  %v942_v3 = vsub.f32 %v782_v31, %v3502_v57 }
 0x167   :  { %v943_v5 = vsub.f32 %v783_v7, %v3508_v45  ;;  %v1742_v63 = vsel %vm3692_vm12, %v1741_v11, %v3550_v21  ;;  %v1763_v0 = vand.u32 2147483647, %v1762_v23  ;;  %v1771_v54 = vand.u32 2147483647, %v1770_v50 }
 0x168   :  { %v1779_v18 = vand.u32 2147483647, %v1778_v39  ;;  %v1750_v1 = vsel %vm3699_vm13, %v1749_v61, %v3554_v52  ;;  %v1757_v47 = vor.u32 %v1756_v6, %v1755_v25  ;;  %v627_v4 = vmax.f32 %v3602_v9, %v1710_v37 }
 0x169   :  { %v785_v10 = vmin.f32 %v3604_v20, %v625_v58  ;;  %v1780_v57 = vand.u32 2147483648, %v3571_v41  ;;  %v1783_v45 = vand.u32 2147483647, %v3577_v51  ;;  %v1787_v35 = vand.u32 2147483647, %v1786_v48 }
 0x16a   :  { %v628_v44 = vmax.f32 %v3602_v9, %v1718_v55  ;;  %v786_v31 = vmin.f32 %v3604_v20, %v626_v46  ;;  %v944_v39 = vsub.f32 %v784_v59, %v3513_v34  ;;  %v1102_v50 = vmul.f32 %v942_v3, %v942_v3 }
 0x16b   :  { %v1103_v7 = vmul.f32 %v943_v5, %v943_v5  ;;  %v1765_v53 = vor.u32 %v1764_v26, %v1763_v0  ;;  %v1773_v11 = vor.u32 %v1772_v42, %v1771_v54  ;;  %v1781_v25 = vor.u32 %v1780_v57, %v1779_v18 }
 0x16c   :  { %v1788_v37 = vand.u32 2147483648, %v3577_v51  ;;  %vm3755_vm1 = vcmp.lt.f32.partialorder %v1775_v33, 8388608.0  ;;  %v629_v23 = vmax.f32 %v3602_v9, %v1726_v62  ;;  %v787_v61 = vmin.f32 %v3604_v20, %v627_v4 }
 0x16d   :  { %v945_v55 = vsub.f32 %v785_v10, %v3520_v36  ;;  %v1758_v34 = vsel %vm3721_vm14, %v1757_v47, %v3558_v40  ;;  %vm3765_vm2 = vcmp.lt.f32.partialorder %v1783_v45, 8388608.0  ;;  %v630_v42 = vmax.f32 %v3602_v9, %v1734_v56 }
 0x16e   :  { %v1789_v26 = vor.u32 %v1788_v37, %v1787_v35  ;;  %v788_v33 = vmin.f32 %v3604_v20, %v628_v44  ;;  %v946_v48 = vsub.f32 %v786_v31, %v3524_v19  ;;  %v1104_v62 = vmul.f32 %v944_v39, %v944_v39 }
 0x16f   :  { %v1262_v46 = vadd.f32 %v1103_v7, %v1102_v50  ;;  %v1766_v36 = vsel %vm3729_vm15, %v1765_v53, %v3562_v43  ;;  %v1774_v22 = vsel %vm3733_vm0, %v1773_v11, %v3567_v29  ;;  %v1782_v59 = vsel %vm3755_vm1, %v1781_v25, %v3571_v41 }
 0x170   :  { %v631_v56 = vmax.f32 %v3602_v9, %v1742_v63  ;;  %v789_v3 = vmin.f32 %v3604_v20, %v629_v23  ;;  %v947_v19 = vsub.f32 %v787_v61, %v3528_v27  ;;  %v1105_v5 = vmul.f32 %v945_v55, %v945_v55 }
 0x171   :  { %v1263_v0 = vadd.f32 %v1262_v46, %v1104_v62  ;;  %v1790_v28 = vsel %vm3765_vm2, %v1789_v26, %v3577_v51  ;;  %v632_v54 = vmax.f32 %v3602_v9, %v1750_v1  ;;  %v633_v60 = vmax.f32 %v3602_v9, %v1758_v34 }
 0x172   :  { %v634_v18 = vmax.f32 %v3602_v9, %v1766_v36  ;;  %v790_v47 = vmin.f32 %v3604_v20, %v630_v42  ;;  %v948_v63 = vsub.f32 %v788_v33, %v3533_v24  ;;  %v1106_v4 = vmul.f32 %v946_v48, %v946_v48 }
 0x173   :  { %v1264_v10 = vadd.f32 %v1263_v0, %v1105_v5  ;;  %v635_v27 = vmax.f32 %v3602_v9, %v1774_v22  ;;  %v636_v57 = vmax.f32 %v3602_v9, %v1782_v59  ;;  %v637_v45 = vmax.f32 %v3602_v9, %v1790_v28 }
 0x174   :  { %v791_v35 = vmin.f32 %v3604_v20, %v631_v56  ;;  %v949_v1 = vsub.f32 %v789_v3, %v3537_v49  ;;  %v1107_v44 = vmul.f32 %v947_v19, %v947_v19  ;;  %v792_v39 = vmin.f32 %v3604_v20, %v632_v54 }
 0x175   :  { %v1265_v31 = vadd.f32 %v1264_v10, %v1106_v4  ;;  %v793_v50 = vmin.f32 %v3604_v20, %v633_v60  ;;  %v3801_v24 = vmul.f32 %v3587_v32, %v3178_v2  ;;  %v794_v7 = vmin.f32 %v3604_v20, %v634_v18 }
 0x176   :  { %v950_v53 = vsub.f32 %v790_v47, %v3541_v8  ;;  %v1108_v11 = vmul.f32 %v948_v63, %v948_v63  ;;  %v795_v25 = vmin.f32 %v3604_v20, %v635_v27  ;;  %v796_v49 = vmin.f32 %v3604_v20, %v636_v57 }
 0x177   :  { %v1266_v9 = vadd.f32 %v1265_v31, %v1107_v44  ;;  %v797_v37 = vmin.f32 %v3604_v20, %v637_v45  ;;  %v951_v6 = vsub.f32 %v791_v35, %v3550_v21  ;;  %v1109_v23 = vmul.f32 %v949_v1, %v949_v1  ;;  %v6439_v35 = vld [vmem:[#allocation11_spill] sm:$0xff]  ;;  %v6440_v44 = vld [vmem:[#allocation12_spill] sm:$0xff] }
 0x178   :  { %v952_v55 = vsub.f32 %v792_v39, %v3554_v52  ;;  %v953_v34 = vsub.f32 %v793_v50, %v3558_v40  ;;  %v1601_v58 = vcvt.f32.s32 %v3801_v24  ;;  %v954_v8 = vsub.f32 %v794_v7, %v3562_v43  ;;  %v6441_v7 = vld [vmem:[#allocation13_spill] sm:$0xff] }
 0x179   :  { %v1267_v61 = vadd.f32 %v1266_v9, %v1108_v11  ;;  %v1110_v26 = vmul.f32 %v950_v53, %v950_v53  ;;  %v3815_v33 = vmul.f32 %v3587_v32, %v3060_v12  ;;  %v955_v20 = vsub.f32 %v795_v25, %v3567_v29  ;;  %v6442_v11 = vld [vmem:[#allocation14_spill] sm:$0xff] }
 0x17a   :  { %v956_v21 = vsub.f32 %v796_v49, %v3571_v41  ;;  %v3821_v48 = vmul.f32 %v3587_v32, %v3062_v13  ;;  %v957_v52 = vsub.f32 %v797_v37, %v3577_v51  ;;  %v1111_v40 = vmul.f32 %v951_v6, %v951_v6  ;;  %v6443_v37 = vld [vmem:[#allocation15_spill] sm:$0xff] }
 0x17b   :  { %v1268_v42 = vadd.f32 %v1267_v61, %v1109_v23  ;;  %v1112_v46 = vmul.f32 %v952_v55, %v952_v55  ;;  %v1113_v43 = vmul.f32 %v953_v34, %v953_v34  ;;  %v1602_v36 = vcvt.s32.f32 %v1601_v58  ;;  %v6444_v23 = vld [vmem:[#allocation16_spill] sm:$0xff] }
 0x17c   :  { %v1114_v22 = vmul.f32 %v954_v8, %v954_v8  ;;  %v3826_v56 = vmul.f32 %v3587_v32, %v3064_v14  ;;  %v1921_v29 = vcvt.f32.s32 %v3815_v33  ;;  %v1115_v41 = vmul.f32 %v955_v20, %v955_v20 }
 0x17d   :  { %v1269_v62 = vadd.f32 %v1268_v42, %v1110_v26  ;;  %v1116_v3 = vmul.f32 %v956_v21, %v956_v21  ;;  %v1599_v19 = vand.u32 2147483647, %v3801_v24  ;;  %v1929_v5 = vcvt.f32.s32 %v3821_v48  ;;  %v6445_v42 = vld [vmem:[#allocation17_spill] sm:$0xff]  ;;  %v6446_v21 = vld [vmem:[#allocation18_spill] sm:$0xff] }
 0x17e   :  { %v1117_v51 = vmul.f32 %v957_v52, %v957_v52  ;;  %v3833_v28 = vmul.f32 %v3587_v32, %v3066_v15  ;;  %v3837_v54 = vmul.f32 %v3587_v32, %v3068_v16  ;;  %v1603_v60 = vand.u32 2147483647, %v1602_v36 }
 0x17f   :  { %v1270_v59 = vadd.f32 %v1269_v62, %v1111_v40  ;;  %v1604_v18 = vand.u32 2147483648, %v3801_v24  ;;  %v3842_v47 = vmul.f32 %v3587_v32, %v3070_v17  ;;  %v3846_v63 = vmul.f32 %v3587_v32, %v6393_v30 }
 0x180   :  { %v3850_v10 = vmul.f32 %v3587_v32, %v6394_v38  ;;  %v1922_v27 = vcvt.s32.f32 %v1921_v29  ;;  %v1937_v57 = vcvt.f32.s32 %v3826_v56  ;;  %vm3853_vm3 = vcmp.lt.f32.partialorder %v1599_v19, 8388608.0 }
 0x181   :  { %v1271_v0 = vadd.f32 %v1270_v59, %v1112_v46  ;;  %v3859_v1 = vmul.f32 %v3587_v32, %v6439_v35  ;;  %v3863_v31 = vmul.f32 %v3587_v32, %v6440_v44  ;;  %v1930_v39 = vcvt.s32.f32 %v1929_v5 }
 0x182   :  { %v3867_v53 = vmul.f32 %v3587_v32, %v6441_v7  ;;  %v3871_v9 = vmul.f32 %v3587_v32, %v6442_v11  ;;  %v1945_v25 = vcvt.f32.s32 %v3833_v28  ;;  %v1605_v49 = vor.u32 %v1604_v18, %v1603_v60 }
 0x183   :  { %v1272_v4 = vadd.f32 %v1271_v0, %v1113_v43  ;;  %v3876_v6 = vmul.f32 %v3587_v32, %v6443_v37  ;;  %v3880_v61 = vmul.f32 %v3587_v32, %v6444_v23  ;;  %v1919_v55 = vand.u32 2147483647, %v3815_v33 }
 0x184   :  { %v1923_v58 = vand.u32 2147483647, %v1922_v27  ;;  %v1938_v8 = vcvt.s32.f32 %v1937_v57  ;;  %v1953_v26 = vcvt.f32.s32 %v3837_v54  ;;  %v3886_v20 = vmul.f32 %v3587_v32, %v6445_v42 }
 0x185   :  { %v1273_v50 = vadd.f32 %v1272_v4, %v1114_v22  ;;  %v3890_v52 = vmul.f32 %v3587_v32, %v6446_v21  ;;  %v1927_v40 = vand.u32 2147483647, %v3821_v48  ;;  %v1931_v62 = vand.u32 2147483647, %v1930_v39 }
 0x186   :  { %v1924_v43 = vand.u32 2147483648, %v3815_v33  ;;  %v1932_v36 = vand.u32 2147483648, %v3821_v48  ;;  %v1946_v22 = vcvt.s32.f32 %v1945_v25  ;;  %v1606_v59 = vsel %vm3853_vm3, %v1605_v49, %v3801_v24 }
 0x187   :  { %v1274_v34 = vadd.f32 %v1273_v50, %v1115_v41  ;;  %vm3898_vm4 = vcmp.lt.f32.partialorder %v1919_v55, 8388608.0  ;;  %v1935_v32 = vand.u32 2147483647, %v3826_v56  ;;  %v1961_v41 = vcvt.f32.s32 %v3842_v47 }
 0x188   :  { %v1925_v5 = vor.u32 %v1924_v43, %v1923_v58  ;;  %v1954_v0 = vcvt.s32.f32 %v1953_v26  ;;  %vm3904_vm5 = vcmp.lt.f32.partialorder %v1927_v40, 8388608.0  ;;  %v1933_v18 = vor.u32 %v1932_v36, %v1931_v62 }
 0x189   :  { %v1275_v46 = vadd.f32 %v1274_v34, %v1116_v3  ;;  %v1939_v3 = vand.u32 2147483647, %v1938_v8  ;;  %v1943_v4 = vand.u32 2147483647, %v3833_v28  ;;  %v1969_v24 = vcvt.f32.s32 %v3846_v63 }
 0x18a   :  { %v3910_v27 = vsub.f32 0.0, %v1606_v59  ;;  %v1940_v57 = vand.u32 2147483648, %v3826_v56  ;;  %v1947_v45 = vand.u32 2147483647, %v1946_v22  ;;  %v3914_v39 = vsub.f32 255.0, %v1606_v59 }
 0x18b   :  { %v1276_v19 = vadd.f32 %v1275_v46, %v1117_v51  ;;  %v1977_v51 = vcvt.f32.s32 %v3850_v10  ;;  %vm3916_vm6 = vcmp.lt.f32.partialorder %v1935_v32, 8388608.0  ;;  %v1951_v25 = vand.u32 2147483647, %v3837_v54 }
 0x18c   :  { %v1962_v49 = vcvt.s32.f32 %v1961_v41  ;;  %v1926_v55 = vsel %vm3898_vm4, %v1925_v5, %v3815_v33  ;;  %v1941_v34 = vor.u32 %v1940_v57, %v1939_v3  ;;  %v1948_v58 = vand.u32 2147483648, %v3833_v28 }
 0x18d   :  { %1277 = vadd.xlane.f32.xlu1 %v1276_v19  ;;  %v1955_v8 = vand.u32 2147483647, %v1954_v0  ;;  %v1934_v26 = vsel %vm3904_vm5, %v1933_v18, %v3821_v48  ;;  %vm3928_vm7 = vcmp.lt.f32.partialorder %v1943_v4, 8388608.0  ;;  %v1970_v62 = vcvt.s32.f32 %v1969_v24 }
 0x18e   :  { %v1985_v46 = vcvt.f32.s32 %v3859_v1  ;;  %v1949_v43 = vor.u32 %v1948_v58, %v1947_v45  ;;  %v1956_v36 = vand.u32 2147483648, %v3837_v54  ;;  %v1959_v22 = vand.u32 2147483647, %v3842_v47 }
 0x18f   :  { %v1978_v59 = vcvt.s32.f32 %v1977_v51  ;;  %vm3935_vm8 = vcmp.lt.f32.partialorder %v1951_v25, 8388608.0  ;;  %v1963_v32 = vand.u32 2147483647, %v1962_v49  ;;  %v1967_v41 = vand.u32 2147483647, %v3846_v63 }
 0x190   :  { %v1993_v19 = vcvt.f32.s32 %v3863_v31  ;;  %v1942_v5 = vsel %vm3916_vm6, %v1941_v34, %v3826_v56  ;;  %v1957_v3 = vor.u32 %v1956_v36, %v1955_v8  ;;  %v1964_v0 = vand.u32 2147483648, %v3842_v47 }
 0x191   :  { %v1975_v60 = vand.u32 2147483647, %v3850_v10  ;;  %v1971_v18 = vand.u32 2147483647, %v1970_v62  ;;  %v1983_v4 = vand.u32 2147483647, %v3859_v1  ;;  %v1986_v24 = vcvt.s32.f32 %v1985_v46 }
 0x192   :  { %v2001_v57 = vcvt.f32.s32 %v3867_v53  ;;  %v1950_v45 = vsel %vm3928_vm7, %v1949_v43, %v3833_v28  ;;  %vm3951_vm9 = vcmp.lt.f32.partialorder %v1959_v22, 8388608.0  ;;  %v1972_v50 = vand.u32 2147483648, %v3846_v63 }
 0x193   :  { %v1979_v25 = vand.u32 2147483647, %v1978_v59  ;;  %v1965_v49 = vor.u32 %v1964_v0, %v1963_v32  ;;  %vm3956_vm10 = vcmp.lt.f32.partialorder %v1967_v41, 8388608.0  ;;  %v1994_v58 = vcvt.s32.f32 %v1993_v19 }
 0x194   :  { %v2009_v8 = vcvt.f32.s32 %v3871_v9  ;;  %v1958_v40 = vsel %vm3935_vm8, %v1957_v3, %v3837_v54  ;;  %vm3964_vm11 = vcmp.lt.f32.partialorder %v1975_v60, 8388608.0  ;;  %v1980_v46 = vand.u32 2147483648, %v3850_v10 }
 0x195   :  { %v1991_v43 = vand.u32 2147483647, %v3863_v31  ;;  %v1973_v36 = vor.u32 %v1972_v50, %v1971_v18  ;;  %vm3970_vm12 = vcmp.lt.f32.partialorder %v1983_v4, 8388608.0  ;;  %v1987_v59 = vand.u32 2147483647, %v1986_v24 }
 0x196   :  { %v2002_v32 = vcvt.s32.f32 %v2001_v57  ;;  %v1981_v41 = vor.u32 %v1980_v46, %v1979_v25  ;;  %v1988_v19 = vand.u32 2147483648, %v3859_v1  ;;  %v1999_v29 = vand.u32 2147483647, %v3867_v53 }
 0x197   :  { %v654_v3 = vmax.f32 %v3910_v27, %v1926_v55  ;;  %v1966_v0 = vsel %vm3951_vm9, %v1965_v49, %v3842_v47  ;;  %v1995_v60 = vand.u32 2147483647, %v1994_v58  ;;  %v2010_v21 = vcvt.s32.f32 %v2009_v8 }
 0x198   :  { %v655_v18 = vmax.f32 %v3910_v27, %v1934_v26  ;;  %vm3981_vm13 = vcmp.lt.f32.partialorder %v1991_v43, 8388608.0  ;;  %v1996_v24 = vand.u32 2147483648, %v3863_v31  ;;  %v2007_v57 = vand.u32 2147483647, %v3871_v9 }
 0x199   :  { %v2017_v50 = vcvt.f32.s32 %v3876_v6  ;;  %v1974_v55 = vsel %vm3956_vm10, %v1973_v36, %v3846_v63  ;;  %v1989_v51 = vor.u32 %v1988_v19, %v1987_v59  ;;  %v2003_v25 = vand.u32 2147483647, %v2002_v32 }
 0x19a   :  { %v2004_v49 = vand.u32 2147483648, %v3867_v53  ;;  %v1982_v26 = vsel %vm3964_vm11, %v1981_v41, %v3850_v10  ;;  %vm3995_vm14 = vcmp.lt.f32.partialorder %v1999_v29, 8388608.0  ;;  %v656_v8 = vmax.f32 %v3910_v27, %v1942_v5 }
 0x19b   :  { %v814_v46 = vmin.f32 %v3914_v39, %v654_v3  ;;  %v1997_v43 = vor.u32 %v1996_v24, %v1995_v60  ;;  %v2011_v42 = vand.u32 2147483647, %v2010_v21  ;;  %v2012_v34 = vand.u32 2147483648, %v3871_v9 }
 0x19c   :  { %v815_v36 = vmin.f32 %v3914_v39, %v655_v18  ;;  %vm4003_vm15 = vcmp.lt.f32.partialorder %v2007_v57, 8388608.0  ;;  %v2015_v62 = vand.u32 2147483647, %v3876_v6  ;;  %v2018_v32 = vcvt.s32.f32 %v2017_v50 }
 0x19d   :  { %v657_v41 = vmax.f32 %v3910_v27, %v1950_v45  ;;  %v1990_v5 = vsel %vm3970_vm12, %v1989_v51, %v3859_v1  ;;  %v2005_v19 = vor.u32 %v2004_v49, %v2003_v25  ;;  %v2020_v21 = vand.u32 2147483648, %v3876_v6 }
 0x19e   :  { %v2025_v29 = vcvt.f32.s32 %v3880_v61  ;;  %v2023_v3 = vand.u32 2147483647, %v3880_v61  ;;  %v658_v60 = vmax.f32 %v3910_v27, %v1958_v40  ;;  %v816_v18 = vmin.f32 %v3914_v39, %v656_v8 }
 0x19f   :  { %v974_v24 = vsub.f32 %v814_v46, %v3815_v33  ;;  %v1998_v45 = vsel %vm3981_vm13, %v1997_v43, %v3863_v31  ;;  %v2013_v57 = vor.u32 %v2012_v34, %v2011_v42  ;;  %v2033_v22 = vcvt.f32.s32 %v3886_v20 }
 0x1a0   :  { %v975_v50 = vsub.f32 %v815_v36, %v3821_v48  ;;  %v2019_v51 = vand.u32 2147483647, %v2018_v32  ;;  %v2028_v25 = vand.u32 2147483648, %v3880_v61  ;;  %v659_v49 = vmax.f32 %v3910_v27, %v1966_v0 }
 0x1a1   :  { %v817_v40 = vmin.f32 %v3914_v39, %v657_v41  ;;  %v2006_v33 = vsel %vm3995_vm14, %v2005_v19, %v3867_v53  ;;  %v2026_v8 = vcvt.s32.f32 %v2025_v29  ;;  %v2031_v4 = vand.u32 2147483647, %v3886_v20 }
 0x1a2   :  { %v2041_v42 = vcvt.f32.s32 %v3890_v52  ;;  %vm4031_vm0 = vcmp.lt.f32.partialorder %v2015_v62, 8388608.0  ;;  %v660_v48 = vmax.f32 %v3910_v27, %v1974_v55  ;;  %v818_v43 = vmin.f32 %v3914_v39, %v658_v60 }
 0x1a3   :  { %v976_v0 = vsub.f32 %v816_v18, %v3826_v56  ;;  %v1134_v34 = vmul.f32 %v974_v24, %v974_v24  ;;  %v2014_v58 = vsel %vm4003_vm15, %v2013_v57, %v3871_v9  ;;  %v2034_v36 = vcvt.s32.f32 %v2033_v22 }
 0x1a4   :  { %v2036_v32 = vand.u32 2147483648, %v3886_v20  ;;  %v1135_v41 = vmul.f32 %v975_v50, %v975_v50  ;;  %v2021_v19 = vor.u32 %v2020_v21, %v2019_v51  ;;  %vm4042_vm1 = vcmp.lt.f32.partialorder %v2023_v3, 8388608.0 }
 0x1a5   :  { %v661_v55 = vmax.f32 %v3910_v27, %v1982_v26  ;;  %v819_v29 = vmin.f32 %v3914_v39, %v659_v49  ;;  %v977_v56 = vsub.f32 %v817_v40, %v3833_v28  ;;  %v2027_v60 = vand.u32 2147483647, %v2026_v8  ;;  %v6477_v49 = vld [vmem:[#allocation8_spill] sm:$0xff] }
 0x1a6   :  { %v2039_v18 = vand.u32 2147483647, %v3890_v52  ;;  %v2042_v59 = vcvt.s32.f32 %v2041_v42  ;;  %v662_v24 = vmax.f32 %v3910_v27, %v1990_v5  ;;  %vm4051_vm2 = vcmp.lt.f32.partialorder %v2031_v4, 8388608.0 }
 0x1a7   :  { %v820_v21 = vmin.f32 %v3914_v39, %v660_v48  ;;  %v978_v3 = vsub.f32 %v818_v43, %v3837_v54  ;;  %v1136_v22 = vmul.f32 %v976_v0, %v976_v0  ;;  %v1296_v26 = vadd.f32 %v1135_v41, %v1134_v34 }
 0x1a8   :  { %v2035_v50 = vand.u32 2147483647, %v2034_v36  ;;  %v2044_v51 = vand.u32 2147483648, %v3890_v52  ;;  %v663_v28 = vmax.f32 %v3910_v27, %v1998_v45  ;;  %v4060_v40 = vadd.s32 8, %v6477_v49 }
 0x1a9   :  { %v821_v5 = vmin.f32 %v3914_v39, %v661_v55  ;;  %v979_v8 = vsub.f32 %v819_v29, %v3842_v47  ;;  %v1137_v4 = vmul.f32 %v977_v56, %v977_v56  ;;  %v1297_v42 = vadd.f32 %v1296_v26, %v1136_v22 }
 0x1aa   :  { %6478 = vst [vmem:[#allocation25_spill] sm:$0xff] %v4060_v40  ;;  %v2029_v23 = vor.u32 %v2028_v25, %v2027_v60  ;;  %v2043_v48 = vand.u32 2147483647, %v2042_v59  ;;  %v664_v54 = vmax.f32 %v3910_v27, %v2006_v33  ;;  %v6309_v43 = vcvt.s32.f32 %v4060_v40 }
 0x1ab   :  { %v822_v0 = vmin.f32 %v3914_v39, %v662_v24  ;;  %v980_v34 = vsub.f32 %v820_v21, %v3846_v63  ;;  %v1138_v45 = vmul.f32 %v978_v3, %v978_v3  ;;  %v1298_v36 = vadd.f32 %v1297_v42, %v1137_v4 }
 0x1ac   :  { %v2022_v41 = vsel %vm4031_vm0, %v2021_v19, %v3876_v6  ;;  %v2037_v55 = vor.u32 %v2036_v32, %v2035_v50  ;;  %v665_v47 = vmax.f32 %v3910_v27, %v2014_v58  ;;  %v209_v25 = vmul.f32 0.01, %v6309_v43  ;;  %v6479_v19 = vld [vmem:[#allocation20_spill] sm:$0xff] }
 0x1ad   :  { %v823_v33 = vmin.f32 %v3914_v39, %v663_v28  ;;  %v981_v29 = vsub.f32 %v821_v5, %v3850_v10  ;;  %v1139_v56 = vmul.f32 %v979_v8, %v979_v8  ;;  %v1299_v60 = vadd.f32 %v1298_v36, %v1138_v45 }
 0x1ae   :  { %v2030_v63 = vsel %vm4042_vm1, %v2029_v23, %v3880_v61  ;;  %v2045_v59 = vor.u32 %v2044_v51, %v2043_v48  ;;  %v666_v46 = vmax.f32 %v3910_v27, %v2022_v41  ;;  %v220_v32 = vsub.f32 %v6479_v19, %v209_v25 }
 0x1af   :  { %v824_v58 = vmin.f32 %v3914_v39, %v664_v54  ;;  %v982_v24 = vsub.f32 %v822_v0, %v3859_v1  ;;  %v1140_v21 = vmul.f32 %v980_v34, %v980_v34  ;;  %v1300_v3 = vadd.f32 %v1299_v60, %v1139_v56 }
 0x1b0   :  { %v2038_v10 = vsel %vm4051_vm2, %v2037_v55, %v3886_v20  ;;  %vm2040_vm3 = vcmp.lt.f32.partialorder %v2039_v18, 8388608.0  ;;  %v667_v22 = vmax.f32 %v3910_v27, %v2030_v63  ;;  %v4087_v62 = vmul.f32 0.003921569, %v220_v32 }
 0x1b1   :  { %v825_v23 = vmin.f32 %v3914_v39, %v665_v47  ;;  %v983_v26 = vsub.f32 %v823_v33, %v3863_v31  ;;  %v1141_v50 = vmul.f32 %v981_v29, %v981_v29  ;;  %v1301_v51 = vadd.f32 %v1300_v3, %v1140_v21 }
 0x1b2   :  { %6480 = vst [vmem:[#allocation26_spill] sm:$0xff] %v4087_v62  ;;  %v2046_v28 = vsel %vm2040_vm3, %v2045_v59, %v3890_v52  ;;  %v668_v1 = vmax.f32 %v3910_v27, %v2038_v10  ;;  %2973 = vrcp.f32 %v4087_v62  ;;  %v826_v57 = vmin.f32 %v3914_v39, %v666_v46 }
 0x1b3   :  { %v984_v18 = vsub.f32 %v824_v58, %v3867_v53  ;;  %v1142_v5 = vmul.f32 %v982_v24, %v982_v24  ;;  %v1302_v8 = vadd.f32 %v1301_v51, %v1141_v50  ;;  %v669_v4 = vmax.f32 %v3910_v27, %v2046_v28 }
 0x1b4   :  { %v827_v42 = vmin.f32 %v3914_v39, %v667_v22  ;;  %v985_v31 = vsub.f32 %v825_v23, %v3871_v9  ;;  %v1143_v48 = vmul.f32 %v983_v26, %v983_v26  ;;  %v828_v0 = vmin.f32 %v3914_v39, %v668_v1 }
 0x1b5   :  { %v1303_v54 = vadd.f32 %v1302_v8, %v1142_v5  ;;  %v986_v34 = vsub.f32 %v826_v57, %v3876_v6  ;;  %v1144_v45 = vmul.f32 %v984_v18, %v984_v18  ;;  %v829_v41 = vmin.f32 %v3914_v39, %v669_v4 }
 0x1b6   :  { %v987_v53 = vsub.f32 %v827_v42, %v3880_v61  ;;  %v1145_v55 = vmul.f32 %v985_v31, %v985_v31  ;;  %v4104_v27 = vadd.s32 48, %v6477_v49  ;;  %v988_v25 = vsub.f32 %v828_v0, %v3886_v20 }
 0x1b7   :  { %v1304_v36 = vadd.f32 %v1303_v54, %v1143_v48  ;;  %v1146_v9 = vmul.f32 %v986_v34, %v986_v34  ;;  %v989_v29 = vsub.f32 %v829_v41, %v3890_v52  ;;  %v4113_v20 = vadd.s32 40, %v6477_v49 }
 0x1b8   :  { %6481 = vst [vmem:[#allocation27_spill] sm:$0xff] %v4104_v27  ;;  %v1147_v56 = vmul.f32 %v987_v53, %v987_v53  ;;  %v6307_v6 = vcvt.s32.f32 %v4104_v27  ;;  %v1148_v59 = vmul.f32 %v988_v25, %v988_v25 }
 0x1b9   :  { %v1305_v47 = vadd.f32 %v1304_v36, %v1144_v45  ;;  %v1149_v46 = vmul.f32 %v989_v29, %v989_v29  ;;  %6482 = vst [vmem:[#allocation28_spill] sm:$0xff] %v4113_v20  ;;  %v6308_v22 = vcvt.s32.f32 %v4113_v20 }
 0x1ba   :  { %v214_v58 = vmul.f32 0.01, %v6307_v6 }
 0x1bb   :  { %v1306_v33 = vadd.f32 %v1305_v47, %v1145_v55  ;;  %v4132_v57 = vmul.f32 0.01, %v6308_v22 }
 0x1bc   :  { %v225_v21 = vsub.f32 %v6479_v19, %v214_v58 }
 0x1bd   :  { %v1307_v60 = vadd.f32 %v1306_v33, %v1146_v9  ;;  %v6486_v9 = vld [vmem:[#allocation16_spill] sm:$0xff] }
 0x1be   :  { %v4123_v26 = vmul.f32 0.003921569, %v225_v21  ;;  %v6488_v21 = vld [vmem:[#allocation18_spill] sm:$0xff] }
 0x1bf   :  { %v2974_v63 = vpop.eup %2973  ;;  %v1308_v39 = vadd.f32 %v1307_v60, %v1147_v56  ;;  %v6487_v56 = vld [vmem:[#allocation17_spill] sm:$0xff] }
 0x1c0   :  { %v263_v32 = vmul.f32 %v2974_v63, %v3178_v2  ;;  %v4117_v3 = vmul.f32 %v2974_v63, %v3060_v12  ;;  %v4120_v10 = vmul.f32 %v2974_v63, %v3062_v13  ;;  %6483 = vst [vmem:[#allocation29_spill] sm:$0xff] %v4123_v26  ;;  %v4126_v50 = vmul.f32 %v2974_v63, %v3064_v14 }
 0x1c1   :  { %v1309_v61 = vadd.f32 %v1308_v39, %v1148_v59  ;;  %v4135_v5 = vmul.f32 %v2974_v63, %v3066_v15  ;;  %v4138_v8 = vmul.f32 %v2974_v63, %v3068_v16  ;;  %2975 = vrcp.f32 %v4123_v26 }
 0x1c2   :  { %v1593_v52 = vcvt.f32.s32 %v263_v32  ;;  %v1793_v51 = vcvt.f32.s32 %v4117_v3  ;;  %v1591_v28 = vand.u32 2147483647, %v263_v32  ;;  %v1801_v1 = vcvt.f32.s32 %v4120_v10 }
 0x1c3   :  { %v1310_v24 = vadd.f32 %v1309_v61, %v1149_v46  ;;  %v1596_v4 = vand.u32 2147483648, %v263_v32  ;;  %v4142_v42 = vmul.f32 %v2974_v63, %v3070_v17  ;;  %v4145_v31 = vmul.f32 %v2974_v63, %v6393_v30 }
 0x1c4   :  { %v1594_v23 = vcvt.s32.f32 %v1593_v52  ;;  %v1809_v48 = vcvt.f32.s32 %v4126_v50  ;;  %v4149_v54 = vmul.f32 %v2974_v63, %v6394_v38  ;;  %v4152_v0 = vmul.f32 %v2974_v63, %v6439_v35 }
 0x1c5   :  { %1311 = vadd.xlane.f32.xlu0 %v1310_v24  ;;  %v4155_v34 = vmul.f32 %v2974_v63, %v6440_v44  ;;  %v1794_v45 = vcvt.s32.f32 %v1793_v51  ;;  %vm4157_vm4 = vcmp.lt.f32.partialorder %v1591_v28, 8388608.0  ;;  %v4162_v41 = vmul.f32 %v2974_v63, %v6441_v7 }
 0x1c6   :  { %v1595_v18 = vand.u32 2147483647, %v1594_v23  ;;  %v4165_v53 = vmul.f32 %v2974_v63, %v6442_v11  ;;  %v1802_v55 = vcvt.s32.f32 %v1801_v1  ;;  %v4168_v25 = vmul.f32 %v2974_v63, %v6443_v37 }
 0x1c7   :  { %v4171_v33 = vmul.f32 %v2974_v63, %v6486_v9  ;;  %v1817_v29 = vcvt.f32.s32 %v4135_v5  ;;  %v4175_v60 = vmul.f32 %v2974_v63, %v6487_v56  ;;  %v1791_v59 = vand.u32 2147483647, %v4117_v3 }
 0x1c8   :  { %v1597_v47 = vor.u32 %v1596_v4, %v1595_v18  ;;  %v1799_v39 = vand.u32 2147483647, %v4120_v10  ;;  %v1810_v46 = vcvt.s32.f32 %v1809_v48  ;;  %v1795_v61 = vand.u32 2147483647, %v1794_v45 }
 0x1c9   :  { %v1807_v58 = vand.u32 2147483647, %v4126_v50  ;;  %v1825_v24 = vcvt.f32.s32 %v4138_v8  ;;  %v1833_v52 = vcvt.f32.s32 %v4142_v42  ;;  %v4183_v23 = vmul.f32 %v2974_v63, %v6488_v21 }
 0x1ca   :  { %v1796_v51 = vand.u32 2147483648, %v4117_v3  ;;  %v1803_v28 = vand.u32 2147483647, %v1802_v55  ;;  %v1804_v1 = vand.u32 2147483648, %v4120_v10  ;;  %v1598_v18 = vsel %vm4157_vm4, %v1597_v47, %v263_v32 }
 0x1cb   :  { %v1815_v4 = vand.u32 2147483647, %v4135_v5  ;;  %v1818_v48 = vcvt.s32.f32 %v1817_v29  ;;  %v1841_v45 = vcvt.f32.s32 %v4145_v31  ;;  %vm4191_vm5 = vcmp.lt.f32.partialorder %v1791_v59, 8388608.0 }
 0x1cc   :  { %vm4195_vm6 = vcmp.lt.f32.partialorder %v1799_v39, 8388608.0  ;;  %v1811_v22 = vand.u32 2147483647, %v1810_v46  ;;  %v1849_v55 = vcvt.f32.s32 %v4149_v54  ;;  %v4200_v43 = vor.u32 %v1796_v51, %v1795_v61 }
 0x1cd   :  { %vm4202_vm7 = vcmp.lt.f32.partialorder %v1807_v58, 8388608.0  ;;  %v1826_v36 = vcvt.s32.f32 %v1825_v24  ;;  %v1834_v47 = vcvt.s32.f32 %v1833_v52  ;;  %v4206_v29 = vsub.f32 0.0, %v1598_v18 }
 0x1ce   :  { %v4208_v59 = vor.u32 %v1804_v1, %v1803_v28  ;;  %v1812_v39 = vand.u32 2147483648, %v4126_v50  ;;  %v1823_v27 = vand.u32 2147483647, %v4138_v8  ;;  %v4212_v20 = vsub.f32 255.0, %v1598_v18  ;;  %v4218_v51 = vpop.eup %2975 }
 0x1cf   :  { %vm4214_vm8 = vcmp.lt.f32.partialorder %v1815_v4, 8388608.0  ;;  %v1819_v61 = vand.u32 2147483647, %v1818_v48  ;;  %v1842_v58 = vcvt.s32.f32 %v1841_v45  ;;  %v1820_v52 = vand.u32 2147483648, %v4135_v5 }
 0x1d0   :  { %v4220_v24 = vor.u32 %v1812_v39, %v1811_v22  ;;  %v1850_v28 = vcvt.s32.f32 %v1849_v55  ;;  %v1857_v1 = vcvt.f32.s32 %v4152_v0  ;;  %v1798_v18 = vsel %vm4191_vm5, %v4200_v43, %v4117_v3 }
 0x1d1   :  { %v1827_v4 = vand.u32 2147483647, %v1826_v36  ;;  %v1828_v40 = vand.u32 2147483648, %v4138_v8  ;;  %v1835_v26 = vand.u32 2147483647, %v1834_v47  ;;  %v1806_v22 = vsel %vm4195_vm6, %v4208_v59, %v4120_v10 }
 0x1d2   :  { %vm4233_vm9 = vcmp.lt.f32.partialorder %v1823_v27, 8388608.0  ;;  %v1831_v45 = vand.u32 2147483647, %v4142_v42  ;;  %v1865_v55 = vcvt.f32.s32 %v4155_v34  ;;  %v4239_v39 = vor.u32 %v1820_v52, %v1819_v61 }
 0x1d3   :  { %v1836_v43 = vand.u32 2147483648, %v4142_v42  ;;  %v1839_v6 = vand.u32 2147483647, %v4145_v31  ;;  %v1843_v36 = vand.u32 2147483647, %v1842_v58  ;;  %v1814_v63 = vsel %vm4202_vm7, %v4220_v24, %v4126_v50 }
 0x1d4   :  { %v1847_v27 = vand.u32 2147483647, %v4149_v54  ;;  %v1851_v47 = vand.u32 2147483647, %v1850_v28  ;;  %v1858_v59 = vcvt.s32.f32 %v1857_v1  ;;  %v4248_v62 = vor.u32 %v1828_v40, %v1827_v4 }
 0x1d5   :  { %v4250_v49 = vor.u32 %v1836_v43, %v1835_v26  ;;  %v1844_v61 = vand.u32 2147483648, %v4145_v31  ;;  %v1855_v52 = vand.u32 2147483647, %v4152_v0  ;;  %vm4254_vm10 = vcmp.lt.f32.partialorder %v1831_v45, 8388608.0 }
 0x1d6   :  { %v1852_v58 = vand.u32 2147483648, %v4149_v54  ;;  %v1863_v32 = vand.u32 2147483647, %v4155_v34  ;;  %v1866_v24 = vcvt.s32.f32 %v1865_v55  ;;  %v1822_v40 = vsel %vm4214_vm8, %v4239_v39, %v4135_v5 }
 0x1d7   :  { %vm4264_vm11 = vcmp.lt.f32.partialorder %v1839_v6, 8388608.0  ;;  %v4268_v28 = vor.u32 %v1844_v61, %v1843_v36  ;;  %v1873_v1 = vcvt.f32.s32 %v4162_v41  ;;  %vm4271_vm12 = vcmp.lt.f32.partialorder %v1847_v27, 8388608.0 }
 0x1d8   :  { %v4275_v45 = vor.u32 %v1852_v58, %v1851_v47  ;;  %v1859_v55 = vand.u32 2147483647, %v1858_v59  ;;  %v1881_v43 = vcvt.f32.s32 %v4165_v53  ;;  %v1830_v46 = vsel %vm4233_vm9, %v4248_v62, %v4138_v8 }
 0x1d9   :  { %v1838_v39 = vsel %vm4254_vm10, %v4250_v49, %v4142_v42  ;;  %vm4286_vm13 = vcmp.lt.f32.partialorder %v1855_v52, 8388608.0  ;;  %v1860_v36 = vand.u32 2147483648, %v4152_v0  ;;  %vm4291_vm14 = vcmp.lt.f32.partialorder %v1863_v32, 8388608.0 }
 0x1da   :  { %v1867_v47 = vand.u32 2147483647, %v1866_v24  ;;  %v1868_v59 = vand.u32 2147483648, %v4155_v34  ;;  %v1889_v62 = vcvt.f32.s32 %v4168_v25  ;;  %v1846_v49 = vsel %vm4264_vm11, %v4268_v28, %v4145_v31 }
 0x1db   :  { %v1871_v21 = vand.u32 2147483647, %v4162_v41  ;;  %v1874_v48 = vcvt.s32.f32 %v1873_v1  ;;  %v1897_v61 = vcvt.f32.s32 %v4171_v33  ;;  %v4307_v58 = vor.u32 %v1860_v36, %v1859_v55 }
 0x1dc   :  { %v1882_v32 = vcvt.s32.f32 %v1881_v43  ;;  %v1905_v24 = vcvt.f32.s32 %v4175_v60  ;;  %v1879_v56 = vand.u32 2147483647, %v4165_v53  ;;  %v1887_v26 = vand.u32 2147483647, %v4168_v25 }
 0x1dd   :  { %v638_v28 = vmax.f32 %v4206_v29, %v1798_v18  ;;  %v639_v1 = vmax.f32 %v4206_v29, %v1806_v22  ;;  %v1869_v9 = vor.u32 %v1868_v59, %v1867_v47  ;;  %v1876_v37 = vand.u32 2147483648, %v4162_v41 }
 0x1de   :  { %v1890_v11 = vcvt.s32.f32 %v1889_v62  ;;  %v1913_v7 = vcvt.f32.s32 %v4183_v23  ;;  %vm4316_vm15 = vcmp.lt.f32.partialorder %v1871_v21, 8388608.0  ;;  %v1875_v43 = vand.u32 2147483647, %v1874_v48 }
 0x1df   :  { %v1895_v36 = vand.u32 2147483647, %v4171_v33  ;;  %v1898_v52 = vcvt.s32.f32 %v1897_v61  ;;  %v1862_v18 = vsel %vm4286_vm13, %v4307_v58, %v4152_v0  ;;  %v1883_v22 = vand.u32 2147483647, %v1882_v32 }
 0x1e0   :  { %v1884_v47 = vand.u32 2147483648, %v4165_v53  ;;  %v1906_v59 = vcvt.s32.f32 %v1905_v24  ;;  %vm4326_vm0 = vcmp.lt.f32.partialorder %v1879_v56, 8388608.0  ;;  %vm4330_vm1 = vcmp.lt.f32.partialorder %v1887_v26, 8388608.0 }
 0x1e1   :  { %v640_v48 = vmax.f32 %v4206_v29, %v1814_v63  ;;  %v798_v61 = vmin.f32 %v4212_v20, %v638_v28  ;;  %v799_v44 = vmin.f32 %v4212_v20, %v639_v1  ;;  %v1870_v6 = vsel %vm4291_vm14, %v1869_v9, %v4155_v34 }
 0x1e2   :  { %v1891_v58 = vand.u32 2147483647, %v1890_v11  ;;  %v1892_v56 = vand.u32 2147483648, %v4168_v25  ;;  %v1914_v32 = vcvt.s32.f32 %v1913_v7  ;;  %v1877_v24 = vor.u32 %v1876_v37, %v1875_v43 }
 0x1e3   :  { %vm4341_vm2 = vcmp.lt.f32.partialorder %v1895_v36, 8388608.0  ;;  %v1899_v35 = vand.u32 2147483647, %v1898_v52  ;;  %v641_v63 = vmax.f32 %v4206_v29, %v1822_v40  ;;  %v1885_v38 = vor.u32 %v1884_v47, %v1883_v22 }
 0x1e4   :  { %v1900_v28 = vand.u32 2147483648, %v4171_v33  ;;  %v1903_v1 = vand.u32 2147483647, %v4175_v60  ;;  %v1907_v30 = vand.u32 2147483647, %v1906_v59  ;;  %v642_v9 = vmax.f32 %v4206_v29, %v1830_v46 }
 0x1e5   :  { %v800_v11 = vmin.f32 %v4212_v20, %v640_v48  ;;  %v958_v7 = vsub.f32 %v798_v61, %v4117_v3  ;;  %v959_v37 = vsub.f32 %v799_v44, %v4120_v10  ;;  %v1893_v27 = vor.u32 %v1892_v56, %v1891_v58 }
 0x1e6   :  { %v1908_v43 = vand.u32 2147483648, %v4175_v60  ;;  %v1911_v52 = vand.u32 2147483647, %v4183_v23  ;;  %v1915_v40 = vand.u32 2147483647, %v1914_v32  ;;  %v1878_v36 = vsel %vm4316_vm15, %v1877_v24, %v4162_v41 }
 0x1e7   :  { %v1901_v22 = vor.u32 %v1900_v28, %v1899_v35  ;;  %v643_v47 = vmax.f32 %v4206_v29, %v1838_v39  ;;  %v801_v46 = vmin.f32 %v4212_v20, %v641_v63  ;;  %vm4359_vm3 = vcmp.lt.f32.partialorder %v1903_v1, 8388608.0 }
 0x1e8   :  { %v1909_v44 = vor.u32 %v1908_v43, %v1907_v30  ;;  %v1916_v3 = vand.u32 2147483648, %v4183_v23  ;;  %v644_v10 = vmax.f32 %v4206_v29, %v1846_v49  ;;  %v802_v48 = vmin.f32 %v4212_v20, %v642_v9 }
 0x1e9   :  { %v960_v61 = vsub.f32 %v800_v11, %v4126_v50  ;;  %v1118_v55 = vmul.f32 %v958_v7, %v958_v7  ;;  %v1119_v58 = vmul.f32 %v959_v37, %v959_v37  ;;  %v1886_v35 = vsel %vm4326_vm0, %v1885_v38, %v4165_v53 }
 0x1ea   :  { %v1894_v39 = vsel %vm4330_vm1, %v1893_v27, %v4168_v25  ;;  %vm4373_vm4 = vcmp.lt.f32.partialorder %v1911_v52, 8388608.0  ;;  %v1917_v56 = vor.u32 %v1916_v3, %v1915_v40  ;;  %v1902_v49 = vsel %vm4341_vm2, %v1901_v22, %v4171_v33 }
 0x1eb   :  { %v6521_v50 = vsel %vm4271_vm12, %v4275_v45, %v4149_v54  ;;  %v803_v62 = vmin.f32 %v4212_v20, %v643_v47  ;;  %v961_v21 = vsub.f32 %v801_v46, %v4135_v5  ;;  %v1910_v32 = vsel %vm4359_vm3, %v1909_v44, %v4175_v60 }
 0x1ec   :  { %v645_v38 = vmax.f32 %v4206_v29, %v6521_v50  ;;  %v646_v24 = vmax.f32 %v4206_v29, %v1862_v18  ;;  %v647_v26 = vmax.f32 %v4206_v29, %v1870_v6  ;;  %v648_v63 = vmax.f32 %v4206_v29, %v1878_v36 }
 0x1ed   :  { %v804_v4 = vmin.f32 %v4212_v20, %v644_v10  ;;  %v962_v45 = vsub.f32 %v802_v48, %v4138_v8  ;;  %v1120_v28 = vmul.f32 %v960_v61, %v960_v61  ;;  %v1279_v1 = vadd.f32 %v1119_v58, %v1118_v55 }
 0x1ee   :  { %v1918_v5 = vsel %vm4373_vm4, %v1917_v56, %v4183_v23  ;;  %v649_v9 = vmax.f32 %v4206_v29, %v1886_v35  ;;  %v650_v11 = vmax.f32 %v4206_v29, %v1894_v39  ;;  %v651_v18 = vmax.f32 %v4206_v29, %v1902_v49 }
 0x1ef   :  { %v805_v6 = vmin.f32 %v4212_v20, %v645_v38  ;;  %v963_v7 = vsub.f32 %v803_v62, %v4142_v42  ;;  %v1121_v37 = vmul.f32 %v961_v21, %v961_v21  ;;  %v1280_v27 = vadd.f32 %v1279_v1, %v1120_v28 }
 0x1f0   :  { %v652_v8 = vmax.f32 %v4206_v29, %v1910_v32  ;;  %v653_v43 = vmax.f32 %v4206_v29, %v1918_v5  ;;  %v806_v52 = vmin.f32 %v4212_v20, %v646_v24  ;;  %v224_v40 = vsub.f32 %v6479_v19, %v4132_v57 }
 0x1f1   :  { %v964_v36 = vsub.f32 %v804_v4, %v4145_v31  ;;  %v1122_v22 = vmul.f32 %v962_v45, %v962_v45  ;;  %v1281_v47 = vadd.f32 %v1280_v27, %v1121_v37  ;;  %v4412_v46 = vmul.f32 %v4218_v51, %v3178_v2 }
 0x1f2   :  { %v807_v42 = vmin.f32 %v4212_v20, %v647_v26  ;;  %v808_v59 = vmin.f32 %v4212_v20, %v648_v63  ;;  %v809_v44 = vmin.f32 %v4212_v20, %v649_v9  ;;  %v810_v29 = vmin.f32 %v4212_v20, %v650_v11 }
 0x1f3   :  { %v811_v3 = vmin.f32 %v4212_v20, %v651_v18  ;;  %v965_v57 = vsub.f32 %v805_v6, %v4149_v54  ;;  %v1123_v10 = vmul.f32 %v963_v7, %v963_v7  ;;  %v1282_v31 = vadd.f32 %v1281_v47, %v1122_v22  ;;  %v6525_v22 = vld [vmem:[#allocation11_spill] sm:$0xff] }
 0x1f4   :  { %v812_v48 = vmin.f32 %v4212_v20, %v652_v8  ;;  %v813_v61 = vmin.f32 %v4212_v20, %v653_v43  ;;  %v966_v55 = vsub.f32 %v806_v52, %v4152_v0  ;;  %v1124_v58 = vmul.f32 %v964_v36, %v964_v36  ;;  %v6523_v8 = vld [vmem:[#allocation9_spill] sm:$0xff] }
 0x1f5   :  { %v1283_v35 = vadd.f32 %v1282_v31, %v1123_v10  ;;  %v1633_v39 = vcvt.f32.s32 %v4412_v46  ;;  %v967_v30 = vsub.f32 %v807_v42, %v4155_v34  ;;  %v968_v56 = vsub.f32 %v808_v59, %v4162_v41 }
 0x1f6   :  { %v969_v49 = vsub.f32 %v809_v44, %v4165_v53  ;;  %v4427_v50 = vmul.f32 0.003921569, %v224_v40  ;;  %v970_v54 = vsub.f32 %v810_v29, %v4168_v25  ;;  %v971_v38 = vsub.f32 %v811_v3, %v4171_v33  ;;  %v6524_v40 = vld [vmem:[#allocation10_spill] sm:$0xff]  ;;  %v6528_v44 = vld [vmem:[#allocation12_spill] sm:$0xff]  ;;  %v6529_v3 = vld [vmem:[#allocation13_spill] sm:$0xff] }
 0x1f7   :  { %v1125_v62 = vmul.f32 %v965_v57, %v965_v57  ;;  %v1284_v20 = vadd.f32 %v1283_v35, %v1124_v58  ;;  %v972_v0 = vsub.f32 %v812_v48, %v4175_v60  ;;  %v973_v21 = vsub.f32 %v813_v61, %v4183_v23  ;;  %v6530_v61 = vld [vmem:[#allocation14_spill] sm:$0xff]  ;;  %v6531_v35 = vld [vmem:[#allocation15_spill] sm:$0xff] }
 0x1f8   :  { %6522 = vst [vmem:[#allocation30_spill] sm:$0xff] %v4427_v50  ;;  %v4435_v32 = vmul.f32 %v4218_v51, %v3060_v12  ;;  %v1126_v34 = vmul.f32 %v966_v55, %v966_v55  ;;  %v1634_v24 = vcvt.s32.f32 %v1633_v39  ;;  %v4439_v53 = vmul.f32 %v4218_v51, %v3062_v13 }
 0x1f9   :  { %v1285_v41 = vadd.f32 %v1284_v20, %v1125_v62  ;;  %v1127_v25 = vmul.f32 %v967_v30, %v967_v30  ;;  %v1128_v26 = vmul.f32 %v968_v56, %v968_v56  ;;  %v1129_v33 = vmul.f32 %v969_v49, %v969_v49  ;;  %v6532_v30 = vld [vmem:[#allocation16_spill] sm:$0xff]  ;;  %v6533_v62 = vld [vmem:[#allocation17_spill] sm:$0xff] }
 0x1fa   :  { %2977 = vrcp.f32 %v4427_v50  ;;  %v1130_v63 = vmul.f32 %v970_v54, %v970_v54  ;;  %v1131_v60 = vmul.f32 %v971_v38, %v971_v38  ;;  %v4444_v23 = vmul.f32 %v4218_v51, %v3064_v14 }
 0x1fb   :  { %v1286_v4 = vadd.f32 %v1285_v41, %v1126_v34  ;;  %v1132_v45 = vmul.f32 %v972_v0, %v972_v0  ;;  %v1133_v28 = vmul.f32 %v973_v21, %v973_v21  ;;  %v1631_v1 = vand.u32 2147483647, %v4412_v46  ;;  %v6534_v34 = vld [vmem:[#allocation18_spill] sm:$0xff] }
 0x1fc   :  { %v2433_v5 = vcvt.f32.s32 %v4435_v32  ;;  %v1635_v11 = vand.u32 2147483647, %v1634_v24  ;;  %v4450_v18 = vmul.f32 %v4218_v51, %v3066_v15  ;;  %v2441_v6 = vcvt.f32.s32 %v4439_v53 }
 0x1fd   :  { %v1287_v9 = vadd.f32 %v1286_v4, %v1127_v25  ;;  %v1636_v7 = vand.u32 2147483648, %v4412_v46  ;;  %v4456_v37 = vmul.f32 %v4218_v51, %v3068_v16  ;;  %v4460_v27 = vmul.f32 %v4218_v51, %v3070_v17 }
 0x1fe   :  { %v4464_v43 = vmul.f32 %v4218_v51, %v6523_v8  ;;  %v4468_v36 = vmul.f32 %v4218_v51, %v6524_v40  ;;  %v4472_v47 = vmul.f32 %v4218_v51, %v6525_v22  ;;  %v2449_v42 = vcvt.f32.s32 %v4444_v23 }
 0x1ff   :  { %v1288_v52 = vadd.f32 %v1287_v9, %v1128_v26  ;;  %vm4475_vm5 = vcmp.lt.f32.partialorder %v1631_v1, 8388608.0  ;;  %v4481_v29 = vmul.f32 %v4218_v51, %v6528_v44  ;;  %v4485_v57 = vmul.f32 %v4218_v51, %v6529_v3 }
 0x200   :  { %v2434_v10 = vcvt.s32.f32 %v2433_v5  ;;  %v1637_v48 = vor.u32 %v1636_v7, %v1635_v11  ;;  %v4489_v55 = vmul.f32 %v4218_v51, %v6530_v61  ;;  %v2442_v58 = vcvt.s32.f32 %v2441_v6 }
 0x201   :  { %v1289_v31 = vadd.f32 %v1288_v52, %v1129_v33  ;;  %v4493_v39 = vmul.f32 %v4218_v51, %v6531_v35  ;;  %v4497_v56 = vmul.f32 %v4218_v51, %v6532_v30  ;;  %v2431_v49 = vand.u32 2147483647, %v4435_v32 }
 0x202   :  { %v2457_v54 = vcvt.f32.s32 %v4450_v18  ;;  %v4503_v20 = vmul.f32 %v4218_v51, %v6533_v62  ;;  %v2450_v0 = vcvt.s32.f32 %v2449_v42  ;;  %v2465_v21 = vcvt.f32.s32 %v4456_v37 }
 0x203   :  { %v1290_v38 = vadd.f32 %v1289_v31, %v1130_v63  ;;  %v4508_v41 = vmul.f32 %v4218_v51, %v6534_v34  ;;  %v2435_v24 = vand.u32 2147483647, %v2434_v10  ;;  %v2436_v25 = vand.u32 2147483648, %v4435_v32 }
 0x204   :  { %v2439_v26 = vand.u32 2147483647, %v4439_v53  ;;  %v1638_v63 = vsel %vm4475_vm5, %v1637_v48, %v4412_v46  ;;  %v2443_v4 = vand.u32 2147483647, %v2442_v58  ;;  %v2444_v1 = vand.u32 2147483648, %v4439_v53 }
 0x205   :  { %v1291_v33 = vadd.f32 %v1290_v38, %v1131_v60  ;;  %vm4516_vm6 = vcmp.lt.f32.partialorder %v2431_v49, 8388608.0  ;;  %v2447_v51 = vand.u32 2147483647, %v4444_v23  ;;  %v2458_v9 = vcvt.s32.f32 %v2457_v54 }
 0x206   :  { %v2473_v11 = vcvt.f32.s32 %v4460_v27  ;;  %v2451_v60 = vand.u32 2147483647, %v2450_v0  ;;  %v2466_v52 = vcvt.s32.f32 %v2465_v21  ;;  %v2481_v42 = vcvt.f32.s32 %v4464_v43 }
 0x207   :  { %v4522_v6 = vpop.eup %2977  ;;  %v1292_v7 = vadd.f32 %v1291_v33, %v1132_v45  ;;  %v4525_v46 = vsub.f32 0.0, %v1638_v63  ;;  %v4527_v59 = vor.u32 %v2436_v25, %v2435_v24  ;;  %vm4529_vm7 = vcmp.lt.f32.partialorder %v2439_v26, 8388608.0 }
 0x208   :  { %v2455_v31 = vand.u32 2147483647, %v4450_v18  ;;  %v4534_v58 = vor.u32 %v2444_v1, %v2443_v4  ;;  %v2452_v49 = vand.u32 2147483648, %v4444_v23  ;;  %v2489_v45 = vcvt.f32.s32 %v4468_v36 }
 0x209   :  { %v1293_v48 = vadd.f32 %v1292_v7, %v1133_v28  ;;  %v4538_v54 = vsub.f32 255.0, %v1638_v63  ;;  %v2459_v38 = vand.u32 2147483647, %v2458_v9  ;;  %v2463_v0 = vand.u32 2147483647, %v4456_v37 }
 0x20a   :  { %v2474_v21 = vcvt.s32.f32 %v2473_v11  ;;  %vm4541_vm8 = vcmp.lt.f32.partialorder %v2447_v51, 8388608.0  ;;  %v4545_v25 = vor.u32 %v2452_v49, %v2451_v60  ;;  %v2467_v28 = vand.u32 2147483647, %v2466_v52 }
 0x20b   :  { %1294 = vadd.xlane.f32.xlu1 %v1293_v48  ;;  %v2482_v26 = vcvt.s32.f32 %v2481_v42  ;;  %v2438_v33 = vsel %vm4516_vm6, %v4527_v59, %v4435_v32  ;;  %vm4551_vm9 = vcmp.lt.f32.partialorder %v2455_v31, 8388608.0  ;;  %v2460_v4 = vand.u32 2147483648, %v4450_v18 }
 0x20c   :  { %v2471_v1 = vand.u32 2147483647, %v4460_v27  ;;  %v2446_v51 = vsel %vm4529_vm7, %v4534_v58, %v4439_v53  ;;  %v2468_v9 = vand.u32 2147483648, %v4456_v37  ;;  %v2490_v11 = vcvt.s32.f32 %v2489_v45 }
 0x20d   :  { %v2497_v7 = vcvt.f32.s32 %v4472_v47  ;;  %v4563_v5 = vor.u32 %v2460_v4, %v2459_v38  ;;  %vm4565_vm10 = vcmp.lt.f32.partialorder %v2463_v0, 8388608.0  ;;  %v2475_v52 = vand.u32 2147483647, %v2474_v21 }
 0x20e   :  { %v2505_v42 = vcvt.f32.s32 %v4481_v29  ;;  %v2454_v59 = vsel %vm4541_vm8, %v4545_v25, %v4444_v23  ;;  %v4574_v10 = vor.u32 %v2468_v9, %v2467_v28  ;;  %v2479_v31 = vand.u32 2147483647, %v4464_v43 }
 0x20f   :  { %v2483_v48 = vand.u32 2147483647, %v2482_v26  ;;  %vm4577_vm11 = vcmp.lt.f32.partialorder %v2471_v1, 8388608.0  ;;  %v2476_v49 = vand.u32 2147483648, %v4460_v27  ;;  %v2487_v45 = vand.u32 2147483647, %v4468_v36 }
 0x210   :  { %v2495_v38 = vand.u32 2147483647, %v4472_v47  ;;  %v2484_v0 = vand.u32 2147483648, %v4464_v43  ;;  %v2491_v21 = vand.u32 2147483647, %v2490_v11  ;;  %v2498_v24 = vcvt.s32.f32 %v2497_v7 }
 0x211   :  { %v2513_v25 = vcvt.f32.s32 %v4485_v57  ;;  %v2462_v28 = vsel %vm4551_vm9, %v4563_v5, %v4450_v18  ;;  %v4590_v26 = vor.u32 %v2476_v49, %v2475_v52  ;;  %v2503_v4 = vand.u32 2147483647, %v4481_v29 }
 0x212   :  { %v2506_v1 = vcvt.s32.f32 %v2505_v42  ;;  %v2470_v9 = vsel %vm4565_vm10, %v4574_v10, %v4456_v37  ;;  %vm4597_vm12 = vcmp.lt.f32.partialorder %v2479_v31, 8388608.0  ;;  %v4601_v7 = vor.u32 %v2484_v0, %v2483_v48 }
 0x213   :  { %v2492_v50 = vand.u32 2147483648, %v4468_v36  ;;  %vm4604_vm13 = vcmp.lt.f32.partialorder %v2487_v45, 8388608.0  ;;  %vm4608_vm14 = vcmp.lt.f32.partialorder %v2495_v38, 8388608.0  ;;  %v2500_v52 = vand.u32 2147483648, %v4472_v47 }
 0x214   :  { %v2521_v60 = vcvt.f32.s32 %v4489_v55  ;;  %v2499_v10 = vand.u32 2147483647, %v2498_v24  ;;  %v2511_v31 = vand.u32 2147483647, %v4485_v57  ;;  %v2514_v48 = vcvt.s32.f32 %v2513_v25 }
 0x215   :  { %v4614_v42 = vor.u32 %v2492_v50, %v2491_v21  ;;  %v2478_v49 = vsel %vm4577_vm11, %v4590_v26, %v4460_v27  ;;  %vm4621_vm15 = vcmp.lt.f32.partialorder %v2503_v4, 8388608.0  ;;  %v2507_v38 = vand.u32 2147483647, %v2506_v1 }
 0x216   :  { %v2529_v0 = vcvt.f32.s32 %v4493_v39  ;;  %v2486_v50 = vsel %vm4597_vm12, %v4601_v7, %v4464_v43  ;;  %v2508_v21 = vand.u32 2147483648, %v4481_v29  ;;  %v2516_v24 = vand.u32 2147483648, %v4485_v57 }
 0x217   :  { %v718_v25 = vmax.f32 %v4525_v46, %v2438_v33  ;;  %v2519_v58 = vand.u32 2147483647, %v4489_v55  ;;  %v2522_v26 = vcvt.s32.f32 %v2521_v60  ;;  %v2537_v4 = vcvt.f32.s32 %v4497_v56 }
 0x218   :  { %v719_v1 = vmax.f32 %v4525_v46, %v2446_v51  ;;  %v2494_v19 = vsel %vm4604_vm13, %v4614_v42, %v4468_v36  ;;  %v2501_v11 = vor.u32 %v2500_v52, %v2499_v10  ;;  %vm4640_vm0 = vcmp.lt.f32.partialorder %v2511_v31, 8388608.0 }
 0x219   :  { %v2515_v34 = vand.u32 2147483647, %v2514_v48  ;;  %v2509_v62 = vor.u32 %v2508_v21, %v2507_v38  ;;  %v2530_v33 = vcvt.s32.f32 %v2529_v0  ;;  %v2545_v30 = vcvt.f32.s32 %v4503_v20 }
 0x21a   :  { %v2553_v60 = vcvt.f32.s32 %v4508_v41  ;;  %v2524_v35 = vand.u32 2147483648, %v4489_v55  ;;  %v2527_v51 = vand.u32 2147483647, %v4493_v39  ;;  %v720_v61 = vmax.f32 %v4525_v46, %v2454_v59 }
 0x21b   :  { %v878_v63 = vmin.f32 %v4538_v54, %v718_v25  ;;  %vm4650_vm1 = vcmp.lt.f32.partialorder %v2519_v58, 8388608.0  ;;  %v2523_v42 = vand.u32 2147483647, %v2522_v26  ;;  %v2535_v10 = vand.u32 2147483647, %v4497_v56 }
 0x21c   :  { %v2538_v31 = vcvt.s32.f32 %v2537_v4  ;;  %v879_v48 = vmin.f32 %v4538_v54, %v719_v1  ;;  %v2502_v38 = vsel %vm4608_vm14, %v2501_v11, %v4472_v47  ;;  %v2517_v0 = vor.u32 %v2516_v24, %v2515_v34 }
 0x21d   :  { %v2532_v21 = vand.u32 2147483648, %v4493_v39  ;;  %v721_v59 = vmax.f32 %v4525_v46, %v2462_v28  ;;  %v2510_v25 = vsel %vm4621_vm15, %v2509_v62, %v4481_v29  ;;  %v2531_v58 = vand.u32 2147483647, %v2530_v33 }
 0x21e   :  { %v2546_v26 = vcvt.s32.f32 %v2545_v30  ;;  %v2554_v3 = vcvt.s32.f32 %v2553_v60  ;;  %vm4664_vm2 = vcmp.lt.f32.partialorder %v2527_v51, 8388608.0  ;;  %v2540_v1 = vand.u32 2147483648, %v4497_v56 }
 0x21f   :  { %v722_v5 = vmax.f32 %v4525_v46, %v2470_v9  ;;  %v880_v34 = vmin.f32 %v4538_v54, %v720_v61  ;;  %v1038_v24 = vsub.f32 %v878_v63, %v4435_v32  ;;  %v2525_v28 = vor.u32 %v2524_v35, %v2523_v42 }
 0x220   :  { %vm4672_vm3 = vcmp.lt.f32.partialorder %v2535_v10, 8388608.0  ;;  %v2539_v62 = vand.u32 2147483647, %v2538_v31  ;;  %v1039_v30 = vsub.f32 %v879_v48, %v4439_v53  ;;  %v2518_v45 = vsel %vm4640_vm0, %v2517_v0, %v4485_v57 }
 0x221   :  { %v2543_v33 = vand.u32 2147483647, %v4503_v20  ;;  %v723_v9 = vmax.f32 %v4525_v46, %v2478_v49  ;;  %v881_v61 = vmin.f32 %v4538_v54, %v721_v59  ;;  %v2533_v60 = vor.u32 %v2532_v21, %v2531_v58 }
 0x222   :  { %v2547_v32 = vand.u32 2147483647, %v2546_v26  ;;  %v2548_v35 = vand.u32 2147483648, %v4503_v20  ;;  %v2555_v51 = vand.u32 2147483647, %v2554_v3  ;;  %v724_v63 = vmax.f32 %v4525_v46, %v2486_v50 }
 0x223   :  { %v882_v42 = vmin.f32 %v4538_v54, %v722_v5  ;;  %v1040_v53 = vsub.f32 %v880_v34, %v4444_v23  ;;  %v1198_v10 = vmul.f32 %v1038_v24, %v1038_v24  ;;  %v2541_v7 = vor.u32 %v2540_v1, %v2539_v62 }
 0x224   :  { %v2551_v31 = vand.u32 2147483647, %v4508_v41  ;;  %v2556_v48 = vand.u32 2147483648, %v4508_v41  ;;  %v1199_v49 = vmul.f32 %v1039_v30, %v1039_v30  ;;  %v2526_v0 = vsel %vm4650_vm1, %v2525_v28, %v4489_v55 }
 0x225   :  { %v725_v21 = vmax.f32 %v4525_v46, %v2494_v19  ;;  %v883_v3 = vmin.f32 %v4538_v54, %v723_v9  ;;  %v1041_v50 = vsub.f32 %v881_v61, %v4450_v18  ;;  %vm4695_vm4 = vcmp.lt.f32.partialorder %v2543_v33, 8388608.0 }
 0x226   :  { %v2549_v23 = vor.u32 %v2548_v35, %v2547_v32  ;;  %v2557_v58 = vor.u32 %v2556_v48, %v2555_v51  ;;  %v726_v26 = vmax.f32 %v4525_v46, %v2502_v38  ;;  %v884_v1 = vmin.f32 %v4538_v54, %v724_v63 }
 0x227   :  { %v1042_v5 = vsub.f32 %v882_v42, %v4456_v37  ;;  %v1200_v52 = vmul.f32 %v1040_v53, %v1040_v53  ;;  %v1364_v34 = vadd.f32 %v1199_v49, %v1198_v10  ;;  %v2534_v19 = vsel %vm4664_vm2, %v2533_v60, %v4493_v39 }
 0x228   :  { %v2542_v18 = vsel %vm4672_vm3, %v2541_v7, %v4497_v56  ;;  %vm4708_vm5 = vcmp.lt.f32.partialorder %v2551_v31, 8388608.0  ;;  %v727_v38 = vmax.f32 %v4525_v46, %v2510_v25  ;;  %v885_v28 = vmin.f32 %v4538_v54, %v725_v21 }
 0x229   :  { %v1043_v37 = vsub.f32 %v883_v3, %v4460_v27  ;;  %v1201_v62 = vmul.f32 %v1041_v50, %v1041_v50  ;;  %v1365_v30 = vadd.f32 %v1364_v34, %v1200_v52  ;;  %v2550_v4 = vsel %vm4695_vm4, %v2549_v23, %v4503_v20 }
 0x22a   :  { %v2558_v11 = vsel %vm4708_vm5, %v2557_v58, %v4508_v41  ;;  %v728_v33 = vmax.f32 %v4525_v46, %v2518_v45  ;;  %v729_v9 = vmax.f32 %v4525_v46, %v2526_v0  ;;  %v886_v25 = vmin.f32 %v4538_v54, %v726_v26 }
 0x22b   :  { %v1044_v61 = vsub.f32 %v884_v1, %v4464_v43  ;;  %v1202_v60 = vmul.f32 %v1042_v5, %v1042_v5  ;;  %v1366_v27 = vadd.f32 %v1365_v30, %v1201_v62  ;;  %v730_v32 = vmax.f32 %v4525_v46, %v2534_v19 }
 0x22c   :  { %v731_v35 = vmax.f32 %v4525_v46, %v2542_v18  ;;  %v732_v51 = vmax.f32 %v4525_v46, %v2550_v4  ;;  %v733_v63 = vmax.f32 %v4525_v46, %v2558_v11  ;;  %v887_v42 = vmin.f32 %v4538_v54, %v727_v38 }
 0x22d   :  { %v1045_v45 = vsub.f32 %v885_v28, %v4468_v36  ;;  %v1203_v53 = vmul.f32 %v1043_v37, %v1043_v37  ;;  %v1367_v10 = vadd.f32 %v1366_v27, %v1202_v60  ;;  %v888_v7 = vmin.f32 %v4538_v54, %v728_v33 }
 0x22e   :  { %v4734_v43 = vmul.f32 %v4522_v6, %v3178_v2  ;;  %v889_v31 = vmin.f32 %v4538_v54, %v729_v9  ;;  %v1046_v48 = vsub.f32 %v886_v25, %v4472_v47  ;;  %v1204_v49 = vmul.f32 %v1044_v61, %v1044_v61 }
 0x22f   :  { %v1368_v0 = vadd.f32 %v1367_v10, %v1203_v53  ;;  %v890_v46 = vmin.f32 %v4538_v54, %v730_v32  ;;  %v891_v21 = vmin.f32 %v4538_v54, %v731_v35  ;;  %v892_v36 = vmin.f32 %v4538_v54, %v732_v51 }
 0x230   :  { %v893_v3 = vmin.f32 %v4538_v54, %v733_v63  ;;  %v1047_v50 = vsub.f32 %v887_v42, %v4481_v29  ;;  %v1205_v59 = vmul.f32 %v1045_v45, %v1045_v45  ;;  %v1625_v58 = vcvt.f32.s32 %v4734_v43 }
 0x231   :  { %v1369_v23 = vadd.f32 %v1368_v0, %v1204_v49  ;;  %v1048_v26 = vsub.f32 %v888_v7, %v4485_v57  ;;  %v1049_v47 = vsub.f32 %v889_v31, %v4489_v55  ;;  %v1206_v1 = vmul.f32 %v1046_v48, %v1046_v48  ;;  %v6569_v31 = vld [vmem:[#allocation13_spill] sm:$0xff]  ;;  %v6570_v0 = vld [vmem:[#allocation14_spill] sm:$0xff] }
 0x232   :  { %v1050_v52 = vsub.f32 %v890_v46, %v4493_v39  ;;  %v1051_v34 = vsub.f32 %v891_v21, %v4497_v56  ;;  %v4750_v19 = vmul.f32 %v4522_v6, %v3060_v12  ;;  %v1052_v29 = vsub.f32 %v892_v36, %v4503_v20 }
 0x233   :  { %v1370_v5 = vadd.f32 %v1369_v23, %v1205_v59  ;;  %v1053_v54 = vsub.f32 %v893_v3, %v4508_v41  ;;  %v1207_v18 = vmul.f32 %v1047_v50, %v1047_v50  ;;  %v1626_v38 = vcvt.s32.f32 %v1625_v58  ;;  %v6571_v50 = vld [vmem:[#allocation15_spill] sm:$0xff]  ;;  %v6572_v23 = vld [vmem:[#allocation16_spill] sm:$0xff] }
 0x234   :  { %v1208_v57 = vmul.f32 %v1048_v26, %v1048_v26  ;;  %v1209_v28 = vmul.f32 %v1049_v47, %v1049_v47  ;;  %v4756_v37 = vmul.f32 %v4522_v6, %v3062_v13  ;;  %v1210_v39 = vmul.f32 %v1050_v52, %v1050_v52 }
 0x235   :  { %v1371_v24 = vadd.f32 %v1370_v5, %v1206_v1  ;;  %v1211_v56 = vmul.f32 %v1051_v34, %v1051_v34  ;;  %v4760_v62 = vmul.f32 %v4522_v6, %v3064_v14  ;;  %v2305_v20 = vcvt.f32.s32 %v4750_v19 }
 0x236   :  { %v1212_v30 = vmul.f32 %v1052_v29, %v1052_v29  ;;  %v1213_v41 = vmul.f32 %v1053_v54, %v1053_v54  ;;  %v1623_v11 = vand.u32 2147483647, %v4734_v43  ;;  %v1627_v33 = vand.u32 2147483647, %v1626_v38  ;;  %v6573_v29 = vld [vmem:[#allocation17_spill] sm:$0xff] }
 0x237   :  { %v1372_v55 = vadd.f32 %v1371_v24, %v1207_v18  ;;  %v4766_v9 = vmul.f32 %v4522_v6, %v3066_v15  ;;  %v4770_v25 = vmul.f32 %v4522_v6, %v3068_v16  ;;  %v4774_v61 = vmul.f32 %v4522_v6, %v3070_v17  ;;  %v6574_v18 = vld [vmem:[#allocation18_spill] sm:$0xff] }
 0x238   :  { %v1628_v27 = vand.u32 2147483648, %v4734_v43  ;;  %v4779_v32 = vmul.f32 %v4522_v6, %v6523_v8  ;;  %v2313_v35 = vcvt.f32.s32 %v4756_v37  ;;  %v4784_v51 = vmul.f32 %v4522_v6, %v6524_v40 }
 0x239   :  { %v1373_v4 = vadd.f32 %v1372_v55, %v1208_v57  ;;  %v4788_v63 = vmul.f32 %v4522_v6, %v6525_v22  ;;  %v2306_v42 = vcvt.s32.f32 %v2305_v20  ;;  %v2321_v45 = vcvt.f32.s32 %v4760_v62 }
 0x23a   :  { %vm4791_vm6 = vcmp.lt.f32.partialorder %v1623_v11, 8388608.0  ;;  %v4797_v7 = vmul.f32 %v4522_v6, %v6528_v44  ;;  %v4801_v48 = vmul.f32 %v4522_v6, %v6569_v31  ;;  %v1629_v49 = vor.u32 %v1628_v27, %v1627_v33 }
 0x23b   :  { %v1374_v60 = vadd.f32 %v1373_v4, %v1209_v28  ;;  %v4805_v46 = vmul.f32 %v4522_v6, %v6570_v0  ;;  %v2303_v21 = vand.u32 2147483647, %v4750_v19  ;;  %v2329_v36 = vcvt.f32.s32 %v4766_v9 }
 0x23c   :  { %v4811_v59 = vmul.f32 %v4522_v6, %v6571_v50  ;;  %v4815_v58 = vmul.f32 %v4522_v6, %v6572_v23  ;;  %v2314_v26 = vcvt.s32.f32 %v2313_v35  ;;  %v2307_v47 = vand.u32 2147483647, %v2306_v42 }
 0x23d   :  { %v1375_v53 = vadd.f32 %v1374_v60, %v1210_v39  ;;  %v2311_v1 = vand.u32 2147483647, %v4756_v37  ;;  %v2322_v5 = vcvt.s32.f32 %v2321_v45  ;;  %v2337_v52 = vcvt.f32.s32 %v4770_v25 }
 0x23e   :  { %v4821_v54 = vmul.f32 %v4522_v6, %v6573_v29  ;;  %v4825_v24 = vmul.f32 %v4522_v6, %v6574_v18  ;;  %v2308_v38 = vand.u32 2147483648, %v4750_v19  ;;  %v1630_v57 = vsel %vm4791_vm6, %v1629_v49, %v4734_v43 }
 0x23f   :  { %v1376_v3 = vadd.f32 %v1375_v53, %v1211_v56  ;;  %vm4831_vm7 = vcmp.lt.f32.partialorder %v2303_v21, 8388608.0  ;;  %v2330_v55 = vcvt.s32.f32 %v2329_v36  ;;  %v2345_v39 = vcvt.f32.s32 %v4774_v61 }
 0x240   :  { %v2315_v20 = vand.u32 2147483647, %v2314_v26  ;;  %v2319_v6 = vand.u32 2147483647, %v4760_v62  ;;  %v2309_v4 = vor.u32 %v2308_v38, %v2307_v47  ;;  %vm4838_vm8 = vcmp.lt.f32.partialorder %v2311_v1, 8388608.0 }
 0x241   :  { %v1377_v34 = vadd.f32 %v1376_v3, %v1212_v30  ;;  %v2316_v30 = vand.u32 2147483648, %v4756_v37  ;;  %v2323_v33 = vand.u32 2147483647, %v2322_v5  ;;  %v2338_v43 = vcvt.s32.f32 %v2337_v52 }
 0x242   :  { %v4842_v60 = vsub.f32 0.0, %v1630_v57  ;;  %v2324_v27 = vand.u32 2147483648, %v4760_v62  ;;  %v2327_v35 = vand.u32 2147483647, %v4766_v9  ;;  %v4847_v42 = vsub.f32 255.0, %v1630_v57 }
 0x243   :  { %v1378_v56 = vadd.f32 %v1377_v34, %v1213_v41  ;;  %v2353_v41 = vcvt.f32.s32 %v4779_v32  ;;  %v2331_v45 = vand.u32 2147483647, %v2330_v55  ;;  %v2346_v53 = vcvt.s32.f32 %v2345_v39 }
 0x244   :  { %v2361_v10 = vcvt.f32.s32 %v4784_v51  ;;  %v2317_v49 = vor.u32 %v2316_v30, %v2315_v20  ;;  %vm4850_vm9 = vcmp.lt.f32.partialorder %v2319_v6, 8388608.0  ;;  %v2332_v36 = vand.u32 2147483648, %v4766_v9 }
 0x245   :  { %1379 = vadd.xlane.f32.xlu0 %v1378_v56  ;;  %v2335_v3 = vand.u32 2147483647, %v4770_v25  ;;  %v2310_v26 = vsel %vm4831_vm7, %v2309_v4, %v4750_v19  ;;  %v2325_v47 = vor.u32 %v2324_v27, %v2323_v33  ;;  %v2339_v1 = vand.u32 2147483647, %v2338_v43 }
 0x246   :  { %v2369_v5 = vcvt.f32.s32 %v4788_v63  ;;  %vm4860_vm10 = vcmp.lt.f32.partialorder %v2327_v35, 8388608.0  ;;  %v2343_v34 = vand.u32 2147483647, %v4774_v61  ;;  %v2351_v38 = vand.u32 2147483647, %v4779_v32 }
 0x247   :  { %v2354_v57 = vcvt.s32.f32 %v2353_v41  ;;  %v2333_v55 = vor.u32 %v2332_v36, %v2331_v45  ;;  %v2340_v39 = vand.u32 2147483648, %v4770_v25  ;;  %v2347_v56 = vand.u32 2147483647, %v2346_v53 }
 0x248   :  { %v2362_v20 = vcvt.s32.f32 %v2361_v10  ;;  %v2318_v28 = vsel %vm4838_vm8, %v2317_v49, %v4756_v37  ;;  %vm4870_vm11 = vcmp.lt.f32.partialorder %v2335_v3, 8388608.0  ;;  %v2359_v6 = vand.u32 2147483647, %v4784_v51 }
 0x249   :  { %v2377_v4 = vcvt.f32.s32 %v4797_v7  ;;  %v2326_v33 = vsel %vm4850_vm9, %v2325_v47, %v4760_v62  ;;  %v2341_v43 = vor.u32 %v2340_v39, %v2339_v1  ;;  %v2348_v27 = vand.u32 2147483648, %v4774_v61 }
 0x24a   :  { %v2370_v35 = vcvt.s32.f32 %v2369_v5  ;;  %vm4880_vm12 = vcmp.lt.f32.partialorder %v2343_v34, 8388608.0  ;;  %vm4884_vm13 = vcmp.lt.f32.partialorder %v2351_v38, 8388608.0  ;;  %v2355_v45 = vand.u32 2147483647, %v2354_v57 }
 0x24b   :  { %v2385_v53 = vcvt.f32.s32 %v4801_v48  ;;  %v2334_v10 = vsel %vm4860_vm10, %v2333_v55, %v4766_v9  ;;  %v2349_v49 = vor.u32 %v2348_v27, %v2347_v56  ;;  %v2356_v21 = vand.u32 2147483648, %v4779_v32 }
 0x24c   :  { %v2363_v36 = vand.u32 2147483647, %v2362_v20  ;;  %vm4893_vm14 = vcmp.lt.f32.partialorder %v2359_v6, 8388608.0  ;;  %v2367_v47 = vand.u32 2147483647, %v4788_v63  ;;  %v2378_v5 = vcvt.s32.f32 %v2377_v4 }
 0x24d   :  { %v2375_v1 = vand.u32 2147483647, %v4797_v7  ;;  %v2342_v34 = vsel %vm4870_vm11, %v2341_v43, %v4770_v25  ;;  %v2364_v52 = vand.u32 2147483648, %v4784_v51  ;;  %v2371_v38 = vand.u32 2147483647, %v2370_v35 }
 0x24e   :  { %v2393_v57 = vcvt.f32.s32 %v4805_v46  ;;  %v2357_v55 = vor.u32 %v2356_v21, %v2355_v45  ;;  %v2372_v39 = vand.u32 2147483648, %v4788_v63  ;;  %v2383_v56 = vand.u32 2147483647, %v4801_v48 }
 0x24f   :  { %v2386_v20 = vcvt.s32.f32 %v2385_v53  ;;  %v2350_v6 = vsel %vm4880_vm12, %v2349_v49, %v4774_v61  ;;  %v2365_v4 = vor.u32 %v2364_v52, %v2363_v36  ;;  %v702_v27 = vmax.f32 %v4842_v60, %v2310_v26 }
 0x250   :  { %v703_v30 = vmax.f32 %v4842_v60, %v2318_v28  ;;  %vm4911_vm15 = vcmp.lt.f32.partialorder %v2367_v47, 8388608.0  ;;  %vm4915_vm0 = vcmp.lt.f32.partialorder %v2375_v1, 8388608.0  ;;  %v2379_v45 = vand.u32 2147483647, %v2378_v5 }
 0x251   :  { %v2391_v53 = vand.u32 2147483647, %v4805_v46  ;;  %v2373_v21 = vor.u32 %v2372_v39, %v2371_v38  ;;  %v2380_v41 = vand.u32 2147483648, %v4797_v7  ;;  %v2394_v49 = vcvt.s32.f32 %v2393_v57 }
 0x252   :  { %v2401_v36 = vcvt.f32.s32 %v4811_v59  ;;  %v2358_v26 = vsel %vm4884_vm13, %v2357_v55, %v4779_v32  ;;  %vm4925_vm1 = vcmp.lt.f32.partialorder %v2383_v56, 8388608.0  ;;  %v2387_v47 = vand.u32 2147483647, %v2386_v20 }
 0x253   :  { %v2388_v1 = vand.u32 2147483648, %v4801_v48  ;;  %v2366_v5 = vsel %vm4893_vm14, %v2365_v4, %v4784_v51  ;;  %v704_v52 = vmax.f32 %v4842_v60, %v2326_v33  ;;  %v862_v38 = vmin.f32 %v4847_v42, %v702_v27 }
 0x254   :  { %v863_v57 = vmin.f32 %v4847_v42, %v703_v30  ;;  %v2381_v39 = vor.u32 %v2380_v41, %v2379_v45  ;;  %vm4936_vm2 = vcmp.lt.f32.partialorder %v2391_v53, 8388608.0  ;;  %v2396_v55 = vand.u32 2147483648, %v4805_v46 }
 0x255   :  { %v2399_v56 = vand.u32 2147483647, %v4811_v59  ;;  %v2374_v3 = vsel %vm4911_vm15, %v2373_v21, %v4788_v63  ;;  %v2395_v20 = vand.u32 2147483647, %v2394_v49  ;;  %v2402_v4 = vcvt.s32.f32 %v2401_v36 }
 0x256   :  { %v705_v33 = vmax.f32 %v4842_v60, %v2334_v10  ;;  %v2389_v27 = vor.u32 %v2388_v1, %v2387_v47  ;;  %v2404_v30 = vand.u32 2147483648, %v4811_v59  ;;  %v2407_v45 = vand.u32 2147483647, %v4815_v58 }
 0x257   :  { %v2409_v53 = vcvt.f32.s32 %v4815_v58  ;;  %v706_v41 = vmax.f32 %v4842_v60, %v2342_v34  ;;  %v864_v18 = vmin.f32 %v4847_v42, %v704_v52  ;;  %v1022_v29 = vsub.f32 %v862_v38, %v4750_v19 }
 0x258   :  { %v1023_v43 = vsub.f32 %v863_v57, %v4756_v37  ;;  %v2382_v21 = vsel %vm4915_vm0, %v2381_v39, %v4797_v7  ;;  %v2412_v10 = vand.u32 2147483648, %v4815_v58  ;;  %v2415_v49 = vand.u32 2147483647, %v4821_v54 }
 0x259   :  { %v2417_v36 = vcvt.f32.s32 %v4821_v54  ;;  %v2397_v47 = vor.u32 %v2396_v55, %v2395_v20  ;;  %v2403_v1 = vand.u32 2147483647, %v2402_v4  ;;  %v707_v34 = vmax.f32 %v4842_v60, %v2350_v6 }
 0x25a   :  { %v865_v52 = vmin.f32 %v4847_v42, %v705_v33  ;;  %v2390_v19 = vsel %vm4925_vm1, %v2389_v27, %v4801_v48  ;;  %v2410_v37 = vcvt.s32.f32 %v2409_v53  ;;  %v2425_v35 = vcvt.f32.s32 %v4825_v24 }
 0x25b   :  { %v708_v38 = vmax.f32 %v4842_v60, %v2358_v26  ;;  %vm4966_vm3 = vcmp.lt.f32.partialorder %v2399_v56, 8388608.0  ;;  %v866_v39 = vmin.f32 %v4847_v42, %v706_v41  ;;  %v1024_v55 = vsub.f32 %v864_v18, %v4760_v62 }
 0x25c   :  { %v1182_v6 = vmul.f32 %v1022_v29, %v1022_v29  ;;  %v1183_v20 = vmul.f32 %v1023_v43, %v1023_v43  ;;  %v2418_v4 = vcvt.s32.f32 %v2417_v36  ;;  %v2420_v33 = vand.u32 2147483648, %v4821_v54 }
 0x25d   :  { %v2423_v28 = vand.u32 2147483647, %v4825_v24  ;;  %v709_v27 = vmax.f32 %v4842_v60, %v2366_v5  ;;  %v2398_v26 = vsel %vm4936_vm2, %v2397_v47, %v4805_v46  ;;  %v2405_v56 = vor.u32 %v2404_v30, %v2403_v1  ;;  %v6605_v47 = vld [vmem:[#allocation8_spill] sm:$0xff] }
 0x25e   :  { %vm4978_vm4 = vcmp.lt.f32.partialorder %v2407_v45, 8388608.0  ;;  %v867_v62 = vmin.f32 %v4847_v42, %v707_v34  ;;  %v1025_v29 = vsub.f32 %v865_v52, %v4766_v9  ;;  %v2411_v18 = vand.u32 2147483647, %v2410_v37 }
 0x25f   :  { %v2426_v41 = vcvt.s32.f32 %v2425_v35  ;;  %v710_v43 = vmax.f32 %v4842_v60, %v2374_v3  ;;  %v868_v36 = vmin.f32 %v4847_v42, %v708_v38  ;;  %vm4986_vm5 = vcmp.lt.f32.partialorder %v2415_v49, 8388608.0 }
 0x260   :  { %v1026_v11 = vsub.f32 %v866_v39, %v4770_v25  ;;  %v1184_v30 = vmul.f32 %v1024_v55, %v1024_v55  ;;  %v1347_v45 = vadd.f32 %v1183_v20, %v1182_v6  ;;  %v4992_v1 = vadd.s32 64, %v6605_v47 }
 0x261   :  { %v2419_v34 = vand.u32 2147483647, %v2418_v4  ;;  %v2428_v9 = vand.u32 2147483648, %v4825_v24  ;;  %v711_v52 = vmax.f32 %v4842_v60, %v2382_v21  ;;  %v869_v3 = vmin.f32 %v4847_v42, %v709_v27 }
 0x262   :  { %6606 = vst [vmem:[#allocation9_spill] sm:$0xff] %v4992_v1  ;;  %v1027_v37 = vsub.f32 %v867_v62, %v4774_v61  ;;  %v1185_v49 = vmul.f32 %v1025_v29, %v1025_v29  ;;  %v1348_v35 = vadd.f32 %v1347_v45, %v1184_v30  ;;  %v6325_v38 = vcvt.s32.f32 %v4992_v1 }
 0x263   :  { %v2413_v23 = vor.u32 %v2412_v10, %v2411_v18  ;;  %v2427_v25 = vand.u32 2147483647, %v2426_v41  ;;  %v712_v39 = vmax.f32 %v4842_v60, %v2390_v19  ;;  %v870_v55 = vmin.f32 %v4847_v42, %v710_v43  ;;  %v6607_v41 = vld [vmem:[#allocation20_spill] sm:$0xff] }
 0x264   :  { %v1028_v6 = vsub.f32 %v868_v36, %v4779_v32  ;;  %v1186_v20 = vmul.f32 %v1026_v11, %v1026_v11  ;;  %v1349_v4 = vadd.f32 %v1348_v35, %v1185_v49  ;;  %v216_v21 = vmul.f32 0.01, %v6325_v38 }
 0x265   :  { %v2406_v61 = vsel %vm4966_vm3, %v2405_v56, %v4811_v59  ;;  %v2421_v27 = vor.u32 %v2420_v33, %v2419_v34  ;;  %v713_v62 = vmax.f32 %v4842_v60, %v2398_v26  ;;  %v871_v10 = vmin.f32 %v4847_v42, %v711_v52 }
 0x266   :  { %v1029_v19 = vsub.f32 %v869_v3, %v4784_v51  ;;  %v1187_v29 = vmul.f32 %v1027_v37, %v1027_v37  ;;  %v1350_v18 = vadd.f32 %v1349_v4, %v1186_v20  ;;  %v227_v32 = vsub.f32 %v6607_v41, %v216_v21 }
 0x267   :  { %v2414_v43 = vsel %vm4978_vm4, %v2413_v23, %v4815_v58  ;;  %v2429_v36 = vor.u32 %v2428_v9, %v2427_v25  ;;  %v714_v11 = vmax.f32 %v4842_v60, %v2406_v61  ;;  %v872_v57 = vmin.f32 %v4847_v42, %v712_v39 }
 0x268   :  { %v1030_v33 = vsub.f32 %v870_v55, %v4788_v63  ;;  %v1188_v26 = vmul.f32 %v1028_v6, %v1028_v6  ;;  %v1351_v56 = vadd.f32 %v1350_v18, %v1187_v29  ;;  %v5017_v30 = vmul.f32 0.003921569, %v227_v32 }
 0x269   :  { %v2422_v51 = vsel %vm4986_vm5, %v2421_v27, %v4821_v54  ;;  %vm2424_vm6 = vcmp.lt.f32.partialorder %v2423_v28, 8388608.0  ;;  %v715_v45 = vmax.f32 %v4842_v60, %v2414_v43  ;;  %v873_v23 = vmin.f32 %v4847_v42, %v713_v62 }
 0x26a   :  { %6608 = vst [vmem:[#allocation31_spill] sm:$0xff] %v5017_v30  ;;  %v1031_v53 = vsub.f32 %v871_v10, %v4797_v7  ;;  %v1189_v34 = vmul.f32 %v1029_v19, %v1029_v19  ;;  %v1352_v9 = vadd.f32 %v1351_v56, %v1188_v26  ;;  %2979 = vrcp.f32 %v5017_v30 }
 0x26b   :  { %v2430_v63 = vsel %vm2424_vm6, %v2429_v36, %v4825_v24  ;;  %v716_v52 = vmax.f32 %v4842_v60, %v2422_v51  ;;  %v874_v3 = vmin.f32 %v4847_v42, %v714_v11  ;;  %v1032_v5 = vsub.f32 %v872_v57, %v4801_v48 }
 0x26c   :  { %v1190_v37 = vmul.f32 %v1030_v33, %v1030_v33  ;;  %v1353_v28 = vadd.f32 %v1352_v9, %v1189_v34  ;;  %v717_v49 = vmax.f32 %v4842_v60, %v2430_v63  ;;  %v875_v35 = vmin.f32 %v4847_v42, %v715_v45 }
 0x26d   :  { %v1033_v7 = vsub.f32 %v873_v23, %v4805_v46  ;;  %v1191_v25 = vmul.f32 %v1031_v53, %v1031_v53  ;;  %v876_v55 = vmin.f32 %v4847_v42, %v716_v52  ;;  %v1034_v6 = vsub.f32 %v874_v3, %v4811_v59 }
 0x26e   :  { %v1354_v39 = vadd.f32 %v1353_v28, %v1190_v37  ;;  %v1192_v20 = vmul.f32 %v1032_v5, %v1032_v5  ;;  %v5036_v21 = vadd.s32 24, %v6605_v47  ;;  %v877_v48 = vmin.f32 %v4847_v42, %v717_v49 }
 0x26f   :  { %v1035_v61 = vsub.f32 %v875_v35, %v4815_v58  ;;  %v1193_v60 = vmul.f32 %v1033_v7, %v1033_v7  ;;  %v1036_v62 = vsub.f32 %v876_v55, %v4821_v54  ;;  %v1194_v46 = vmul.f32 %v1034_v6, %v1034_v6 }
 0x270   :  { %v1355_v4 = vadd.f32 %v1354_v39, %v1191_v25  ;;  %6609 = vst [vmem:[#allocation32_spill] sm:$0xff] %v5036_v21  ;;  %v6327_v19 = vcvt.s32.f32 %v5036_v21  ;;  %v1037_v29 = vsub.f32 %v877_v48, %v4825_v24  ;;  %v5047_v54 = vadd.s32 56, %v6605_v47 }
 0x271   :  { %v1195_v59 = vmul.f32 %v1035_v61, %v1035_v61  ;;  %v1196_v43 = vmul.f32 %v1036_v62, %v1036_v62 }
 0x272   :  { %v1356_v27 = vadd.f32 %v1355_v4, %v1192_v20  ;;  %v211_v58 = vmul.f32 0.01, %v6327_v19  ;;  %v1197_v42 = vmul.f32 %v1037_v29, %v1037_v29  ;;  %6610 = vst [vmem:[#allocation33_spill] sm:$0xff] %v5047_v54  ;;  %v6326_v45 = vcvt.s32.f32 %v5047_v54  ;;  %v6614_v29 = vld [vmem:[#allocation16_spill] sm:$0xff] }
 0x274   :  { %v1357_v10 = vadd.f32 %v1356_v27, %v1193_v60  ;;  %v222_v56 = vsub.f32 %v6607_v41, %v211_v58  ;;  %v5066_v3 = vmul.f32 0.01, %v6326_v45 }
 0x276   :  { %v1358_v18 = vadd.f32 %v1357_v10, %v1194_v46  ;;  %v5057_v53 = vmul.f32 0.003921569, %v222_v56 }
 0x277   :  { %v2980_v32 = vpop.eup %2979 }
 0x278   :  { %v1359_v36 = vadd.f32 %v1358_v18, %v1195_v59  ;;  %v270_v11 = vmul.f32 %v2980_v32, %v3178_v2  ;;  %v5051_v24 = vmul.f32 %v2980_v32, %v3060_v12  ;;  %v5054_v51 = vmul.f32 %v2980_v32, %v3062_v13  ;;  %6611 = vst [vmem:[#allocation34_spill] sm:$0xff] %v5057_v53  ;;  %v6615_v18 = vld [vmem:[#allocation17_spill] sm:$0xff] }
 0x279   :  { %v5060_v34 = vmul.f32 %v2980_v32, %v3064_v14  ;;  %v5069_v37 = vmul.f32 %v2980_v32, %v3066_v15  ;;  %v5072_v28 = vmul.f32 %v2980_v32, %v3068_v16  ;;  %2981 = vrcp.f32 %v5057_v53 }
 0x27a   :  { %v1360_v57 = vadd.f32 %v1359_v36, %v1196_v43  ;;  %v1649_v26 = vcvt.f32.s32 %v270_v11  ;;  %v2689_v9 = vcvt.f32.s32 %v5051_v24  ;;  %v1647_v63 = vand.u32 2147483647, %v270_v11 }
 0x27b   :  { %v2697_v52 = vcvt.f32.s32 %v5054_v51  ;;  %v1652_v49 = vand.u32 2147483648, %v270_v11  ;;  %v5076_v35 = vmul.f32 %v2980_v32, %v3070_v17  ;;  %v5079_v7 = vmul.f32 %v2980_v32, %v6523_v8 }
 0x27c   :  { %v1361_v33 = vadd.f32 %v1360_v57, %v1197_v42  ;;  %v1650_v23 = vcvt.s32.f32 %v1649_v26  ;;  %v5082_v25 = vmul.f32 %v2980_v32, %v6524_v40  ;;  %v5085_v39 = vmul.f32 %v2980_v32, %v6525_v22  ;;  %v6616_v42 = vld [vmem:[#allocation18_spill] sm:$0xff] }
 0x27d   :  { %v5088_v55 = vmul.f32 %v2980_v32, %v6528_v44  ;;  %v2690_v6 = vcvt.s32.f32 %v2689_v9  ;;  %v2705_v20 = vcvt.f32.s32 %v5060_v34  ;;  %vm5091_vm7 = vcmp.lt.f32.partialorder %v1647_v63, 8388608.0 }
 0x27e   :  { %1362 = vadd.xlane.f32.xlu1 %v1361_v33  ;;  %v1651_v5 = vand.u32 2147483647, %v1650_v23  ;;  %v5096_v48 = vmul.f32 %v2980_v32, %v6569_v31  ;;  %v5099_v61 = vmul.f32 %v2980_v32, %v6570_v0  ;;  %v2698_v60 = vcvt.s32.f32 %v2697_v52 }
 0x27f   :  { %v5102_v62 = vmul.f32 %v2980_v32, %v6571_v50  ;;  %v2687_v46 = vand.u32 2147483647, %v5051_v24  ;;  %v2713_v10 = vcvt.f32.s32 %v5069_v37  ;;  %v5107_v59 = vmul.f32 %v2980_v32, %v6614_v29 }
 0x280   :  { %v1653_v27 = vor.u32 %v1652_v49, %v1651_v5  ;;  %v5110_v43 = vmul.f32 %v2980_v32, %v6615_v18  ;;  %v2695_v36 = vand.u32 2147483647, %v5054_v51  ;;  %v2721_v58 = vcvt.f32.s32 %v5072_v28 }
 0x281   :  { %v5115_v57 = vmul.f32 %v2980_v32, %v6616_v42  ;;  %v2691_v33 = vand.u32 2147483647, %v2690_v6  ;;  %v2706_v26 = vcvt.s32.f32 %v2705_v20  ;;  %v2729_v56 = vcvt.f32.s32 %v5076_v35 }
 0x282   :  { %v2692_v23 = vand.u32 2147483648, %v5051_v24  ;;  %v2699_v9 = vand.u32 2147483647, %v2698_v60  ;;  %v2700_v63 = vand.u32 2147483648, %v5054_v51  ;;  %v2703_v52 = vand.u32 2147483647, %v5060_v34 }
 0x283   :  { %v1654_v5 = vsel %vm5091_vm7, %v1653_v27, %v270_v11  ;;  %vm5123_vm8 = vcmp.lt.f32.partialorder %v2687_v46, 8388608.0  ;;  %v2711_v32 = vand.u32 2147483647, %v5069_v37  ;;  %v2714_v6 = vcvt.s32.f32 %v2713_v10 }
 0x284   :  { %vm5128_vm9 = vcmp.lt.f32.partialorder %v2695_v36, 8388608.0  ;;  %v2708_v60 = vand.u32 2147483648, %v5060_v34  ;;  %v2722_v38 = vcvt.s32.f32 %v2721_v58  ;;  %v2737_v45 = vcvt.f32.s32 %v5079_v7 }
 0x285   :  { %v5134_v19 = vor.u32 %v2692_v23, %v2691_v33  ;;  %v2707_v4 = vand.u32 2147483647, %v2706_v26  ;;  %v2730_v11 = vcvt.s32.f32 %v2729_v56  ;;  %v2745_v27 = vcvt.f32.s32 %v5082_v25 }
 0x286   :  { %v5137_v46 = vsub.f32 0.0, %v1654_v5  ;;  %v5139_v1 = vsub.f32 255.0, %v1654_v5  ;;  %v5141_v10 = vor.u32 %v2700_v63, %v2699_v9  ;;  %vm5143_vm10 = vcmp.lt.f32.partialorder %v2703_v52, 8388608.0  ;;  %v5153_v23 = vpop.eup %2981 }
 0x287   :  { %vm5147_vm11 = vcmp.lt.f32.partialorder %v2711_v32, 8388608.0  ;;  %v2715_v33 = vand.u32 2147483647, %v2714_v6  ;;  %v2716_v26 = vand.u32 2147483648, %v5069_v37  ;;  %v2719_v56 = vand.u32 2147483647, %v5072_v28 }
 0x288   :  { %v2723_v54 = vand.u32 2147483647, %v2722_v38  ;;  %v2727_v5 = vand.u32 2147483647, %v5076_v35  ;;  %v2738_v9 = vcvt.s32.f32 %v2737_v45  ;;  %v2753_v63 = vcvt.f32.s32 %v5085_v39 }
 0x289   :  { %v2694_v52 = vsel %vm5123_vm8, %v5134_v19, %v5051_v24  ;;  %v5161_v32 = vor.u32 %v2708_v60, %v2707_v4  ;;  %v2731_v6 = vand.u32 2147483647, %v2730_v11  ;;  %v2746_v21 = vcvt.s32.f32 %v2745_v27 }
 0x28a   :  { %v2702_v30 = vsel %vm5128_vm9, %v5141_v10, %v5054_v51  ;;  %v2724_v38 = vand.u32 2147483648, %v5072_v28  ;;  %v2735_v45 = vand.u32 2147483647, %v5079_v7  ;;  %v2761_v53 = vcvt.f32.s32 %v5088_v55 }
 0x28b   :  { %v5170_v47 = vor.u32 %v2716_v26, %v2715_v33  ;;  %vm5172_vm12 = vcmp.lt.f32.partialorder %v2719_v56, 8388608.0  ;;  %v2732_v19 = vand.u32 2147483648, %v5076_v35  ;;  %v2743_v60 = vand.u32 2147483647, %v5082_v25 }
 0x28c   :  { %v5178_v4 = vor.u32 %v2724_v38, %v2723_v54  ;;  %vm5180_vm13 = vcmp.lt.f32.partialorder %v2727_v5, 8388608.0  ;;  %v2739_v11 = vand.u32 2147483647, %v2738_v9  ;;  %v2754_v27 = vcvt.s32.f32 %v2753_v63 }
 0x28d   :  { %v2710_v10 = vsel %vm5143_vm10, %v5161_v32, %v5060_v34  ;;  %v5188_v33 = vor.u32 %v2732_v19, %v2731_v6  ;;  %v2747_v26 = vand.u32 2147483647, %v2746_v21  ;;  %v2751_v56 = vand.u32 2147483647, %v5085_v39 }
 0x28e   :  { %vm5191_vm14 = vcmp.lt.f32.partialorder %v2735_v45, 8388608.0  ;;  %v2740_v54 = vand.u32 2147483648, %v5079_v7  ;;  %v2759_v5 = vand.u32 2147483647, %v5088_v55  ;;  %v2762_v9 = vcvt.s32.f32 %v2761_v53 }
 0x28f   :  { %v2718_v36 = vsel %vm5147_vm11, %v5170_v47, %v5069_v37  ;;  %vm5201_vm15 = vcmp.lt.f32.partialorder %v2743_v60, 8388608.0  ;;  %v2748_v21 = vand.u32 2147483648, %v5082_v25  ;;  %v2769_v32 = vcvt.f32.s32 %v5096_v48 }
 0x290   :  { %v2726_v6 = vsel %vm5172_vm12, %v5178_v4, %v5072_v28  ;;  %v5211_v38 = vor.u32 %v2740_v54, %v2739_v11  ;;  %v2755_v53 = vand.u32 2147483647, %v2754_v27  ;;  %v2777_v45 = vcvt.f32.s32 %v5099_v61 }
 0x291   :  { %v2734_v47 = vsel %vm5180_vm13, %v5188_v33, %v5076_v35  ;;  %v5218_v58 = vor.u32 %v2748_v21, %v2747_v26  ;;  %vm5220_vm0 = vcmp.lt.f32.partialorder %v2751_v56, 8388608.0  ;;  %v2756_v60 = vand.u32 2147483648, %v5085_v39 }
 0x292   :  { %vm5225_vm1 = vcmp.lt.f32.partialorder %v2759_v5, 8388608.0  ;;  %v2763_v4 = vand.u32 2147483647, %v2762_v9  ;;  %v2767_v11 = vand.u32 2147483647, %v5096_v48  ;;  %v2785_v27 = vcvt.f32.s32 %v5102_v62 }
 0x293   :  { %v2764_v20 = vand.u32 2147483648, %v5088_v55  ;;  %v2770_v33 = vcvt.s32.f32 %v2769_v32  ;;  %v2775_v26 = vand.u32 2147483647, %v5099_v61  ;;  %v2793_v56 = vcvt.f32.s32 %v5107_v59 }
 0x294   :  { %v2742_v54 = vsel %vm5191_vm14, %v5211_v38, %v5079_v7  ;;  %v5238_v5 = vor.u32 %v2756_v60, %v2755_v53  ;;  %v2778_v21 = vcvt.s32.f32 %v2777_v45  ;;  %v2801_v9 = vcvt.f32.s32 %v5110_v43 }
 0x295   :  { %v2750_v18 = vsel %vm5201_vm15, %v5218_v58, %v5082_v25  ;;  %v2772_v32 = vand.u32 2147483648, %v5096_v48  ;;  %v750_v29 = vmax.f32 %v5137_v46, %v2694_v52  ;;  %v751_v50 = vmax.f32 %v5137_v46, %v2702_v30 }
 0x296   :  { %v2765_v0 = vor.u32 %v2764_v20, %v2763_v4  ;;  %vm5248_vm2 = vcmp.lt.f32.partialorder %v2767_v11, 8388608.0  ;;  %v2783_v38 = vand.u32 2147483647, %v5102_v62  ;;  %v2786_v53 = vcvt.s32.f32 %v2785_v27 }
 0x297   :  { %v2809_v45 = vcvt.f32.s32 %v5115_v57  ;;  %v2771_v60 = vand.u32 2147483647, %v2770_v33  ;;  %vm5254_vm3 = vcmp.lt.f32.partialorder %v2775_v26, 8388608.0  ;;  %v2791_v58 = vand.u32 2147483647, %v5107_v59 }
 0x298   :  { %v2794_v52 = vcvt.s32.f32 %v2793_v56  ;;  %v2758_v30 = vsel %vm5220_vm0, %v5238_v5, %v5085_v39  ;;  %v2779_v4 = vand.u32 2147483647, %v2778_v21  ;;  %v2780_v11 = vand.u32 2147483648, %v5099_v61 }
 0x299   :  { %v2802_v20 = vcvt.s32.f32 %v2801_v9  ;;  %v2788_v27 = vand.u32 2147483648, %v5102_v62  ;;  %v752_v33 = vmax.f32 %v5137_v46, %v2710_v10  ;;  %v910_v26 = vmin.f32 %v5139_v1, %v750_v29 }
 0x29a   :  { %v911_v31 = vmin.f32 %v5139_v1, %v751_v50  ;;  %v2766_v56 = vsel %vm5225_vm1, %v2765_v0, %v5088_v55  ;;  %vm5271_vm4 = vcmp.lt.f32.partialorder %v2783_v38, 8388608.0  ;;  %v2787_v19 = vand.u32 2147483647, %v2786_v53 }
 0x29b   :  { %v2810_v5 = vcvt.s32.f32 %v2809_v45  ;;  %v2773_v21 = vor.u32 %v2772_v32, %v2771_v60  ;;  %vm5275_vm5 = vcmp.lt.f32.partialorder %v2791_v58, 8388608.0  ;;  %v2795_v10 = vand.u32 2147483647, %v2794_v52 }
 0x29c   :  { %v753_v29 = vmax.f32 %v5137_v46, %v2718_v36  ;;  %v2781_v22 = vor.u32 %v2780_v11, %v2779_v4  ;;  %v2796_v50 = vand.u32 2147483648, %v5107_v59  ;;  %v2799_v49 = vand.u32 2147483647, %v5110_v43 }
 0x29d   :  { %v2803_v0 = vand.u32 2147483647, %v2802_v20  ;;  %v754_v38 = vmax.f32 %v5137_v46, %v2726_v6  ;;  %v912_v40 = vmin.f32 %v5139_v1, %v752_v33  ;;  %v1070_v53 = vsub.f32 %v910_v26, %v5051_v24 }
 0x29e   :  { %v1071_v32 = vsub.f32 %v911_v31, %v5054_v51  ;;  %v2789_v45 = vor.u32 %v2788_v27, %v2787_v19  ;;  %v2804_v60 = vand.u32 2147483648, %v5110_v43  ;;  %v2807_v58 = vand.u32 2147483647, %v5115_v57 }
 0x29f   :  { %v2811_v36 = vand.u32 2147483647, %v2810_v5  ;;  %v2774_v52 = vsel %vm5248_vm2, %v2773_v21, %v5096_v48  ;;  %v2797_v4 = vor.u32 %v2796_v50, %v2795_v10  ;;  %v755_v11 = vmax.f32 %v5137_v46, %v2734_v47 }
 0x2a0   :  { %v913_v6 = vmin.f32 %v5139_v1, %v753_v29  ;;  %v2782_v24 = vsel %vm5254_vm3, %v2781_v22, %v5099_v61  ;;  %v2805_v31 = vor.u32 %v2804_v60, %v2803_v0  ;;  %v2812_v51 = vand.u32 2147483648, %v5115_v57 }
 0x2a1   :  { %v756_v20 = vmax.f32 %v5137_v46, %v2742_v54  ;;  %v914_v27 = vmin.f32 %v5139_v1, %v754_v38  ;;  %v1072_v33 = vsub.f32 %v912_v40, %v5060_v34  ;;  %v1230_v42 = vmul.f32 %v1070_v53, %v1070_v53 }
 0x2a2   :  { %v1231_v26 = vmul.f32 %v1071_v32, %v1071_v32  ;;  %v2790_v47 = vsel %vm5271_vm4, %v2789_v45, %v5102_v62  ;;  %vm5303_vm6 = vcmp.lt.f32.partialorder %v2799_v49, 8388608.0  ;;  %vm5307_vm7 = vcmp.lt.f32.partialorder %v2807_v58, 8388608.0 }
 0x2a3   :  { %v2813_v63 = vor.u32 %v2812_v51, %v2811_v36  ;;  %v2798_v54 = vsel %vm5275_vm5, %v2797_v4, %v5107_v59  ;;  %v757_v40 = vmax.f32 %v5137_v46, %v2750_v18  ;;  %v915_v34 = vmin.f32 %v5139_v1, %v755_v11 }
 0x2a4   :  { %v1073_v44 = vsub.f32 %v913_v6, %v5069_v37  ;;  %v2806_v5 = vsel %vm5303_vm6, %v2805_v31, %v5110_v43  ;;  %v758_v21 = vmax.f32 %v5137_v46, %v2758_v30  ;;  %v759_v10 = vmax.f32 %v5137_v46, %v2766_v56 }
 0x2a5   :  { %v760_v29 = vmax.f32 %v5137_v46, %v2774_v52  ;;  %v916_v50 = vmin.f32 %v5139_v1, %v756_v20  ;;  %v1074_v9 = vsub.f32 %v914_v27, %v5072_v28  ;;  %v1232_v49 = vmul.f32 %v1072_v33, %v1072_v33 }
 0x2a6   :  { %v1398_v18 = vadd.f32 %v1231_v26, %v1230_v42  ;;  %v2814_v37 = vsel %vm5307_vm7, %v2813_v63, %v5115_v57  ;;  %v761_v0 = vmax.f32 %v5137_v46, %v2782_v24  ;;  %v762_v38 = vmax.f32 %v5137_v46, %v2790_v47 }
 0x2a7   :  { %v763_v30 = vmax.f32 %v5137_v46, %v2798_v54  ;;  %v917_v56 = vmin.f32 %v5139_v1, %v757_v40  ;;  %v1075_v53 = vsub.f32 %v915_v34, %v5076_v35  ;;  %v1233_v32 = vmul.f32 %v1073_v44, %v1073_v44 }
 0x2a8   :  { %v1399_v45 = vadd.f32 %v1398_v18, %v1232_v49  ;;  %v764_v28 = vmax.f32 %v5137_v46, %v2806_v5  ;;  %v765_v60 = vmax.f32 %v5137_v46, %v2814_v37  ;;  %v918_v58 = vmin.f32 %v5139_v1, %v758_v21 }
 0x2a9   :  { %v226_v36 = vsub.f32 %v6607_v41, %v5066_v3  ;;  %v1076_v52 = vsub.f32 %v916_v50, %v5079_v7  ;;  %v1234_v4 = vmul.f32 %v1074_v9, %v1074_v9  ;;  %v5341_v6 = vmul.f32 %v5153_v23, %v3178_v2 }
 0x2aa   :  { %v1400_v11 = vadd.f32 %v1399_v45, %v1233_v32  ;;  %v919_v35 = vmin.f32 %v5139_v1, %v759_v10  ;;  %v920_v24 = vmin.f32 %v5139_v1, %v760_v29  ;;  %v921_v31 = vmin.f32 %v5139_v1, %v761_v0 }
 0x2ab   :  { %v922_v46 = vmin.f32 %v5139_v1, %v762_v38  ;;  %v923_v51 = vmin.f32 %v5139_v1, %v763_v30  ;;  %v1077_v3 = vsub.f32 %v917_v56, %v5082_v25  ;;  %v1235_v20 = vmul.f32 %v1075_v53, %v1075_v53 }
 0x2ac   :  { %v1401_v7 = vadd.f32 %v1400_v11, %v1234_v4  ;;  %v924_v27 = vmin.f32 %v5139_v1, %v764_v28  ;;  %v925_v33 = vmin.f32 %v5139_v1, %v765_v60  ;;  %v1078_v42 = vsub.f32 %v918_v58, %v5085_v39  ;;  %v6653_v11 = vld [vmem:[#allocation11_spill] sm:$0xff] }
 0x2ad   :  { %v1236_v26 = vmul.f32 %v1076_v52, %v1076_v52  ;;  %v1609_v19 = vcvt.f32.s32 %v5341_v6  ;;  %v1079_v22 = vsub.f32 %v919_v35, %v5088_v55  ;;  %v1080_v63 = vsub.f32 %v920_v24, %v5096_v48  ;;  %v6652_v52 = vld [vmem:[#allocation10_spill] sm:$0xff]  ;;  %v6654_v24 = vld [vmem:[#allocation12_spill] sm:$0xff] }
 0x2ae   :  { %v1402_v47 = vadd.f32 %v1401_v7, %v1235_v20  ;;  %v1081_v54 = vsub.f32 %v921_v31, %v5099_v61  ;;  %v5356_v40 = vmul.f32 0.003921569, %v226_v36  ;;  %v1082_v25 = vsub.f32 %v922_v46, %v5102_v62  ;;  %v6655_v46 = vld [vmem:[#allocation13_spill] sm:$0xff] }
 0x2af   :  { %v1083_v34 = vsub.f32 %v923_v51, %v5107_v59  ;;  %v1237_v44 = vmul.f32 %v1077_v3, %v1077_v3  ;;  %v1084_v39 = vsub.f32 %v924_v27, %v5110_v43  ;;  %v1085_v5 = vsub.f32 %v925_v33, %v5115_v57  ;;  %v6656_v33 = vld [vmem:[#allocation14_spill] sm:$0xff] }
 0x2b0   :  { %6649 = vst [vmem:[#allocation35_spill] sm:$0xff] %v5356_v40  ;;  %v1403_v1 = vadd.f32 %v1402_v47, %v1236_v26  ;;  %v5364_v21 = vmul.f32 %v5153_v23, %v3060_v12  ;;  %v1238_v55 = vmul.f32 %v1078_v42, %v1078_v42  ;;  %v1610_v10 = vcvt.s32.f32 %v1609_v19  ;;  %v6657_v47 = vld [vmem:[#allocation15_spill] sm:$0xff] }
 0x2b1   :  { %v5368_v61 = vmul.f32 %v5153_v23, %v3062_v13  ;;  %v1239_v62 = vmul.f32 %v1079_v22, %v1079_v22  ;;  %v1240_v29 = vmul.f32 %v1080_v63, %v1080_v63  ;;  %v1241_v59 = vmul.f32 %v1081_v54, %v1081_v54  ;;  %v6658_v22 = vld [vmem:[#allocation16_spill] sm:$0xff] }
 0x2b2   :  { %v1404_v48 = vadd.f32 %v1403_v1, %v1237_v44  ;;  %2983 = vrcp.f32 %v5356_v40  ;;  %v1242_v50 = vmul.f32 %v1082_v25, %v1082_v25  ;;  %v1243_v43 = vmul.f32 %v1083_v34, %v1083_v34  ;;  %v6659_v44 = vld [vmem:[#allocation17_spill] sm:$0xff] }
 0x2b3   :  { %v1607_v57 = vand.u32 2147483647, %v5341_v6  ;;  %v1244_v49 = vmul.f32 %v1084_v39, %v1084_v39  ;;  %v1245_v18 = vmul.f32 %v1085_v5, %v1085_v5  ;;  %v5374_v37 = vmul.f32 %v5153_v23, %v3064_v14 }
 0x2b4   :  { %v1405_v9 = vadd.f32 %v1404_v48, %v1238_v55  ;;  %v2049_v0 = vcvt.f32.s32 %v5364_v21  ;;  %v1611_v30 = vand.u32 2147483647, %v1610_v10  ;;  %v5379_v56 = vmul.f32 %v5153_v23, %v3066_v15  ;;  %v6660_v55 = vld [vmem:[#allocation18_spill] sm:$0xff] }
 0x2b5   :  { %v2057_v53 = vcvt.f32.s32 %v5368_v61  ;;  %v1612_v32 = vand.u32 2147483648, %v5341_v6  ;;  %v5385_v45 = vmul.f32 %v5153_v23, %v3068_v16  ;;  %v5389_v28 = vmul.f32 %v5153_v23, %v3070_v17 }
 0x2b6   :  { %v1406_v38 = vadd.f32 %v1405_v9, %v1239_v62  ;;  %v5393_v60 = vmul.f32 %v5153_v23, %v6523_v8  ;;  %vm5395_vm8 = vcmp.lt.f32.partialorder %v1607_v57, 8388608.0  ;;  %v5401_v4 = vmul.f32 %v5153_v23, %v6652_v52 }
 0x2b7   :  { %v5405_v35 = vmul.f32 %v5153_v23, %v6653_v11  ;;  %v5409_v31 = vmul.f32 %v5153_v23, %v6654_v24  ;;  %v5413_v51 = vmul.f32 %v5153_v23, %v6655_v46  ;;  %v2050_v3 = vcvt.s32.f32 %v2049_v0 }
 0x2b8   :  { %v1407_v58 = vadd.f32 %v1406_v38, %v1240_v29  ;;  %v2065_v20 = vcvt.f32.s32 %v5374_v37  ;;  %v1613_v27 = vor.u32 %v1612_v32, %v1611_v30  ;;  %v5418_v42 = vmul.f32 %v5153_v23, %v6656_v33 }
 0x2b9   :  { %v2058_v26 = vcvt.s32.f32 %v2057_v53  ;;  %v5422_v19 = vmul.f32 %v5153_v23, %v6657_v47  ;;  %v5426_v63 = vmul.f32 %v5153_v23, %v6658_v22  ;;  %v2047_v54 = vand.u32 2147483647, %v5364_v21 }
 0x2ba   :  { %v1408_v7 = vadd.f32 %v1407_v58, %v1241_v59  ;;  %v2073_v25 = vcvt.f32.s32 %v5379_v56  ;;  %v5432_v1 = vmul.f32 %v5153_v23, %v6659_v44  ;;  %v2055_v39 = vand.u32 2147483647, %v5368_v61 }
 0x2bb   :  { %v2081_v5 = vcvt.f32.s32 %v5385_v45  ;;  %v5438_v48 = vmul.f32 %v5153_v23, %v6660_v55  ;;  %v2051_v10 = vand.u32 2147483647, %v2050_v3  ;;  %v2052_v62 = vand.u32 2147483648, %v5364_v21 }
 0x2bc   :  { %v1409_v34 = vadd.f32 %v1408_v7, %v1242_v50  ;;  %v2066_v29 = vcvt.s32.f32 %v2065_v20  ;;  %v1614_v50 = vsel %vm5395_vm8, %v1613_v27, %v5341_v6  ;;  %v2059_v9 = vand.u32 2147483647, %v2058_v26 }
 0x2bd   :  { %v2089_v57 = vcvt.f32.s32 %v5389_v28  ;;  %vm5445_vm9 = vcmp.lt.f32.partialorder %v2047_v54, 8388608.0  ;;  %v2060_v38 = vand.u32 2147483648, %v5368_v61  ;;  %v2063_v23 = vand.u32 2147483647, %v5374_v37 }
 0x2be   :  { %v1410_v59 = vadd.f32 %v1409_v34, %v1243_v43  ;;  %v2074_v30 = vcvt.s32.f32 %v2073_v25  ;;  %vm5453_vm10 = vcmp.lt.f32.partialorder %v2055_v39, 8388608.0  ;;  %v2082_v6 = vcvt.s32.f32 %v2081_v5 }
 0x2bf   :  { %v5451_v53 = vpop.eup %2983  ;;  %v2097_v58 = vcvt.f32.s32 %v5393_v60  ;;  %v5458_v36 = vsub.f32 0.0, %v1614_v50  ;;  %v5460_v3 = vor.u32 %v2052_v62, %v2051_v10  ;;  %v2067_v20 = vand.u32 2147483647, %v2066_v29 }
 0x2c0   :  { %v1411_v32 = vadd.f32 %v1410_v59, %v1244_v49  ;;  %v2071_v7 = vand.u32 2147483647, %v5379_v56  ;;  %v5463_v26 = vsub.f32 255.0, %v1614_v50  ;;  %v5465_v54 = vor.u32 %v2060_v38, %v2059_v9 }
 0x2c1   :  { %v2090_v49 = vcvt.s32.f32 %v2089_v57  ;;  %v2068_v25 = vand.u32 2147483648, %v5374_v37  ;;  %v2075_v34 = vand.u32 2147483647, %v2074_v30  ;;  %v2079_v39 = vand.u32 2147483647, %v5385_v45 }
 0x2c2   :  { %v1412_v27 = vadd.f32 %v1411_v32, %v1245_v18  ;;  %v2105_v5 = vcvt.f32.s32 %v5401_v4  ;;  %vm5470_vm11 = vcmp.lt.f32.partialorder %v2063_v23, 8388608.0  ;;  %v2076_v62 = vand.u32 2147483648, %v5379_v56 }
 0x2c3   :  { %v2083_v18 = vand.u32 2147483647, %v2082_v6  ;;  %v2098_v29 = vcvt.s32.f32 %v2097_v58  ;;  %v2054_v59 = vsel %vm5445_vm9, %v5460_v3, %v5364_v21  ;;  %v5479_v50 = vor.u32 %v2068_v25, %v2067_v20 }
 0x2c4   :  { %1413 = vadd.xlane.f32.xlu0 %v1412_v27  ;;  %vm5481_vm12 = vcmp.lt.f32.partialorder %v2071_v7, 8388608.0  ;;  %v2087_v57 = vand.u32 2147483647, %v5389_v28  ;;  %v2062_v38 = vsel %vm5453_vm10, %v5465_v54, %v5368_v61  ;;  %v2084_v23 = vand.u32 2147483648, %v5385_v45 }
 0x2c5   :  { %v2091_v30 = vand.u32 2147483647, %v2090_v49  ;;  %v2113_v32 = vcvt.f32.s32 %v5405_v35  ;;  %v5492_v0 = vor.u32 %v2076_v62, %v2075_v34  ;;  %vm5494_vm13 = vcmp.lt.f32.partialorder %v2079_v39, 8388608.0 }
 0x2c6   :  { %v2106_v58 = vcvt.s32.f32 %v2105_v5  ;;  %v2121_v3 = vcvt.f32.s32 %v5409_v31  ;;  %v5499_v20 = vor.u32 %v2084_v23, %v2083_v18  ;;  %v2092_v7 = vand.u32 2147483648, %v5389_v28 }
 0x2c7   :  { %v2095_v43 = vand.u32 2147483647, %v5393_v60  ;;  %v2099_v27 = vand.u32 2147483647, %v2098_v29  ;;  %v2070_v54 = vsel %vm5470_vm11, %v5479_v50, %v5374_v37  ;;  %vm5507_vm14 = vcmp.lt.f32.partialorder %v2087_v57, 8388608.0 }
 0x2c8   :  { %v2103_v25 = vand.u32 2147483647, %v5401_v4  ;;  %v2111_v34 = vand.u32 2147483647, %v5405_v35  ;;  %v5513_v39 = vor.u32 %v2092_v7, %v2091_v30  ;;  %v2100_v5 = vand.u32 2147483648, %v5393_v60 }
 0x2c9   :  { %v2114_v62 = vcvt.s32.f32 %v2113_v32  ;;  %v2129_v18 = vcvt.f32.s32 %v5413_v51  ;;  %v2078_v10 = vsel %vm5481_vm12, %v5492_v0, %v5379_v56  ;;  %v2107_v29 = vand.u32 2147483647, %v2106_v58 }
 0x2ca   :  { %v2122_v50 = vcvt.s32.f32 %v2121_v3  ;;  %v2137_v57 = vcvt.f32.s32 %v5418_v42  ;;  %v2086_v23 = vsel %vm5494_vm13, %v5499_v20, %v5385_v45  ;;  %vm5526_vm15 = vcmp.lt.f32.partialorder %v2095_v43, 8388608.0 }
 0x2cb   :  { %v5530_v32 = vor.u32 %v2100_v5, %v2099_v27  ;;  %v2119_v7 = vand.u32 2147483647, %v5409_v31  ;;  %vm5533_vm0 = vcmp.lt.f32.partialorder %v2103_v25, 8388608.0  ;;  %v2108_v0 = vand.u32 2147483648, %v5401_v4 }
 0x2cc   :  { %vm5538_vm1 = vcmp.lt.f32.partialorder %v2111_v34, 8388608.0  ;;  %v2127_v6 = vand.u32 2147483647, %v5413_v51  ;;  %v2094_v3 = vsel %vm5507_vm14, %v5513_v39, %v5389_v28  ;;  %v2115_v20 = vand.u32 2147483647, %v2114_v62 }
 0x2cd   :  { %v2116_v43 = vand.u32 2147483648, %v5405_v35  ;;  %v2130_v27 = vcvt.s32.f32 %v2129_v18  ;;  %v5548_v25 = vor.u32 %v2108_v0, %v2107_v29  ;;  %v2123_v5 = vand.u32 2147483647, %v2122_v50 }
 0x2ce   :  { %v2124_v40 = vand.u32 2147483648, %v5409_v31  ;;  %v2138_v34 = vcvt.s32.f32 %v2137_v57  ;;  %v2102_v41 = vsel %vm5526_vm15, %v5530_v32, %v5393_v60  ;;  %vm5555_vm2 = vcmp.lt.f32.partialorder %v2119_v7, 8388608.0 }
 0x2cf   :  { %v2145_v49 = vcvt.f32.s32 %v5422_v19  ;;  %v2153_v39 = vcvt.f32.s32 %v5426_v63  ;;  %vm5561_vm3 = vcmp.lt.f32.partialorder %v2127_v6, 8388608.0  ;;  %v2132_v18 = vand.u32 2147483648, %v5413_v51 }
 0x2d0   :  { %v670_v29 = vmax.f32 %v5458_v36, %v2054_v59  ;;  %v671_v50 = vmax.f32 %v5458_v36, %v2062_v38  ;;  %v2117_v57 = vor.u32 %v2116_v43, %v2115_v20  ;;  %v2131_v30 = vand.u32 2147483647, %v2130_v27 }
 0x2d1   :  { %v2135_v32 = vand.u32 2147483647, %v5418_v42  ;;  %v2161_v7 = vcvt.f32.s32 %v5432_v1  ;;  %v2110_v0 = vsel %vm5533_vm0, %v5548_v25, %v5401_v4  ;;  %v2125_v6 = vor.u32 %v2124_v40, %v2123_v5 }
 0x2d2   :  { %v2139_v44 = vand.u32 2147483647, %v2138_v34  ;;  %v2143_v22 = vand.u32 2147483647, %v5422_v19  ;;  %v2146_v47 = vcvt.s32.f32 %v2145_v49  ;;  %v2151_v59 = vand.u32 2147483647, %v5426_v63 }
 0x2d3   :  { %v2154_v33 = vcvt.s32.f32 %v2153_v39  ;;  %v2169_v38 = vcvt.f32.s32 %v5438_v48  ;;  %v2140_v20 = vand.u32 2147483648, %v5418_v42  ;;  %v672_v43 = vmax.f32 %v5458_v36, %v2070_v54 }
 0x2d4   :  { %v830_v27 = vmin.f32 %v5463_v26, %v670_v29  ;;  %v831_v46 = vmin.f32 %v5463_v26, %v671_v50  ;;  %v2118_v40 = vsel %vm5538_vm1, %v2117_v57, %v5405_v35  ;;  %v2133_v9 = vor.u32 %v2132_v18, %v2131_v30 }
 0x2d5   :  { %vm5584_vm4 = vcmp.lt.f32.partialorder %v2135_v32, 8388608.0  ;;  %v2162_v5 = vcvt.s32.f32 %v2161_v7  ;;  %v2126_v34 = vsel %vm5555_vm2, %v2125_v6, %v5409_v31  ;;  %v2141_v49 = vor.u32 %v2140_v20, %v2139_v44 }
 0x2d6   :  { %vm5591_vm5 = vcmp.lt.f32.partialorder %v2143_v22, 8388608.0  ;;  %v2148_v39 = vand.u32 2147483648, %v5422_v19  ;;  %v673_v58 = vmax.f32 %v5458_v36, %v2078_v10  ;;  %v2147_v29 = vand.u32 2147483647, %v2146_v47 }
 0x2d7   :  { %vm5597_vm6 = vcmp.lt.f32.partialorder %v2151_v59, 8388608.0  ;;  %v2155_v50 = vand.u32 2147483647, %v2154_v33  ;;  %v2170_v57 = vcvt.s32.f32 %v2169_v38  ;;  %v674_v30 = vmax.f32 %v5458_v36, %v2086_v23 }
 0x2d8   :  { %v832_v55 = vmin.f32 %v5463_v26, %v672_v43  ;;  %v990_v22 = vsub.f32 %v830_v27, %v5364_v21  ;;  %v991_v44 = vsub.f32 %v831_v46, %v5368_v61  ;;  %v2134_v32 = vsel %vm5561_vm3, %v2133_v9, %v5413_v51 }
 0x2d9   :  { %v2156_v47 = vand.u32 2147483648, %v5426_v63  ;;  %v2159_v10 = vand.u32 2147483647, %v5432_v1  ;;  %v2163_v7 = vand.u32 2147483647, %v2162_v5  ;;  %v2164_v33 = vand.u32 2147483648, %v5432_v1 }
 0x2da   :  { %v2167_v6 = vand.u32 2147483647, %v5438_v48  ;;  %v675_v23 = vmax.f32 %v5458_v36, %v2094_v3  ;;  %v833_v59 = vmin.f32 %v5463_v26, %v673_v58  ;;  %v2149_v21 = vor.u32 %v2148_v39, %v2147_v29 }
 0x2db   :  { %v2157_v38 = vor.u32 %v2156_v47, %v2155_v50  ;;  %v2171_v61 = vand.u32 2147483647, %v2170_v57  ;;  %v676_v46 = vmax.f32 %v5458_v36, %v2102_v41  ;;  %v834_v62 = vmin.f32 %v5463_v26, %v674_v30 }
 0x2dc   :  { %v992_v20 = vsub.f32 %v832_v55, %v5374_v37  ;;  %v1150_v43 = vmul.f32 %v990_v22, %v990_v22  ;;  %v1151_v27 = vmul.f32 %v991_v44, %v991_v44  ;;  %v2142_v9 = vsel %vm5584_vm4, %v2141_v49, %v5418_v42 }
 0x2dd   :  { %vm5620_vm7 = vcmp.lt.f32.partialorder %v2159_v10, 8388608.0  ;;  %v2165_v3 = vor.u32 %v2164_v33, %v2163_v7  ;;  %v2172_v39 = vand.u32 2147483648, %v5438_v48  ;;  %vm5625_vm8 = vcmp.lt.f32.partialorder %v2167_v6, 8388608.0 }
 0x2de   :  { %v677_v41 = vmax.f32 %v5458_v36, %v2110_v0  ;;  %v835_v37 = vmin.f32 %v5463_v26, %v675_v23  ;;  %v993_v29 = vsub.f32 %v833_v59, %v5379_v56  ;;  %v2150_v25 = vsel %vm5591_vm5, %v2149_v21, %v5422_v19 }
 0x2df   :  { %v2158_v49 = vsel %vm5597_vm6, %v2157_v38, %v5426_v63  ;;  %v2173_v50 = vor.u32 %v2172_v39, %v2171_v61  ;;  %v678_v57 = vmax.f32 %v5458_v36, %v2118_v40  ;;  %v836_v30 = vmin.f32 %v5463_v26, %v676_v46 }
 0x2e0   :  { %v994_v55 = vsub.f32 %v834_v62, %v5385_v45  ;;  %v1152_v0 = vmul.f32 %v992_v20, %v992_v20  ;;  %v1313_v22 = vadd.f32 %v1151_v27, %v1150_v43  ;;  %v2166_v56 = vsel %vm5620_vm7, %v2165_v3, %v5432_v1 }
 0x2e1   :  { %v679_v54 = vmax.f32 %v5458_v36, %v2126_v34  ;;  %v680_v44 = vmax.f32 %v5458_v36, %v2134_v32  ;;  %v681_v18 = vmax.f32 %v5458_v36, %v2142_v9  ;;  %v837_v47 = vmin.f32 %v5463_v26, %v677_v41 }
 0x2e2   :  { %v995_v40 = vsub.f32 %v835_v37, %v5389_v28  ;;  %v1153_v10 = vmul.f32 %v993_v29, %v993_v29  ;;  %v1314_v7 = vadd.f32 %v1313_v22, %v1152_v0  ;;  %v2174_v45 = vsel %vm5625_vm8, %v2173_v50, %v5438_v48 }
 0x2e3   :  { %v682_v33 = vmax.f32 %v5458_v36, %v2150_v25  ;;  %v683_v6 = vmax.f32 %v5458_v36, %v2158_v49  ;;  %v684_v34 = vmax.f32 %v5458_v36, %v2166_v56  ;;  %v838_v32 = vmin.f32 %v5463_v26, %v678_v57 }
 0x2e4   :  { %v996_v23 = vsub.f32 %v836_v30, %v5393_v60  ;;  %v1154_v59 = vmul.f32 %v994_v55, %v994_v55  ;;  %v1315_v21 = vadd.f32 %v1314_v7, %v1153_v10  ;;  %v685_v28 = vmax.f32 %v5458_v36, %v2174_v45 }
 0x2e5   :  { %v839_v38 = vmin.f32 %v5463_v26, %v679_v54  ;;  %v840_v61 = vmin.f32 %v5463_v26, %v680_v44  ;;  %v997_v46 = vsub.f32 %v837_v47, %v5401_v4  ;;  %v1155_v62 = vmul.f32 %v995_v40, %v995_v40 }
 0x2e6   :  { %v1316_v20 = vadd.f32 %v1315_v21, %v1154_v59  ;;  %v841_v43 = vmin.f32 %v5463_v26, %v681_v18  ;;  %v842_v27 = vmin.f32 %v5463_v26, %v682_v33  ;;  %v843_v9 = vmin.f32 %v5463_v26, %v683_v6 }
 0x2e7   :  { %v5666_v60 = vmul.f32 %v5451_v53, %v3178_v2  ;;  %v844_v36 = vmin.f32 %v5463_v26, %v684_v34  ;;  %v998_v5 = vsub.f32 %v838_v32, %v5405_v35  ;;  %v1156_v3 = vmul.f32 %v996_v23, %v996_v23 }
 0x2e8   :  { %v1317_v39 = vadd.f32 %v1316_v20, %v1155_v62  ;;  %v845_v4 = vmin.f32 %v5463_v26, %v685_v28  ;;  %v999_v58 = vsub.f32 %v839_v38, %v5409_v31  ;;  %v1000_v41 = vsub.f32 %v840_v61, %v5413_v51  ;;  %v6695_v62 = vld [vmem:[#allocation13_spill] sm:$0xff] }
 0x2e9   :  { %v1157_v37 = vmul.f32 %v997_v46, %v997_v46  ;;  %v1001_v25 = vsub.f32 %v841_v43, %v5418_v42  ;;  %v1002_v49 = vsub.f32 %v842_v27, %v5422_v19  ;;  %v1641_v50 = vcvt.f32.s32 %v5666_v60  ;;  %v6696_v43 = vld [vmem:[#allocation14_spill] sm:$0xff] }
 0x2ea   :  { %v1318_v29 = vadd.f32 %v1317_v39, %v1156_v3  ;;  %v1003_v57 = vsub.f32 %v843_v9, %v5426_v63  ;;  %v1004_v35 = vsub.f32 %v844_v36, %v5432_v1  ;;  %v1158_v30 = vmul.f32 %v998_v5, %v998_v5  ;;  %v6697_v5 = vld [vmem:[#allocation15_spill] sm:$0xff] }
 0x2eb   :  { %v1005_v26 = vsub.f32 %v845_v4, %v5438_v48  ;;  %v5681_v31 = vmul.f32 %v5451_v53, %v3060_v12  ;;  %v1159_v51 = vmul.f32 %v999_v58, %v999_v58  ;;  %v1160_v0 = vmul.f32 %v1000_v41, %v1000_v41  ;;  %v6698_v41 = vld [vmem:[#allocation16_spill] sm:$0xff] }
 0x2ec   :  { %v1319_v55 = vadd.f32 %v1318_v29, %v1157_v37  ;;  %v1161_v42 = vmul.f32 %v1001_v25, %v1001_v25  ;;  %v1162_v56 = vmul.f32 %v1002_v49, %v1002_v49  ;;  %v1642_v19 = vcvt.s32.f32 %v1641_v50  ;;  %v6699_v50 = vld [vmem:[#allocation17_spill] sm:$0xff] }
 0x2ed   :  { %v5685_v54 = vmul.f32 %v5451_v53, %v3062_v13  ;;  %v1163_v63 = vmul.f32 %v1003_v57, %v1003_v57  ;;  %v1164_v1 = vmul.f32 %v1004_v35, %v1004_v35  ;;  %v5689_v48 = vmul.f32 %v5451_v53, %v3064_v14 }
 0x2ee   :  { %v1320_v22 = vadd.f32 %v1319_v55, %v1158_v30  ;;  %v1165_v18 = vmul.f32 %v1005_v26, %v1005_v26  ;;  %v1639_v47 = vand.u32 2147483647, %v5666_v60  ;;  %v5694_v40 = vmul.f32 %v5451_v53, %v3066_v15  ;;  %v6700_v55 = vld [vmem:[#allocation18_spill] sm:$0xff] }
 0x2ef   :  { %v2561_v10 = vcvt.f32.s32 %v5681_v31  ;;  %v1644_v45 = vand.u32 2147483648, %v5666_v60  ;;  %v5700_v33 = vmul.f32 %v5451_v53, %v3068_v16  ;;  %v5704_v6 = vmul.f32 %v5451_v53, %v3070_v17 }
 0x2f0   :  { %v1321_v44 = vadd.f32 %v1320_v22, %v1159_v51  ;;  %v1643_v34 = vand.u32 2147483647, %v1642_v19  ;;  %v5708_v32 = vmul.f32 %v5451_v53, %v6523_v8  ;;  %v5712_v23 = vmul.f32 %v5451_v53, %v6652_v52 }
 0x2f1   :  { %v2569_v59 = vcvt.f32.s32 %v5685_v54  ;;  %v5717_v28 = vmul.f32 %v5451_v53, %v6653_v11  ;;  %v5721_v38 = vmul.f32 %v5451_v53, %v6654_v24  ;;  %v2577_v61 = vcvt.f32.s32 %v5689_v48 }
 0x2f2   :  { %v1322_v7 = vadd.f32 %v1321_v44, %v1160_v0  ;;  %vm5724_vm9 = vcmp.lt.f32.partialorder %v1639_v47, 8388608.0  ;;  %v5730_v20 = vmul.f32 %v5451_v53, %v6695_v62  ;;  %v5734_v27 = vmul.f32 %v5451_v53, %v6696_v43 }
 0x2f3   :  { %v2562_v9 = vcvt.s32.f32 %v2561_v10  ;;  %v5738_v3 = vmul.f32 %v5451_v53, %v6697_v5  ;;  %v2559_v39 = vand.u32 2147483647, %v5681_v31  ;;  %v2585_v4 = vcvt.f32.s32 %v5694_v40 }
 0x2f4   :  { %v1323_v21 = vadd.f32 %v1322_v7, %v1161_v42  ;;  %v1645_v58 = vor.u32 %v1644_v45, %v1643_v34  ;;  %v5744_v37 = vmul.f32 %v5451_v53, %v6698_v41  ;;  %v2567_v29 = vand.u32 2147483647, %v5685_v54 }
 0x2f5   :  { %v2570_v25 = vcvt.s32.f32 %v2569_v59  ;;  %v5749_v57 = vmul.f32 %v5451_v53, %v6699_v50  ;;  %v2578_v35 = vcvt.s32.f32 %v2577_v61  ;;  %v2593_v30 = vcvt.f32.s32 %v5700_v33 }
 0x2f6   :  { %v1324_v36 = vadd.f32 %v1323_v21, %v1162_v56  ;;  %v5754_v26 = vmul.f32 %v5451_v53, %v6700_v55  ;;  %v2563_v51 = vand.u32 2147483647, %v2562_v9  ;;  %v2564_v0 = vand.u32 2147483648, %v5681_v31 }
 0x2f7   :  { %v2601_v22 = vcvt.f32.s32 %v5704_v6  ;;  %vm5758_vm10 = vcmp.lt.f32.partialorder %v2559_v39, 8388608.0  ;;  %v2572_v19 = vand.u32 2147483648, %v5685_v54  ;;  %v1646_v44 = vsel %vm5724_vm9, %v1645_v58, %v5666_v60 }
 0x2f8   :  { %v1325_v49 = vadd.f32 %v1324_v36, %v1163_v63  ;;  %v2586_v63 = vcvt.s32.f32 %v2585_v4  ;;  %vm5766_vm11 = vcmp.lt.f32.partialorder %v2567_v29, 8388608.0  ;;  %v2571_v47 = vand.u32 2147483647, %v2570_v25 }
 0x2f9   :  { %v2575_v10 = vand.u32 2147483647, %v5689_v48  ;;  %v2594_v45 = vcvt.s32.f32 %v2593_v30  ;;  %v2609_v34 = vcvt.f32.s32 %v5708_v32  ;;  %v2565_v59 = vor.u32 %v2564_v0, %v2563_v51 }
 0x2fa   :  { %v1326_v42 = vadd.f32 %v1325_v49, %v1164_v1  ;;  %v2579_v1 = vand.u32 2147483647, %v2578_v35  ;;  %v2580_v21 = vand.u32 2147483648, %v5689_v48  ;;  %v2583_v61 = vand.u32 2147483647, %v5694_v40 }
 0x2fb   :  { %v2602_v9 = vcvt.s32.f32 %v2601_v22  ;;  %v5774_v60 = vsub.f32 0.0, %v1646_v44  ;;  %v5776_v46 = vsub.f32 255.0, %v1646_v44  ;;  %v2587_v36 = vand.u32 2147483647, %v2586_v63 }
 0x2fc   :  { %v1327_v7 = vadd.f32 %v1326_v42, %v1165_v18  ;;  %v2617_v39 = vcvt.f32.s32 %v5712_v23  ;;  %v2573_v4 = vor.u32 %v2572_v19, %v2571_v47  ;;  %vm5779_vm12 = vcmp.lt.f32.partialorder %v2575_v10, 8388608.0 }
 0x2fd   :  { %v2588_v58 = vand.u32 2147483648, %v5694_v40  ;;  %v2591_v29 = vand.u32 2147483647, %v5700_v33  ;;  %v2581_v25 = vor.u32 %v2580_v21, %v2579_v1  ;;  %v2595_v49 = vand.u32 2147483647, %v2594_v45 }
 0x2fe   :  { %1328 = vadd.xlane.f32.xlu1 %v1327_v7  ;;  %v2610_v35 = vcvt.s32.f32 %v2609_v34  ;;  %v2625_v30 = vcvt.f32.s32 %v5717_v28  ;;  %v2566_v51 = vsel %vm5758_vm10, %v2565_v59, %v5681_v31  ;;  %vm5789_vm13 = vcmp.lt.f32.partialorder %v2583_v61, 8388608.0 }
 0x2ff   :  { %v2599_v22 = vand.u32 2147483647, %v5704_v6  ;;  %v2603_v42 = vand.u32 2147483647, %v2602_v9  ;;  %v2589_v19 = vor.u32 %v2588_v58, %v2587_v36  ;;  %v2596_v63 = vand.u32 2147483648, %v5700_v33 }
 0x300   :  { %v2607_v44 = vand.u32 2147483647, %v5708_v32  ;;  %v2618_v47 = vcvt.s32.f32 %v2617_v39  ;;  %v2574_v10 = vsel %vm5766_vm11, %v2573_v4, %v5685_v54  ;;  %vm5799_vm14 = vcmp.lt.f32.partialorder %v2591_v29, 8388608.0 }
 0x301   :  { %v2604_v7 = vand.u32 2147483648, %v5704_v6  ;;  %v2633_v1 = vcvt.f32.s32 %v5721_v38  ;;  %v2582_v45 = vsel %vm5779_vm12, %v2581_v25, %v5689_v48  ;;  %v2597_v34 = vor.u32 %v2596_v63, %v2595_v49 }
 0x302   :  { %v2611_v59 = vand.u32 2147483647, %v2610_v35  ;;  %v2626_v21 = vcvt.s32.f32 %v2625_v30  ;;  %vm5808_vm15 = vcmp.lt.f32.partialorder %v2599_v22, 8388608.0  ;;  %v2615_v9 = vand.u32 2147483647, %v5712_v23 }
 0x303   :  { %v2605_v53 = vor.u32 %v2604_v7, %v2603_v42  ;;  %v2641_v36 = vcvt.f32.s32 %v5730_v20  ;;  %v2590_v39 = vsel %vm5789_vm13, %v2589_v19, %v5694_v40  ;;  %vm5817_vm0 = vcmp.lt.f32.partialorder %v2607_v44, 8388608.0 }
 0x304   :  { %v2612_v18 = vand.u32 2147483648, %v5708_v32  ;;  %v2619_v58 = vand.u32 2147483647, %v2618_v47  ;;  %v2623_v29 = vand.u32 2147483647, %v5717_v28  ;;  %v2634_v49 = vcvt.s32.f32 %v2633_v1 }
 0x305   :  { %v2631_v25 = vand.u32 2147483647, %v5721_v38  ;;  %v2649_v35 = vcvt.f32.s32 %v5734_v27  ;;  %v2598_v30 = vsel %vm5799_vm14, %v2597_v34, %v5700_v33  ;;  %v2620_v22 = vand.u32 2147483648, %v5712_v23 }
 0x306   :  { %v2613_v0 = vor.u32 %v2612_v18, %v2611_v59  ;;  %v2627_v42 = vand.u32 2147483647, %v2626_v21  ;;  %v2606_v19 = vsel %vm5808_vm15, %v2605_v53, %v5704_v6  ;;  %vm5832_vm1 = vcmp.lt.f32.partialorder %v2615_v9, 8388608.0 }
 0x307   :  { %v2639_v44 = vand.u32 2147483647, %v5730_v20  ;;  %v2642_v47 = vcvt.s32.f32 %v2641_v36  ;;  %v2621_v7 = vor.u32 %v2620_v22, %v2619_v58  ;;  %v2628_v1 = vand.u32 2147483648, %v5717_v28 }
 0x308   :  { %v734_v56 = vmax.f32 %v5774_v60, %v2566_v51  ;;  %v735_v34 = vmax.f32 %v5774_v60, %v2574_v10  ;;  %vm5840_vm2 = vcmp.lt.f32.partialorder %v2623_v29, 8388608.0  ;;  %vm5844_vm3 = vcmp.lt.f32.partialorder %v2631_v25, 8388608.0 }
 0x309   :  { %v2635_v61 = vand.u32 2147483647, %v2634_v49  ;;  %v2650_v53 = vcvt.s32.f32 %v2649_v35  ;;  %v2614_v9 = vsel %vm5817_vm0, %v2613_v0, %v5708_v32  ;;  %v2629_v36 = vor.u32 %v2628_v1, %v2627_v42 }
 0x30a   :  { %v2636_v18 = vand.u32 2147483648, %v5721_v38  ;;  %v2657_v51 = vcvt.f32.s32 %v5738_v3  ;;  %vm5853_vm4 = vcmp.lt.f32.partialorder %v2639_v44, 8388608.0  ;;  %v2643_v58 = vand.u32 2147483647, %v2642_v47 }
 0x30b   :  { %v2644_v29 = vand.u32 2147483648, %v5730_v20  ;;  %v2647_v25 = vand.u32 2147483647, %v5734_v27  ;;  %v2622_v49 = vsel %vm5832_vm1, %v2621_v7, %v5712_v23  ;;  %v736_v4 = vmax.f32 %v5774_v60, %v2582_v45 }
 0x30c   :  { %v894_v35 = vmin.f32 %v5776_v46, %v734_v56  ;;  %v895_v0 = vmin.f32 %v5776_v46, %v735_v34  ;;  %v2637_v22 = vor.u32 %v2636_v18, %v2635_v61  ;;  %v2651_v42 = vand.u32 2147483647, %v2650_v53 }
 0x30d   :  { %v2652_v44 = vand.u32 2147483648, %v5734_v27  ;;  %v2655_v47 = vand.u32 2147483647, %v5738_v3  ;;  %v2630_v1 = vsel %vm5840_vm2, %v2629_v36, %v5717_v28  ;;  %v2658_v55 = vcvt.s32.f32 %v2657_v51 }
 0x30e   :  { %v2665_v63 = vcvt.f32.s32 %v5744_v37  ;;  %v737_v7 = vmax.f32 %v5774_v60, %v2590_v39  ;;  %v2645_v45 = vor.u32 %v2644_v29, %v2643_v58  ;;  %vm5872_vm5 = vcmp.lt.f32.partialorder %v2647_v25, 8388608.0 }
 0x30f   :  { %v2660_v34 = vand.u32 2147483648, %v5738_v3  ;;  %v2663_v61 = vand.u32 2147483647, %v5744_v37  ;;  %v738_v53 = vmax.f32 %v5774_v60, %v2598_v30  ;;  %v896_v18 = vmin.f32 %v5776_v46, %v736_v4 }
 0x310   :  { %v1054_v59 = vsub.f32 %v894_v35, %v5681_v31  ;;  %v1055_v36 = vsub.f32 %v895_v0, %v5685_v54  ;;  %v2638_v39 = vsel %vm5844_vm3, %v2637_v22, %v5721_v38  ;;  %v2653_v51 = vor.u32 %v2652_v44, %v2651_v42 }
 0x311   :  { %v2668_v58 = vand.u32 2147483648, %v5744_v37  ;;  %v2673_v29 = vcvt.f32.s32 %v5749_v57  ;;  %v2659_v25 = vand.u32 2147483647, %v2658_v55  ;;  %v2666_v50 = vcvt.s32.f32 %v2665_v63 }
 0x312   :  { %v739_v41 = vmax.f32 %v5774_v60, %v2606_v19  ;;  %v897_v30 = vmin.f32 %v5776_v46, %v737_v7  ;;  %v2646_v31 = vsel %vm5853_vm4, %v2645_v45, %v5730_v20  ;;  %v2671_v54 = vand.u32 2147483647, %v5749_v57 }
 0x313   :  { %v2681_v21 = vcvt.f32.s32 %v5754_v26  ;;  %v740_v4 = vmax.f32 %v5774_v60, %v2614_v9  ;;  %vm5895_vm6 = vcmp.lt.f32.partialorder %v2655_v47, 8388608.0  ;;  %v898_v55 = vmin.f32 %v5776_v46, %v738_v53 }
 0x314   :  { %v1056_v19 = vsub.f32 %v896_v18, %v5689_v48  ;;  %v1214_v0 = vmul.f32 %v1054_v59, %v1054_v59  ;;  %v1215_v22 = vmul.f32 %v1055_v36, %v1055_v36  ;;  %v2654_v10 = vsel %vm5872_vm5, %v2653_v51, %v5734_v27 }
 0x315   :  { %v2674_v42 = vcvt.s32.f32 %v2673_v29  ;;  %v2676_v44 = vand.u32 2147483648, %v5749_v57  ;;  %v741_v63 = vmax.f32 %v5774_v60, %v2622_v49  ;;  %v2661_v9 = vor.u32 %v2660_v34, %v2659_v25 }
 0x316   :  { %vm5906_vm7 = vcmp.lt.f32.partialorder %v2663_v61, 8388608.0  ;;  %v2667_v7 = vand.u32 2147483647, %v2666_v50  ;;  %v899_v45 = vmin.f32 %v5776_v46, %v739_v41  ;;  %v1057_v48 = vsub.f32 %v897_v30, %v5694_v40  ;;  %v6729_v61 = vld [vmem:[#allocation8_spill] sm:$0xff] }
 0x317   :  { %v2679_v53 = vand.u32 2147483647, %v5754_v26  ;;  %v2682_v18 = vcvt.s32.f32 %v2681_v21  ;;  %v742_v56 = vmax.f32 %v5774_v60, %v2630_v1  ;;  %v900_v59 = vmin.f32 %v5776_v46, %v740_v4 }
 0x318   :  { %v1058_v36 = vsub.f32 %v898_v55, %v5700_v33  ;;  %v1216_v49 = vmul.f32 %v1056_v19, %v1056_v19  ;;  %v1381_v34 = vadd.f32 %v1215_v22, %v1214_v0  ;;  %v5917_v51 = vadd.s32 72, %v6729_v61 }
 0x319   :  { %v2675_v29 = vand.u32 2147483647, %v2674_v42  ;;  %v2684_v50 = vand.u32 2147483648, %v5754_v26  ;;  %v743_v41 = vmax.f32 %v5774_v60, %v2638_v39  ;;  %v901_v40 = vmin.f32 %v5776_v46, %v741_v63 }
 0x31a   :  { %v1059_v25 = vsub.f32 %v899_v45, %v5704_v6  ;;  %v1217_v30 = vmul.f32 %v1057_v48, %v1057_v48  ;;  %v1382_v1 = vadd.f32 %v1381_v34, %v1216_v49  ;;  %v207_v21 = vcvt.s32.f32 %v5917_v51 }
 0x31b   :  { %v2669_v4 = vor.u32 %v2668_v58, %v2667_v7  ;;  %v2683_v33 = vand.u32 2147483647, %v2682_v18  ;;  %v744_v55 = vmax.f32 %v5774_v60, %v2646_v31  ;;  %v902_v19 = vmin.f32 %v5776_v46, %v742_v56  ;;  %v6730_v18 = vld [vmem:[#allocation20_spill] sm:$0xff] }
 0x31c   :  { %v1060_v0 = vsub.f32 %v900_v59, %v5708_v32  ;;  %v1218_v22 = vmul.f32 %v1058_v36, %v1058_v36  ;;  %v1383_v42 = vadd.f32 %v1382_v1, %v1217_v30  ;;  %v217_v39 = vmul.f32 0.01, %v207_v21 }
 0x31d   :  { %v2662_v6 = vsel %vm5895_vm6, %v2661_v9, %v5738_v3  ;;  %v2677_v63 = vor.u32 %v2676_v44, %v2675_v29  ;;  %v745_v45 = vmax.f32 %v5774_v60, %v2654_v10  ;;  %v903_v58 = vmin.f32 %v5776_v46, %v743_v41 }
 0x31e   :  { %v1061_v31 = vsub.f32 %v901_v40, %v5712_v23  ;;  %v1219_v7 = vmul.f32 %v1059_v25, %v1059_v25  ;;  %v1384_v48 = vadd.f32 %v1383_v42, %v1218_v22  ;;  %v228_v32 = vsub.f32 %v6730_v18, %v217_v39 }
 0x31f   :  { %v2670_v56 = vsel %vm5906_vm7, %v2669_v4, %v5744_v37  ;;  %vm5939_vm8 = vcmp.lt.f32.partialorder %v2671_v54, 8388608.0  ;;  %v2685_v35 = vor.u32 %v2684_v50, %v2683_v33  ;;  %v746_v44 = vmax.f32 %v5774_v60, %v2662_v6 }
 0x320   :  { %v904_v10 = vmin.f32 %v5776_v46, %v744_v55  ;;  %v1062_v9 = vsub.f32 %v902_v19, %v5717_v28  ;;  %v1220_v23 = vmul.f32 %v1060_v0, %v1060_v0  ;;  %v1385_v36 = vadd.f32 %v1384_v48, %v1219_v7 }
 0x321   :  { %v2678_v49 = vsel %vm5939_vm8, %v2677_v63, %v5749_v57  ;;  %vm2680_vm9 = vcmp.lt.f32.partialorder %v2679_v53, 8388608.0  ;;  %v747_v47 = vmax.f32 %v5774_v60, %v2670_v56  ;;  %v5950_v54 = vmul.f32 0.003921569, %v228_v32 }
 0x322   :  { %v905_v34 = vmin.f32 %v5776_v46, %v745_v45  ;;  %v1063_v29 = vsub.f32 %v903_v58, %v5721_v38  ;;  %v1221_v50 = vmul.f32 %v1061_v31, %v1061_v31  ;;  %v1386_v41 = vadd.f32 %v1385_v36, %v1220_v23 }
 0x323   :  { %v2686_v40 = vsel %vm2680_vm9, %v2685_v35, %v5754_v26  ;;  %v748_v28 = vmax.f32 %v5774_v60, %v2678_v49  ;;  %v906_v25 = vmin.f32 %v5776_v46, %v746_v44  ;;  %v1064_v30 = vsub.f32 %v904_v10, %v5730_v20 }
 0x324   :  { %v1222_v1 = vmul.f32 %v1062_v9, %v1062_v9  ;;  %v1387_v53 = vadd.f32 %v1386_v41, %v1221_v50  ;;  %v749_v4 = vmax.f32 %v5774_v60, %v2686_v40  ;;  %2985 = vrcp.f32 %v5950_v54 }
 0x325   :  { %v907_v33 = vmin.f32 %v5776_v46, %v747_v47  ;;  %v1065_v38 = vsub.f32 %v905_v34, %v5734_v27  ;;  %v1223_v55 = vmul.f32 %v1063_v29, %v1063_v29  ;;  %v908_v0 = vmin.f32 %v5776_v46, %v748_v28 }
 0x326   :  { %v1388_v19 = vadd.f32 %v1387_v53, %v1222_v1  ;;  %v1066_v22 = vsub.f32 %v906_v25, %v5738_v3  ;;  %v1224_v42 = vmul.f32 %v1064_v30, %v1064_v30  ;;  %v909_v20 = vmin.f32 %v5776_v46, %v749_v4  ;;  %v6735_v30 = vld [vmem:[#allocation16_spill] sm:$0xff]  ;;  %v6736_v53 = vld [vmem:[#allocation17_spill] sm:$0xff] }
 0x327   :  { %v1067_v6 = vsub.f32 %v907_v33, %v5744_v37  ;;  %v1225_v63 = vmul.f32 %v1065_v38, %v1065_v38  ;;  %v1068_v45 = vsub.f32 %v908_v0, %v5749_v57 }
 0x328   :  { %v1389_v39 = vadd.f32 %v1388_v19, %v1223_v55  ;;  %v1226_v58 = vmul.f32 %v1066_v22, %v1066_v22  ;;  %v1069_v27 = vsub.f32 %v909_v20, %v5754_v26 }
 0x329   :  { %v1227_v7 = vmul.f32 %v1067_v6, %v1067_v6  ;;  %v1228_v18 = vmul.f32 %v1068_v45, %v1068_v45 }
 0x32a   :  { %v1390_v60 = vadd.f32 %v1389_v39, %v1224_v42  ;;  %v1229_v3 = vmul.f32 %v1069_v27, %v1069_v27 }
 0x32c   :  { %v1391_v31 = vadd.f32 %v1390_v60, %v1225_v63 }
 0x32e   :  { %v1392_v48 = vadd.f32 %v1391_v31, %v1226_v58 }
 0x330   :  { %v1393_v32 = vadd.f32 %v1392_v48, %v1227_v7 }
 0x331   :  { %v2986_v56 = vpop.eup %2985 }
 0x332   :  { %v1394_v59 = vadd.f32 %v1393_v32, %v1228_v18  ;;  %v271_v46 = vmul.f32 %v2986_v56, %v3178_v2  ;;  %v5970_v44 = vmul.f32 %v2986_v56, %v3060_v12  ;;  %v5973_v10 = vmul.f32 %v2986_v56, %v3062_v13 }
 0x333   :  { %v5976_v26 = vmul.f32 %v2986_v56, %v3064_v14  ;;  %v5980_v36 = vmul.f32 %v2986_v56, %v3066_v15  ;;  %v5984_v12 = vmul.f32 %v2986_v56, %v3068_v16  ;;  %v5987_v34 = vmul.f32 %v2986_v56, %v3070_v17 }
 0x334   :  { %v1395_v35 = vadd.f32 %v1394_v59, %v1229_v3  ;;  %v1657_v37 = vcvt.f32.s32 %v271_v46  ;;  %v2817_v9 = vcvt.f32.s32 %v5970_v44  ;;  %v1655_v23 = vand.u32 2147483647, %v271_v46 }
 0x335   :  { %v2825_v2 = vcvt.f32.s32 %v5973_v10  ;;  %v1660_v47 = vand.u32 2147483648, %v271_v46  ;;  %v5990_v13 = vmul.f32 %v2986_v56, %v6523_v8  ;;  %v5993_v14 = vmul.f32 %v2986_v56, %v6652_v52 }
 0x336   :  { %1396 = vadd.xlane.f32.xlu1 %v1395_v35  ;;  %v1658_v57 = vcvt.s32.f32 %v1657_v37  ;;  %v2818_v29 = vcvt.s32.f32 %v2817_v9  ;;  %v2833_v15 = vcvt.f32.s32 %v5976_v26  ;;  %vm5996_vm10 = vcmp.lt.f32.partialorder %v1655_v23, 8388608.0 }
 0x337   :  { %v6001_v41 = vmul.f32 %v2986_v56, %v6653_v11  ;;  %v6004_v16 = vmul.f32 %v2986_v56, %v6654_v24  ;;  %v2841_v17 = vcvt.f32.s32 %v5980_v36  ;;  %v6008_v40 = vmul.f32 %v2986_v56, %v6695_v62 }
 0x338   :  { %v1659_v49 = vand.u32 2147483647, %v1658_v57  ;;  %v6011_v52 = vmul.f32 %v2986_v56, %v6696_v43  ;;  %v2826_v28 = vcvt.s32.f32 %v2825_v2  ;;  %v6014_v25 = vmul.f32 %v2986_v56, %v6697_v5  ;;  %v6737_v43 = vld [vmem:[#allocation18_spill] sm:$0xff] }
 0x339   :  { %v6017_v1 = vmul.f32 %v2986_v56, %v6735_v30  ;;  %v2815_v11 = vand.u32 2147483647, %v5970_v44  ;;  %v2823_v24 = vand.u32 2147483647, %v5973_v10  ;;  %v6022_v4 = vmul.f32 %v2986_v56, %v6736_v53 }
 0x33a   :  { %v1661_v8 = vor.u32 %v1660_v47, %v1659_v49  ;;  %v2819_v33 = vand.u32 2147483647, %v2818_v29  ;;  %v2834_v62 = vcvt.s32.f32 %v2833_v15  ;;  %v2849_v38 = vcvt.f32.s32 %v5984_v12 }
 0x33b   :  { %v6026_v55 = vmul.f32 %v2986_v56, %v6737_v43  ;;  %v2820_v5 = vand.u32 2147483648, %v5970_v44  ;;  %v2831_v19 = vand.u32 2147483647, %v5976_v26  ;;  %v2842_v0 = vcvt.s32.f32 %v2841_v17 }
 0x33c   :  { %v1662_v22 = vsel %vm5996_vm10, %v1661_v8, %v271_v46  ;;  %v2827_v42 = vand.u32 2147483647, %v2826_v28  ;;  %v2828_v39 = vand.u32 2147483648, %v5973_v10  ;;  %v2857_v20 = vcvt.f32.s32 %v5987_v34 }
 0x33d   :  { %vm6034_vm11 = vcmp.lt.f32.partialorder %v2815_v11, 8388608.0  ;;  %vm6038_vm12 = vcmp.lt.f32.partialorder %v2823_v24, 8388608.0  ;;  %v2836_v60 = vand.u32 2147483648, %v5976_v26  ;;  %v2865_v45 = vcvt.f32.s32 %v5990_v13 }
 0x33e   :  { %v2821_v58 = vor.u32 %v2820_v5, %v2819_v33  ;;  %v2835_v31 = vand.u32 2147483647, %v2834_v62  ;;  %v2839_v27 = vand.u32 2147483647, %v5980_v36  ;;  %v2850_v7 = vcvt.s32.f32 %v2849_v38 }
 0x33f   :  { %v6045_v48 = vsub.f32 0.0, %v1662_v22  ;;  %vm6047_vm13 = vcmp.lt.f32.partialorder %v2831_v19, 8388608.0  ;;  %v2843_v32 = vand.u32 2147483647, %v2842_v0  ;;  %v2873_v56 = vcvt.f32.s32 %v5993_v14 }
 0x340   :  { %v6052_v3 = vsub.f32 255.0, %v1662_v22  ;;  %v2829_v59 = vor.u32 %v2828_v39, %v2827_v42  ;;  %v2847_v35 = vand.u32 2147483647, %v5984_v12  ;;  %v2858_v46 = vcvt.s32.f32 %v2857_v20 }
 0x341   :  { %v2844_v37 = vand.u32 2147483648, %v5980_v36  ;;  %v2855_v57 = vand.u32 2147483647, %v5987_v34  ;;  %v2866_v9 = vcvt.s32.f32 %v2865_v45  ;;  %v2881_v23 = vcvt.f32.s32 %v6001_v41 }
 0x342   :  { %v2822_v49 = vsel %vm6034_vm11, %v2821_v58, %v5970_v44  ;;  %v2837_v2 = vor.u32 %v2836_v60, %v2835_v31  ;;  %vm6061_vm14 = vcmp.lt.f32.partialorder %v2839_v27, 8388608.0  ;;  %v2851_v29 = vand.u32 2147483647, %v2850_v7 }
 0x343   :  { %v2845_v15 = vor.u32 %v2844_v37, %v2843_v32  ;;  %v2852_v50 = vand.u32 2147483648, %v5984_v12  ;;  %v2863_v17 = vand.u32 2147483647, %v5990_v13  ;;  %v2874_v8 = vcvt.s32.f32 %v2873_v56 }
 0x344   :  { %v2830_v28 = vsel %vm6038_vm12, %v2829_v59, %v5973_v10  ;;  %vm6070_vm15 = vcmp.lt.f32.partialorder %v2847_v35, 8388608.0  ;;  %v2859_v11 = vand.u32 2147483647, %v2858_v46  ;;  %v2889_v24 = vcvt.f32.s32 %v6004_v16 }
 0x345   :  { %vm6075_vm0 = vcmp.lt.f32.partialorder %v2855_v57, 8388608.0  ;;  %v2867_v33 = vand.u32 2147483647, %v2866_v9  ;;  %v2871_v62 = vand.u32 2147483647, %v5993_v14  ;;  %v2882_v38 = vcvt.s32.f32 %v2881_v23 }
 0x346   :  { %v2838_v43 = vsel %vm6047_vm13, %v2837_v2, %v5976_v26  ;;  %v2853_v5 = vor.u32 %v2852_v50, %v2851_v29  ;;  %v2860_v19 = vand.u32 2147483648, %v5987_v34  ;;  %v2868_v0 = vand.u32 2147483648, %v5990_v13 }
 0x347   :  { %v2846_v22 = vsel %vm6061_vm14, %v2845_v15, %v5980_v36  ;;  %vm6088_vm1 = vcmp.lt.f32.partialorder %v2863_v17, 8388608.0  ;;  %v2875_v39 = vand.u32 2147483647, %v2874_v8  ;;  %v2879_v20 = vand.u32 2147483647, %v6001_v41 }
 0x348   :  { %v2861_v6 = vor.u32 %v2860_v19, %v2859_v11  ;;  %v2887_v63 = vand.u32 2147483647, %v6004_v16  ;;  %v2890_v60 = vcvt.s32.f32 %v2889_v24  ;;  %v2897_v45 = vcvt.f32.s32 %v6008_v40 }
 0x349   :  { %v2869_v58 = vor.u32 %v2868_v0, %v2867_v33  ;;  %vm6095_vm2 = vcmp.lt.f32.partialorder %v2871_v62, 8388608.0  ;;  %v2876_v27 = vand.u32 2147483648, %v5993_v14  ;;  %v2883_v7 = vand.u32 2147483647, %v2882_v38 }
 0x34a   :  { %v2854_v18 = vsel %vm6070_vm15, %v2853_v5, %v5984_v12  ;;  %v2884_v32 = vand.u32 2147483648, %v6001_v41  ;;  %v766_v56 = vmax.f32 %v6045_v48, %v2822_v49  ;;  %v767_v59 = vmax.f32 %v6045_v48, %v2830_v28 }
 0x34b   :  { %v2877_v35 = vor.u32 %v2876_v27, %v2875_v39  ;;  %vm6106_vm3 = vcmp.lt.f32.partialorder %v2879_v20, 8388608.0  ;;  %v2895_v37 = vand.u32 2147483647, %v6008_v40  ;;  %v2905_v57 = vcvt.f32.s32 %v6011_v52 }
 0x34c   :  { %v2862_v9 = vsel %vm6075_vm0, %v2861_v6, %v5987_v34  ;;  %vm6115_vm4 = vcmp.lt.f32.partialorder %v2887_v63, 8388608.0  ;;  %v2891_v49 = vand.u32 2147483647, %v2890_v60  ;;  %v2898_v2 = vcvt.s32.f32 %v2897_v45 }
 0x34d   :  { %v2870_v47 = vsel %vm6088_vm1, %v2869_v58, %v5990_v13  ;;  %v2885_v29 = vor.u32 %v2884_v32, %v2883_v7  ;;  %v2892_v15 = vand.u32 2147483648, %v6004_v16  ;;  %v2900_v50 = vand.u32 2147483648, %v6008_v40 }
 0x34e   :  { %v2903_v17 = vand.u32 2147483647, %v6011_v52  ;;  %v768_v8 = vmax.f32 %v6045_v48, %v2838_v43  ;;  %v926_v28 = vmin.f32 %v6052_v3, %v766_v56  ;;  %v927_v30 = vmin.f32 %v6052_v3, %v767_v59 }
 0x34f   :  { %v2878_v11 = vsel %vm6095_vm2, %v2877_v35, %v5993_v14  ;;  %vm6131_vm5 = vcmp.lt.f32.partialorder %v2895_v37, 8388608.0  ;;  %v2906_v53 = vcvt.s32.f32 %v2905_v57  ;;  %v2913_v33 = vcvt.f32.s32 %v6014_v25 }
 0x350   :  { %v2893_v62 = vor.u32 %v2892_v15, %v2891_v49  ;;  %v2899_v38 = vand.u32 2147483647, %v2898_v2  ;;  %v2908_v5 = vand.u32 2147483648, %v6011_v52  ;;  %v769_v43 = vmax.f32 %v6045_v48, %v2846_v22 }
 0x351   :  { %v2886_v19 = vsel %vm6106_vm3, %v2885_v29, %v6001_v41  ;;  %v2911_v0 = vand.u32 2147483647, %v6014_v25  ;;  %v2916_v42 = vand.u32 2147483648, %v6014_v25  ;;  %v2921_v39 = vcvt.f32.s32 %v6017_v1 }
 0x352   :  { %v770_v20 = vmax.f32 %v6045_v48, %v2854_v18  ;;  %v928_v6 = vmin.f32 %v6052_v3, %v768_v8  ;;  %v1086_v63 = vsub.f32 %v926_v28, %v5970_v44  ;;  %v1087_v60 = vsub.f32 %v927_v30, %v5973_v10 }
 0x353   :  { %v2907_v45 = vand.u32 2147483647, %v2906_v53  ;;  %v2914_v22 = vcvt.s32.f32 %v2913_v33  ;;  %v2919_v58 = vand.u32 2147483647, %v6017_v1  ;;  %v2929_v31 = vcvt.f32.s32 %v6022_v4 }
 0x354   :  { %v2894_v27 = vsel %vm6115_vm4, %v2893_v62, %v6004_v16  ;;  %v2901_v7 = vor.u32 %v2900_v50, %v2899_v38  ;;  %vm6153_vm6 = vcmp.lt.f32.partialorder %v2903_v17, 8388608.0  ;;  %v771_v18 = vmax.f32 %v6045_v48, %v2862_v9 }
 0x355   :  { %v929_v44 = vmin.f32 %v6052_v3, %v769_v43  ;;  %v2922_v10 = vcvt.s32.f32 %v2921_v39  ;;  %v2924_v56 = vand.u32 2147483648, %v6017_v1  ;;  %v2937_v59 = vcvt.f32.s32 %v6026_v55 }
 0x356   :  { %v772_v35 = vmax.f32 %v6045_v48, %v2870_v47  ;;  %vm6162_vm7 = vcmp.lt.f32.partialorder %v2911_v0, 8388608.0  ;;  %v930_v37 = vmin.f32 %v6052_v3, %v770_v20  ;;  %v1088_v57 = vsub.f32 %v928_v6, %v5976_v26 }
 0x357   :  { %v1246_v23 = vmul.f32 %v1086_v63, %v1086_v63  ;;  %v1247_v49 = vmul.f32 %v1087_v60, %v1087_v60  ;;  %v2909_v9 = vor.u32 %v2908_v5, %v2907_v45  ;;  %v2915_v2 = vand.u32 2147483647, %v2914_v22 }
 0x358   :  { %v2927_v29 = vand.u32 2147483647, %v6022_v4  ;;  %v2930_v15 = vcvt.s32.f32 %v2929_v31  ;;  %v2902_v50 = vsel %vm6131_vm5, %v2901_v7, %v6008_v40  ;;  %vm6172_vm8 = vcmp.lt.f32.partialorder %v2919_v58, 8388608.0 }
 0x359   :  { %v773_v17 = vmax.f32 %v6045_v48, %v2878_v11  ;;  %v931_v8 = vmin.f32 %v6052_v3, %v771_v18  ;;  %v1089_v26 = vsub.f32 %v929_v44, %v5980_v36  ;;  %v2923_v28 = vand.u32 2147483647, %v2922_v10 }
 0x35a   :  { %v2932_v30 = vand.u32 2147483648, %v6022_v4  ;;  %v2938_v53 = vcvt.s32.f32 %v2937_v59  ;;  %v774_v33 = vmax.f32 %v6045_v48, %v2886_v19  ;;  %v932_v62 = vmin.f32 %v6052_v3, %v772_v35 }
 0x35b   :  { %v1090_v24 = vsub.f32 %v930_v37, %v5984_v12  ;;  %v1248_v38 = vmul.f32 %v1088_v57, %v1088_v57  ;;  %v1415_v5 = vadd.f32 %v1247_v49, %v1246_v23  ;;  %v2917_v43 = vor.u32 %v2916_v42, %v2915_v2 }
 0x35c   :  { %v2931_v0 = vand.u32 2147483647, %v2930_v15  ;;  %v2935_v11 = vand.u32 2147483647, %v6026_v55  ;;  %v775_v39 = vmax.f32 %v6045_v48, %v2894_v27  ;;  %v933_v36 = vmin.f32 %v6052_v3, %v773_v17 }
 0x35d   :  { %v1091_v20 = vsub.f32 %v931_v8, %v5987_v34  ;;  %v1249_v6 = vmul.f32 %v1089_v26, %v1089_v26  ;;  %v1416_v63 = vadd.f32 %v1415_v5, %v1248_v38  ;;  %v2910_v19 = vsel %vm6153_vm6, %v2909_v9, %v6011_v52 }
 0x35e   :  { %v2925_v60 = vor.u32 %v2924_v56, %v2923_v28  ;;  %v2939_v12 = vand.u32 2147483647, %v2938_v53  ;;  %v776_v45 = vmax.f32 %v6045_v48, %v2902_v50  ;;  %v934_v42 = vmin.f32 %v6052_v3, %v774_v33 }
 0x35f   :  { %v1092_v22 = vsub.f32 %v932_v62, %v5990_v13  ;;  %v1250_v58 = vmul.f32 %v1090_v24, %v1090_v24  ;;  %v1417_v31 = vadd.f32 %v1416_v63, %v1249_v6  ;;  %v2918_v34 = vsel %vm6162_vm7, %v2917_v43, %v6014_v25 }
 0x360   :  { %v2933_v27 = vor.u32 %v2932_v30, %v2931_v0  ;;  %v2940_v7 = vand.u32 2147483648, %v6026_v55  ;;  %v777_v32 = vmax.f32 %v6045_v48, %v2910_v19  ;;  %v935_v18 = vmin.f32 %v6052_v3, %v775_v39 }
 0x361   :  { %v1093_v44 = vsub.f32 %v933_v36, %v5993_v14  ;;  %v1251_v10 = vmul.f32 %v1091_v20, %v1091_v20  ;;  %v1418_v56 = vadd.f32 %v1417_v31, %v1250_v58  ;;  %v2926_v13 = vsel %vm6172_vm8, %v2925_v60, %v6017_v1 }
 0x362   :  { %vm2928_vm9 = vcmp.lt.f32.partialorder %v2927_v29, 8388608.0  ;;  %v2941_v59 = vor.u32 %v2940_v7, %v2939_v12  ;;  %v778_v35 = vmax.f32 %v6045_v48, %v2918_v34  ;;  %v936_v46 = vmin.f32 %v6052_v3, %v776_v45  ;;  %v1278_v45 = vpop.xlane.xlu1 %1277  ;;  %v6766_v34 = vld [vmem:[#allocation23_spill] sm:$0xff] }
 0x363   :  { %v1094_v37 = vsub.f32 %v934_v42, %v6001_v41  ;;  %v1252_v57 = vmul.f32 %v1092_v22, %v1092_v22  ;;  %v1419_v23 = vadd.f32 %v1418_v56, %v1251_v10  ;;  %v2934_v49 = vsel %vm2928_vm9, %v2933_v27, %v6022_v4  ;;  %v1346_v42 = vpop.xlane.xlu0 %1345 }
 0x364   :  { %vm2936_vm10 = vcmp.lt.f32.partialorder %v2935_v11, 8388608.0  ;;  %v779_v14 = vmax.f32 %v6045_v48, %v2926_v13  ;;  %v937_v9 = vmin.f32 %v6052_v3, %v777_v32  ;;  %v1095_v2 = vsub.f32 %v935_v18, %v6004_v16  ;;  %v6768_v32 = vld [vmem:[#allocation30_spill] sm:$0xff] }
 0x365   :  { %v1253_v15 = vmul.f32 %v1093_v44, %v1093_v44  ;;  %v1420_v29 = vadd.f32 %v1419_v23, %v1252_v57  ;;  %v2942_v50 = vsel %vm2936_vm10, %v2941_v59, %v6026_v55  ;;  %v780_v47 = vmax.f32 %v6045_v48, %v2934_v49  ;;  %v6769_v44 = vld [vmem:[#allocation35_spill] sm:$0xff]  ;;  %v6770_v13 = vld [vmem:[#allocation26_spill] sm:$0xff] }
 0x366   :  { %v938_v17 = vmin.f32 %v6052_v3, %v778_v35  ;;  %v1096_v41 = vsub.f32 %v936_v46, %v6008_v40  ;;  %v1254_v8 = vmul.f32 %v1094_v37, %v1094_v37  ;;  %v781_v28 = vmax.f32 %v6045_v48, %v2942_v50  ;;  %v6771_v35 = vld [vmem:[#allocation34_spill] sm:$0xff]  ;;  %v6772_v37 = vld [vmem:[#allocation29_spill] sm:$0xff]  ;;  %v6773_v23 = vld [vmem:[#allocation31_spill] sm:$0xff] }
 0x367   :  { %v1421_v26 = vadd.f32 %v1420_v29, %v1253_v15  ;;  %v939_v30 = vmin.f32 %v6052_v3, %v779_v14  ;;  %v1097_v53 = vsub.f32 %v937_v9, %v6011_v52  ;;  %v1255_v33 = vmul.f32 %v1095_v2, %v1095_v2  ;;  %v1312_v22 = vpop.xlane.xlu0 %1311  ;;  %v6774_v29 = vld [vmem:[#allocation24_spill] sm:$0xff] }
 0x368   :  { %v940_v62 = vmin.f32 %v6052_v3, %v780_v47  ;;  %v1098_v24 = vsub.f32 %v938_v17, %v6014_v25  ;;  %v1256_v38 = vmul.f32 %v1096_v41, %v1096_v41  ;;  %v941_v43 = vmin.f32 %v6052_v3, %v781_v28  ;;  %v1295_v3 = vpop.xlane.xlu1 %1294 }
 0x369   :  { %v1422_v16 = vadd.f32 %v1421_v26, %v1254_v8  ;;  %v1099_v40 = vsub.f32 %v939_v30, %v6017_v1  ;;  %v1257_v0 = vmul.f32 %v1097_v53, %v1097_v53  ;;  %v1432_v27 = vmul.f32 %v6766_v34, %v6766_v34 }
 0x36a   :  { %v1100_v48 = vsub.f32 %v940_v62, %v6022_v4  ;;  %v1258_v39 = vmul.f32 %v1098_v24, %v1098_v24  ;;  %v1101_v52 = vsub.f32 %v941_v43, %v6026_v55  ;;  %v6767_v55 = vld [vmem:[#allocation21_spill] sm:$0xff]  ;;  %v1437_v18 = vmul.f32 %v6768_v32, %v6768_v32  ;;  %v6780_v32 = vld [vmem:[#allocation32_spill] sm:$0xff] }
 0x36b   :  { %v1423_v5 = vadd.f32 %v1422_v16, %v1255_v33  ;;  %v1259_v20 = vmul.f32 %v1099_v40, %v1099_v40  ;;  %v1380_v31 = vpop.xlane.xlu0 %1379  ;;  %v1436_v7 = vmul.f32 %v6767_v55, %v6767_v55  ;;  %v1439_v10 = vmul.f32 %v6769_v44, %v6769_v44 }
 0x36c   :  { %v1260_v63 = vmul.f32 %v1100_v48, %v1100_v48  ;;  %v1261_v60 = vmul.f32 %v1101_v52, %v1101_v52  ;;  %v1363_v1 = vpop.xlane.xlu1 %1362  ;;  %v1433_v59 = vmul.f32 %v6770_v13, %v6770_v13  ;;  %v1435_v46 = vmul.f32 %v6771_v35, %v6771_v35 }
 0x36d   :  { %v1424_v11 = vadd.f32 %v1423_v5, %v1256_v38  ;;  %v1438_v57 = vmul.f32 %v6772_v37, %v6772_v37  ;;  %v1440_v49 = vmul.f32 %v6773_v23, %v6773_v23  ;;  %v1442_v14 = vmul.f32 %v1432_v27, %v1278_v45  ;;  %v6778_v27 = vld [vmem:[#allocation22_spill] sm:$0xff]  ;;  %v6786_v37 = vld [vmem:[#allocation27_spill] sm:$0xff] }
 0x36e   :  { %v1446_v9 = vmul.f32 %v1436_v7, %v1346_v42  ;;  %v1447_v2 = vmul.f32 %v1437_v18, %v1363_v1  ;;  %v1434_v50 = vmul.f32 %v6774_v29, %v6774_v29  ;;  %v1443_v47 = vmul.f32 %v1433_v59, %v1295_v3  ;;  %v6784_v59 = vld [vmem:[#allocation28_spill] sm:$0xff] }
 0x36f   :  { %v1425_v36 = vadd.f32 %v1424_v11, %v1257_v0  ;;  %v1414_v56 = vpop.xlane.xlu0 %1413  ;;  %v1448_v41 = vmul.f32 %v1438_v57, %v1380_v31  ;;  %vm1452_vm11 = vcmp.ne.f32.partialorder %v1442_v14, %v1442_v14  ;;  %v1441_v28 = vmul.f32 %v5950_v54, %v5950_v54  ;;  %v6776_v31 = vld [vmem:[#allocation25_spill] sm:$0xff] }
 0x370   :  { %v1450_v8 = vmul.f32 %v1440_v49, %v1414_v56  ;;  %v1444_v26 = vmul.f32 %v1434_v50, %v1312_v22  ;;  %vm1456_vm12 = vcmp.ne.f32.partialorder %v1446_v9, %v1446_v9  ;;  %vm1457_vm13 = vcmp.ne.f32.partialorder %v1447_v2, %v1447_v2  ;;  %v6790_v50 = vld [vmem:[#allocation9_spill] sm:$0xff] }
 0x371   :  { %v1426_v6 = vadd.f32 %v1425_v36, %v1258_v39  ;;  %vm1453_vm15 = vcmp.ne.f32.partialorder %v1443_v47, %v1443_v47  ;;  %vm1458_vm1 = vcmp.ne.f32.partialorder %v1448_v41, %v1448_v41  ;;  %v1462_v53 = vsel %vm1452_vm11, inf, %v1442_v14 }
 0x372   :  { %vm1460_vm2 = vcmp.ne.f32.partialorder %v1450_v8, %v1450_v8  ;;  %v1466_v33 = vsel %vm1456_vm12, inf, %v1446_v9  ;;  %v1467_v16 = vsel %vm1457_vm13, inf, %v1447_v2  ;;  %vm1454_vm3 = vcmp.ne.f32.partialorder %v1444_v26, %v1444_v26 }
 0x373   :  { %v1427_v19 = vadd.f32 %v1426_v6, %v1259_v20  ;;  %v1463_v38 = vsel %vm1453_vm15, inf, %v1443_v47  ;;  %v1468_v43 = vsel %vm1458_vm1, inf, %v1448_v41  ;;  %v1470_v40 = vsel %vm1460_vm2, inf, %v1450_v8 }
 0x374   :  { %v1472_v0 = vmin.f32 %v1462_v53, %v1466_v33  ;;  %v1473_v11 = vmin.f32 %v1463_v38, %v1467_v16  ;;  %v1464_v54 = vsel %vm1454_vm3, inf, %v1444_v26  ;;  %v6775_v22 = vcvt.s32.f32 %v6729_v61  ;;  %v6788_v61 = vld [vmem:[#allocation33_spill] sm:$0xff] }
 0x375   :  { %v1428_v25 = vadd.f32 %v1427_v19, %v1260_v63  ;;  %v1474_v36 = vmin.f32 %v1464_v54, %v1468_v43  ;;  %v6779_v55 = vcvt.s32.f32 %v6778_v27  ;;  %v6781_v18 = vcvt.s32.f32 %v6780_v32 }
 0x376   :  { %v1476_v52 = vmin.f32 %v1472_v0, %v1470_v40  ;;  %v6785_v35 = vcvt.s32.f32 %v6784_v59  ;;  %v6787_v57 = vcvt.s32.f32 %v6786_v37  ;;  %v6789_v49 = vcvt.s32.f32 %v6788_v61  ;;  %v2990_v0 = vld [vmem:[#allocation2 + $0x8] sm:$0xff] }
 0x377   :  { %v1429_v12 = vadd.f32 %v1428_v25, %v1261_v60  ;;  %v6791_v47 = vcvt.s32.f32 %v6790_v50 }
 0x379   :  { %1430 = vadd.xlane.f32.xlu1 %v1429_v12 }
 0x387   :  { %v1329_v58 = vpop.xlane.xlu1 %1328 }
 0x388   :  { %v1445_v17 = vmul.f32 %v1435_v46, %v1329_v58 }
 0x38a   :  { %vm1455_vm0 = vcmp.ne.f32.partialorder %v1445_v17, %v1445_v17 }
 0x38b   :  { %v1465_v5 = vsel %vm1455_vm0, inf, %v1445_v17 }
 0x3bf   :  { %v1397_v4 = vpop.xlane.xlu1 %1396 }
 0x3c0   :  { %v1449_v15 = vmul.f32 %v1439_v10, %v1397_v4  ;;  %v6777_v4 = vcvt.s32.f32 %v6776_v31  ;;  %v6782_v10 = vld [vmem:[#allocation19_spill] sm:$0xff] }
 0x3c1   :  { %v6783_v56 = vcvt.s32.f32 %v6782_v10 }
 0x3c2   :  { %vm1459_vm14 = vcmp.ne.f32.partialorder %v1449_v15, %v1449_v15 }
 0x3c3   :  { %v1469_v62 = vsel %vm1459_vm14, inf, %v1449_v15 }
 0x3c4   :  { %v1475_v48 = vmin.f32 %v1465_v5, %v1469_v62 }
 0x3c6   :  { %v1479_v63 = vmin.f32 %v1474_v36, %v1475_v48 }
 0x402   :  { %v1431_v30 = vpop.xlane.xlu1 %1430 }
 0x403   :  { %v1451_v24 = vmul.f32 %v1441_v28, %v1431_v30 }
 0x405   :  { %vm1461_vm4 = vcmp.ne.f32.partialorder %v1451_v24, %v1451_v24 }
 0x406   :  { %v1471_v39 = vsel %vm1461_vm4, inf, %v1451_v24 }
 0x407   :  { %v1477_v20 = vmin.f32 %v1473_v11, %v1471_v39 }
 0x409   :  { %v1478_v6 = vmin.f32 %v1476_v52, %v1477_v20 }
 0x40b   :  { %v1480_v19 = vmin.f32 %v1478_v6, %v1479_v63 }
 0x40d   :  { %v1481_v60 = vrot.slane %v1480_v19, 4 }
 0x40f   :  { %v1482_v25 = vmin.f32 %v1480_v19, %v1481_v60 }
 0x411   :  { %v1483_v12 = vrot.slane %v1482_v25, 2 }
 0x413   :  { %v1484_v45 = vmin.f32 %v1482_v25, %v1483_v12 }
 0x415   :  { %v1485_v3 = vrot.slane %v1484_v45, 1 }
 0x417   :  { %v1486_v42 = vmin.f32 %v1484_v45, %v1485_v3 }
 0x419   :  { %2943 = vpush %v1486_v42 }
 0x44a   :  { %s6243_s14 = spop %2943 }
 0x44b   :  { %v1488_v1 = vstv %s6243_s14  ;;  %p1578_p5 = scmp.lt.f32.partialorder %s6243_s14, inf }
 0x44c   :  { %vm1489_vm5 = vcmp.eq.f32.partialorder %v1462_v53, %v1488_v1  ;;  %vm1490_vm6 = vcmp.eq.f32.partialorder %v1463_v38, %v1488_v1  ;;  %vm1491_vm7 = vcmp.eq.f32.partialorder %v1464_v54, %v1488_v1  ;;  %vm1492_vm8 = vcmp.eq.f32.partialorder %v1465_v5, %v1488_v1 }
 0x44d   :  { %vm1493_vm9 = vcmp.eq.f32.partialorder %v1466_v33, %v1488_v1  ;;  %vm1494_vm10 = vcmp.eq.f32.partialorder %v1467_v16, %v1488_v1  ;;  %vm1495_vm11 = vcmp.eq.f32.partialorder %v1468_v43, %v1488_v1  ;;  %vm1496_vm12 = vcmp.eq.f32.partialorder %v1469_v62, %v1488_v1  ;;  %v2989_v43 = vld [vmem:[#allocation2] sm:$0xff] }
 0x44e   :  { %vm1497_vm13 = vcmp.eq.f32.partialorder %v1470_v40, %v1488_v1  ;;  %vm1498_vm14 = vcmp.eq.f32.partialorder %v1471_v39, %v1488_v1  ;;  %v1499_v58 = vsel %vm1489_vm5, %v6775_v22, 80.0  ;;  %v1500_v34 = vsel %vm1490_vm6, %v6777_v4, 80.0 }
 0x44f   :  { %v1501_v7 = vsel %vm1491_vm7, %v6779_v55, 80.0  ;;  %v1502_v44 = vsel %vm1492_vm8, %v6781_v18, 80.0  ;;  %v1503_v13 = vsel %vm1493_vm9, %v6783_v56, 80.0  ;;  %v1504_v46 = vsel %vm1494_vm10, %v6785_v35, 80.0 }
 0x450   :  { %v1505_v23 = vsel %vm1495_vm11, %v6787_v57, 80.0  ;;  %v1506_v14 = vsel %vm1496_vm12, %v6789_v49, 80.0  ;;  %v1509_v9 = vmin.f32 %v1499_v58, %v1503_v13  ;;  %v1510_v2 = vmin.f32 %v1500_v34, %v1504_v46 }
 0x451   :  { %v1511_v15 = vmin.f32 %v1501_v7, %v1505_v23  ;;  %v1512_v29 = vmin.f32 %v1502_v44, %v1506_v14  ;;  %v1507_v17 = vsel %vm1497_vm13, %v6791_v47, 80.0  ;;  %v1508_v41 = vsel %vm1498_vm14, %v207_v21, 80.0 }
 0x452   :  { %v1513_v8 = vmin.f32 %v1509_v9, %v1507_v17  ;;  %v1514_v26 = vmin.f32 %v1510_v2, %v1508_v41 }
 0x453   :  { %v1516_v30 = vmin.f32 %v1511_v15, %v1512_v29 }
 0x454   :  { %v1515_v28 = vmin.f32 %v1513_v8, %v1514_v26 }
 0x456   :  { %v1517_v53 = vmin.f32 %v1515_v28, %v1516_v30 }
 0x458   :  { %v1518_v33 = vrot.slane %v1517_v53, 4 }
 0x45a   :  { %v1519_v16 = vmin.f32 %v1517_v53, %v1518_v33 }
 0x45c   :  { %v1520_v62 = vrot.slane %v1519_v16, 2 }
 0x45e   :  { %v1521_v24 = vmin.f32 %v1519_v16, %v1520_v62 }
 0x460   :  { %v1522_v38 = vrot.slane %v1521_v24, 1 }
 0x462   :  { %v1523_v5 = vmin.f32 %v1521_v24, %v1522_v38 }
 0x464   :  { %2945 = vpush %v1523_v5 }
 0x495   :  { %s2946_s15 = spop %2945 }
 0x496   :  { %s6793_s15 = smov (!%p1578_p5, %s2946_s15), 0.0 }
 0x497   :  { %s1527_s16 = smul.f32 0.01, %s6793_s15 }
 0x499   :  { %s1528_s17 = ssub.f32 %s3165_s12, %s1527_s16 }
 0x49b   :  { %s1531_s18 = smul.f32 0.003921569, %s1528_s17 }
 0x49d   :  { %v1532_v51 = vstv %s1531_s18 }
 0x49e   :  { %2987 = vrcp.f32 %v1532_v51 }
 0x4ab   :  { %v2988_v21 = vpop.eup %2987 }
 0x4ac   :  { %2947 = vpush %v2988_v21  ;;  %v1546_v40 = vmul.f32 %v2989_v43, %v2988_v21  ;;  %v1547_v11 = vmul.f32 %v2990_v0, %v2988_v21 }
 0x4ae   :  { %v2951_v48 = vcvt.f32.s32 %v1546_v40  ;;  %v2959_v54 = vcvt.f32.s32 %v1547_v11  ;;  %v2954_v6 = vand.u32 2147483648, %v1546_v40  ;;  %v2962_v63 = vand.u32 2147483648, %v1547_v11 }
 0x4af   :  { %v2949_v19 = vand.u32 2147483647, %v1546_v40  ;;  %v2957_v60 = vand.u32 2147483647, %v1547_v11 }
 0x4b0   :  { %v2952_v39 = vcvt.s32.f32 %v2951_v48  ;;  %v2960_v36 = vcvt.s32.f32 %v2959_v54 }
 0x4b1   :  { %vm2950_vm15 = vcmp.lt.f32.partialorder %v2949_v19, 8388608.0  ;;  %vm2958_vm0 = vcmp.lt.f32.partialorder %v2957_v60, 8388608.0 }
 0x4b2   :  { %v2953_v52 = vand.u32 2147483647, %v2952_v39  ;;  %v2961_v20 = vand.u32 2147483647, %v2960_v36 }
 0x4b4   :  { %v2955_v25 = vor.u32 %v2954_v6, %v2953_v52  ;;  %v2963_v12 = vor.u32 %v2962_v63, %v2961_v20 }
 0x4b6   :  { %v2956_v45 = vsel %vm2950_vm15, %v2955_v25, %v1546_v40  ;;  %v2964_v3 = vsel %vm2958_vm0, %v2963_v12, %v1547_v11 }
 0x4dd   :  { %s2948_s19 = spop %2947 }
 0x4de   :  { %s1535_s20 = smul.f32 %s2948_s19, %s260_s13 }
 0x4e0   :  { %s1536_s21 = scvt.f32.s32 %s1535_s20  ;;  %s1541_s22 = sand.u32 2147483647, %s1535_s20 }
 0x4e1   :  { %s1539_s24 = sand.u32 2147483648, %s1535_s20  ;;  %p1542_p6 = scmp.lt.f32.partialorder %s1541_s22, 2.1474836e+09 }
 0x4e2   :  { %s1537_s23 = scvt.s32.f32 %s1536_s21 }
 0x4e4   :  { %s1538_s25 = sand.u32 2147483647, %s1537_s23 }
 0x4e5   :  { %s1540_s26 = sor.u32 %s1539_s24, %s1538_s25 }
 0x4e6   :  { %s6795_s26 = smov (!%p1542_p6, %s1540_s26), %s1535_s20 }
 0x4e7   :  { %v1550_v42 = vstv %s6795_s26 }
 0x4e8   :  { %v1551_v1 = vadd.f32 %v2956_v45, %v1550_v42  ;;  %v1552_v22 = vadd.f32 %v2964_v3, %v1550_v42 }
 0x4ea   :  { %v1553_v58 = vmax.f32 %v1551_v1, 0.0  ;;  %v1554_v31 = vmax.f32 %v1552_v22, 0.0 }
 0x4ec   :  { %v1555_v4 = vmin.f32 %v1553_v58, 255.0  ;;  %v1556_v34 = vmin.f32 %v1554_v31, 255.0 }
 0x4ee   :  { %v1557_v27 = vsub.f32 %v1555_v4, %v1550_v42  ;;  %v1558_v55 = vsub.f32 %v1556_v34, %v1550_v42 }
 0x4f0   :  { %v1559_v7 = vmul.f32 %v1557_v27, %v1532_v51  ;;  %v1560_v32 = vmul.f32 %v1558_v55, %v1532_v51 }
 0x4f2   :  { %1561 = vst [vmem:[#allocation5] sm:$0xff] %v1559_v7  ;;  %1562 = vst [vmem:[#allocation5 + $0x8] sm:$0xff] %v1560_v32 }
 0x4f3   :  { %3022 = shalt.err (!%p3019_p11)
}
 0x4f4   :  { %1572 = dma.vmem_to_hbm [thread:$0]  %s1570_s28, 256, %s6274_s1, [#allocation4]  }
 0x4f5   :  { %3033 = dma.done.wait [#allocation4], 256  }
 0x4f6   :  { %3034 = vsyncadd [#allocation4], 4294967040 }
 0x4f7   :  { %1576 = vsyncpa [#allocation3], 1 }
 0x4f8   :  { %1577 = vsyncpa [#allocation4], 1 }

</bundles_post_ra>
